<compile_context>
chip_gen: v6e
topology: v6e:2x2x1
jax: 0.10.0
libtpu: 0.0.40
codegen_flags: <defaults>
</compile_context>

<pallas_src>
import functools

import numpy as np

import jax
import jax.numpy as jnp
from jax import lax
from jax.experimental import pallas as pl
from jax.experimental.pallas import tpu as pltpu


def _round_up(v, m):
    return ((v + m - 1) // m) * m


# ----------------------------------------------------------------------------
# Fused kernel: conv1+ReLU+pool + conv2+ReLU + fc1+ReLU + fc2 + log_softmax
# ----------------------------------------------------------------------------
def _digit_kernel(xpb_ref, wb1_ref, b1_ref, wb2_ref, b2_ref,
                  wfc1_ref, bfc1_ref, wfc2_ref, bfc2_ref, o_ref, *, tb):
    """One batch tile of `tb` images.

    xpb_ref : (2, 14*tb, 28) bf16   input rows split by parity; row idx*tb+b
                                    holds image-row 2*idx+parity of image b.
    wb1_ref : (5, 28, 256)  bf16    banded conv1 weights, col = q*128+pw*10+co.
    b1_ref  : (1, 128)      f32     conv1 bias tiled over pw (cols >=120 zero).
    wb2_ref : (3, 128, 256) bf16    banded conv2 weights, col = ow*20+co.
    b2_ref  : (1, 256)      f32     conv2 bias tiled over ow (cols >=200 zero).
    wfc1_ref: (10, 256, 512) bf16   fc1 split per conv2 output row oh.
    bfc1_ref: (1, 512)      f32
    wfc2_ref: (512, 10)     bf16
    bfc2_ref: (1, 10)       f32
    o_ref   : (tb, 10)      f32     log-probabilities.
    """
    f32 = jnp.float32

    # ---- conv1 + ReLU + 2x2/2 max-pool (q folded into lanes, p unrolled) ----
    pooled = None
    for p in (0, 1):                                  # pool row parity
        acc = jnp.zeros((12 * tb, 256), f32)
        for dy in range(5):
            a = p + dy
            xs = xpb_ref[a % 2, (a // 2) * tb:(a // 2) * tb + 12 * tb, :]
            acc = acc + jnp.dot(xs, wb1_ref[dy],
                                preferred_element_type=f32)
        y0 = jnp.maximum(acc[:, :128] + b1_ref[...], 0.0)    # q = 0
        y1 = jnp.maximum(acc[:, 128:] + b1_ref[...], 0.0)    # q = 1
        m = jnp.maximum(y0, y1)
        pooled = m if pooled is None else jnp.maximum(pooled, m)
    pooled = pooled.astype(jnp.bfloat16)              # (12*tb, 128)

    # ---- conv2 + ReLU (banded over dy; row layout (ph, b) -> ph*tb + b) ----
    acc2 = jnp.zeros((10 * tb, 256), f32)
    for dy in range(3):
        acc2 = acc2 + jnp.dot(pooled[dy * tb:dy * tb + 10 * tb, :],
                              wb2_ref[dy], preferred_element_type=f32)
    feat = jnp.maximum(acc2 + b2_ref[...], 0.0).astype(jnp.bfloat16)

    # ---- fc1 + ReLU (sum over the 10 conv2 output rows) ----
    h = jnp.zeros((tb, 512), f32)
    for oh in range(10):
        h = h + jnp.dot(feat[oh * tb:(oh + 1) * tb, :], wfc1_ref[oh],
                        preferred_element_type=f32)
    h = jnp.maximum(h + bfc1_ref[...], 0.0).astype(jnp.bfloat16)

    # ---- fc2 + log_softmax ----
    z = jnp.dot(h, wfc2_ref[...], preferred_element_type=f32) + bfc2_ref[...]
    z = z - jnp.max(z, axis=-1, keepdims=True)
    z = z - jnp.log(jnp.sum(jnp.exp(z), axis=-1, keepdims=True))
    o_ref[...] = z.astype(o_ref.dtype)


def _digit_call(xpb, kp, *, tb, n_pad):
    nt = n_pad // tb
    kernel = functools.partial(_digit_kernel, tb=tb)
    w_bytes = sum(int(np.prod(kp[k].shape)) * kp[k].dtype.itemsize
                  for k in ("wb1", "b1", "wb2", "b2",
                            "wfc1", "bfc1", "wfc2", "bfc2"))
    cost = pl.CostEstimate(
        flops=n_pad * 2 * (24 * 24 * 10 * 25 + 10 * 10 * 20 * 90
                           + 256 * 512 * 10 + 512 * 10),
        transcendentals=n_pad * 11,
        bytes_accessed=xpb.size * 2 + w_bytes + n_pad * 10 * 4,
    )
    return pl.pallas_call(
        kernel,
        out_shape=jax.ShapeDtypeStruct((n_pad, 10), jnp.float32),
        grid=(nt,),
        in_specs=[
            pl.BlockSpec((None, 2, 14 * tb, 28), lambda i: (i, 0, 0, 0)),
            pl.BlockSpec((5, 28, 256), lambda i: (0, 0, 0)),     # resident
            pl.BlockSpec((1, 128), lambda i: (0, 0)),
            pl.BlockSpec((3, 128, 256), lambda i: (0, 0, 0)),    # resident
            pl.BlockSpec((1, 256), lambda i: (0, 0)),
            pl.BlockSpec((10, 256, 512), lambda i: (0, 0, 0)),   # resident
            pl.BlockSpec((1, 512), lambda i: (0, 0)),
            pl.BlockSpec((512, 10), lambda i: (0, 0)),
            pl.BlockSpec((1, 10), lambda i: (0, 0)),
        ],
        out_specs=pl.BlockSpec((tb, 10), lambda i: (i, 0)),
        compiler_params=pltpu.CompilerParams(
            dimension_semantics=("parallel",),
            vmem_limit_bytes=32 * 1024 * 1024),
        cost_estimate=cost,
    )(xpb, kp["wb1"], kp["b1"], kp["wb2"], kp["b2"],
      kp["wfc1"], kp["bfc1"], kp["wfc2"], kp["bfc2"])


# ----------------------------------------------------------------------------
# Parameters (PyTorch layout) and one-time kernel-layout repack
# ----------------------------------------------------------------------------
def init_params(key):
    """Random parameters in the original PyTorch layouts."""
    ks = jax.random.split(key, 8)
    s = 0.05
    return {
        "conv1_w": jax.random.normal(ks[0], (10, 1, 5, 5), jnp.float32) * s,
        "conv1_b": jax.random.normal(ks[1], (10,), jnp.float32) * s,
        "conv2_w": jax.random.normal(ks[2], (20, 10, 3, 3), jnp.float32) * s,
        "conv2_b": jax.random.normal(ks[3], (20,), jnp.float32) * s,
        "fc1_w": jax.random.normal(ks[4], (500, 2000), jnp.float32) * s,
        "fc1_b": jax.random.normal(ks[5], (500,), jnp.float32) * s,
        "fc2_w": jax.random.normal(ks[6], (10, 500), jnp.float32) * s,
        "fc2_b": jax.random.normal(ks[7], (10,), jnp.float32) * s,
    }


def prepare_params(params):
    """One-time repack of PyTorch-layout weights into kernel layouts."""
    w1 = np.asarray(params["conv1_w"], np.float32)   # (10, 1, 5, 5)
    b1 = np.asarray(params["conv1_b"], np.float32)
    w2 = np.asarray(params["conv2_w"], np.float32)   # (20, 10, 3, 3)
    b2 = np.asarray(params["conv2_b"], np.float32)

    # conv1 -> banded matmul weights; pool column parity q folded into lanes:
    #   wb1[dy, 2*pw+q+dx, q*128 + pw*10 + co] = w1[co, 0, dy, dx]
    wb1 = np.zeros((5, 28, 256), np.float32)
    for dy in range(5):
        for q in range(2):
            for pw in range(12):
                for dx in range(5):
                    col = q * 128 + pw * 10
                    wb1[dy, 2 * pw + q + dx, col:col + 10] = w1[:, 0, dy, dx]
    b1row = np.zeros((1, 128), np.float32)
    b1row[0, :120] = np.tile(b1, 12)

    # conv2 -> banded matmul weights (K 120->128, N 200->256 zero-padded):
    #   wb2[dy, (ow+dx)*10 + ci, ow*20 + co] = w2[co, ci, dy, dx]
    wb2 = np.zeros((3, 128, 256), np.float32)
    for dy in range(3):
        for ow in range(10):
            for dx in range(3):
                pw = ow + dx
                wb2[dy, pw * 10:(pw + 1) * 10, ow * 20:(ow + 1) * 20] = \
                    w2[:, :, dy, dx].T
    b2row = np.zeros((1, 256), np.float32)
    b2row[0, :200] = np.tile(b2, 10)

    # fc1: fold PyTorch's (c, h, w) flatten order into the weights, split per
    # conv2 output row oh, pad K 200->256 and hidden 500->512.
    fw = np.asarray(params["fc1_w"], np.float32).reshape(500, 20, 10, 10)
    fw = fw.transpose(2, 3, 1, 0).reshape(10, 200, 500)   # [oh, ow*20+c, j]
    wfc1 = np.zeros((10, 256, 512), np.float32)
    wfc1[:, :200, :500] = fw
    bfc1 = np.zeros((1, 512), np.float32)
    bfc1[0, :500] = np.asarray(params["fc1_b"], np.float32)

    wfc2 = np.zeros((512, 10), np.float32)
    wfc2[:500, :] = np.asarray(params["fc2_w"], np.float32).T
    bfc2 = np.asarray(params["fc2_b"], np.float32)[None, :]

    return {
        "wb1": jnp.asarray(wb1, jnp.bfloat16), "b1": jnp.asarray(b1row),
        "wb2": jnp.asarray(wb2, jnp.bfloat16), "b2": jnp.asarray(b2row),
        "wfc1": jnp.asarray(wfc1, jnp.bfloat16), "bfc1": jnp.asarray(bfc1),
        "wfc2": jnp.asarray(wfc2, jnp.bfloat16), "bfc2": jnp.asarray(bfc2),
    }


# ----------------------------------------------------------------------------
# Forward pass
# ----------------------------------------------------------------------------
@jax.jit
def digit_forward(kparams, x_nchw):
    """x_nchw: (N, 1, 28, 28) f32 -> (N, 10) log-probabilities."""
    n = x_nchw.shape[0]
    tb = max(8, min(32, _round_up(n, 8)))       # images per grid step
    n_pad = _round_up(n, tb)
    nt = n_pad // tb

    x = x_nchw.reshape(n, 28, 28).astype(jnp.bfloat16)
    if n_pad != n:
        x = jnp.pad(x, ((0, n_pad - n), (0, 0), (0, 0)))

    # Row-parity split + (tile, parity, image-row, image, col) layout so every
    # in-kernel slice is static, contiguous and sublane-aligned.  Cheap XLA
    # layout work on a tiny (3 KB/image) input, done once per forward.
    xr = x.reshape(nt, tb, 28, 28)
    xp = jnp.stack([xr[:, :, 0::2, :], xr[:, :, 1::2, :]], axis=1)
    xpb = xp.transpose(0, 1, 3, 2, 4).reshape(nt, 2, 14 * tb, 28)

    out = _digit_call(xpb, kparams, tb=tb, n_pad=n_pad)
    return out[:n]


def reference_forward(params, x_nchw):
    """Pure-JAX (f32) replica of the PyTorch Digit.forward, for checking."""
    dn = ("NCHW", "OIHW", "NCHW")
    y = lax.conv_general_dilated(x_nchw, params["conv1_w"], (1, 1), "VALID",
                                 dimension_numbers=dn)
    y = jax.nn.relu(y + params["conv1_b"][None, :, None, None])
    y = jnp.maximum(jnp.maximum(y[:, :, 0::2, 0::2], y[:, :, 0::2, 1::2]),
                    jnp.maximum(y[:, :, 1::2, 0::2], y[:, :, 1::2, 1::2]))
    y = lax.conv_general_dilated(y, params["conv2_w"], (1, 1), "VALID",
                                 dimension_numbers=dn)
    y = jax.nn.relu(y + params["conv2_b"][None, :, None, None])
    flat = y.reshape(x_nchw.shape[0], -1)
    h = jax.nn.relu(flat @ params["fc1_w"].T + params["fc1_b"])
    z = h @ params["fc2_w"].T + params["fc2_b"]
    return jax.nn.log_softmax(z, axis=1)


if __name__ == "__main__":
    key = jax.random.PRNGKey(0)
    k_params, k_x = jax.random.split(key)
    params = init_params(k_params)          # PyTorch-layout parameters
    kparams = prepare_params(params)        # one-time repack for the kernel

    # Input size dictated by fc1 (20*10*10): MNIST-style (N, 1, 28, 28).
    x = jax.random.normal(k_x, (2, 1, 28, 28), jnp.float32)

    out = jax.block_until_ready(digit_forward(kparams, x))

    assert out.shape == (2, 10)
    # log_softmax rows must exponentiate-and-sum to ~1.
    assert jnp.allclose(jnp.sum(jnp.exp(out), axis=1), 1.0, atol=1e-4)
    # Match a pure-JAX f32 reference of the PyTorch forward (matmuls run in
    # bf16 on the MXU with f32 accumulation, hence the loose tolerance).
    ref = reference_forward(params, x)
    assert jnp.allclose(out, ref, atol=3e-2), float(jnp.max(jnp.abs(out - ref)))
    print("KERNEL_OK")
</pallas_src>

<mosaic_0001>
module attributes {stable_mosaic.version = 11 : i64} {
  func.func @_digit_kernel(%arg0: i32, %arg1: memref<1x2x112x28xbf16, #tpu.memory_space<vmem>>, %arg2: memref<5x28x256xbf16, #tpu.memory_space<vmem>>, %arg3: memref<1x128xf32, #tpu.memory_space<vmem>>, %arg4: memref<3x128x256xbf16, #tpu.memory_space<vmem>>, %arg5: memref<1x256xf32, #tpu.memory_space<vmem>>, %arg6: memref<10x256x512xbf16, #tpu.memory_space<vmem>>, %arg7: memref<1x512xf32, #tpu.memory_space<vmem>>, %arg8: memref<512x10xbf16, #tpu.memory_space<vmem>>, %arg9: memref<1x10xf32, #tpu.memory_space<vmem>>, %arg10: memref<8x10xf32, #tpu.memory_space<vmem>>) attributes {dimension_semantics = [#tpu.dimension_semantics<parallel>], iteration_bounds = array<i64: 1>, scalar_prefetch = 0 : i64, scratch_operands = 0 : i64, tpu.core_type = #tpu.core_type<tc>, window_params = [{transform_indices = @transform_0, window_bounds = array<i64: 1, 2, 112, 28>}, {pipeline_mode = #tpu.pipeline_mode<synchronous>, transform_indices = @transform_1, window_bounds = array<i64: 5, 28, 256>}, {pipeline_mode = #tpu.pipeline_mode<synchronous>, transform_indices = @transform_2, window_bounds = array<i64: 1, 128>}, {pipeline_mode = #tpu.pipeline_mode<synchronous>, transform_indices = @transform_3, window_bounds = array<i64: 3, 128, 256>}, {pipeline_mode = #tpu.pipeline_mode<synchronous>, transform_indices = @transform_4, window_bounds = array<i64: 1, 256>}, {pipeline_mode = #tpu.pipeline_mode<synchronous>, transform_indices = @transform_5, window_bounds = array<i64: 10, 256, 512>}, {pipeline_mode = #tpu.pipeline_mode<synchronous>, transform_indices = @transform_6, window_bounds = array<i64: 1, 512>}, {pipeline_mode = #tpu.pipeline_mode<synchronous>, transform_indices = @transform_7, window_bounds = array<i64: 512, 10>}, {pipeline_mode = #tpu.pipeline_mode<synchronous>, transform_indices = @transform_8, window_bounds = array<i64: 1, 10>}, {transform_indices = @transform_9, window_bounds = array<i64: 8, 10>}]} {
    %cst = arith.constant 0.000000e+00 : f32
    %0 = vector.broadcast %cst : f32 to vector<96x256xf32>
    %c0 = arith.constant 0 : index
    %c0_0 = arith.constant 0 : index
    %c0_1 = arith.constant 0 : index
    %c0_2 = arith.constant 0 : index
    %1 = vector.load %arg1[%c0, %c0_0, %c0_1, %c0_2] : memref<1x2x112x28xbf16, #tpu.memory_space<vmem>>, vector<1x1x96x28xbf16>
    %2 = vector.shape_cast %1 : vector<1x1x96x28xbf16> to vector<96x28xbf16>
    %c0_3 = arith.constant 0 : index
    %c0_4 = arith.constant 0 : index
    %c0_5 = arith.constant 0 : index
    %3 = vector.load %arg2[%c0_3, %c0_4, %c0_5] : memref<5x28x256xbf16, #tpu.memory_space<vmem>>, vector<1x28x256xbf16>
    %4 = vector.shape_cast %3 : vector<1x28x256xbf16> to vector<28x256xbf16>
    %cst_6 = arith.constant dense<0.000000e+00> : vector<96x256xf32>
    %5 = tpu.matmul %2, %4, %cst_6 {dimension_numbers = #tpu.dot_dimension_numbers<[1], [0], [0], [1], [0, 0, 1, 1], [], []>} : vector<96x28xbf16>, vector<28x256xbf16>, vector<96x256xf32> -> vector<96x256xf32>
    %6 = arith.addf %0, %5 : vector<96x256xf32>
    %c0_7 = arith.constant 0 : index
    %c1 = arith.constant 1 : index
    %c0_8 = arith.constant 0 : index
    %c0_9 = arith.constant 0 : index
    %7 = vector.load %arg1[%c0_7, %c1, %c0_8, %c0_9] : memref<1x2x112x28xbf16, #tpu.memory_space<vmem>>, vector<1x1x96x28xbf16>
    %8 = vector.shape_cast %7 : vector<1x1x96x28xbf16> to vector<96x28xbf16>
    %c1_10 = arith.constant 1 : index
    %c0_11 = arith.constant 0 : index
    %c0_12 = arith.constant 0 : index
    %9 = vector.load %arg2[%c1_10, %c0_11, %c0_12] : memref<5x28x256xbf16, #tpu.memory_space<vmem>>, vector<1x28x256xbf16>
    %10 = vector.shape_cast %9 : vector<1x28x256xbf16> to vector<28x256xbf16>
    %cst_13 = arith.constant dense<0.000000e+00> : vector<96x256xf32>
    %11 = tpu.matmul %8, %10, %cst_13 {dimension_numbers = #tpu.dot_dimension_numbers<[1], [0], [0], [1], [0, 0, 1, 1], [], []>} : vector<96x28xbf16>, vector<28x256xbf16>, vector<96x256xf32> -> vector<96x256xf32>
    %12 = arith.addf %6, %11 : vector<96x256xf32>
    %c0_14 = arith.constant 0 : index
    %c0_15 = arith.constant 0 : index
    %c8 = arith.constant 8 : index
    %c0_16 = arith.constant 0 : index
    %13 = vector.load %arg1[%c0_14, %c0_15, %c8, %c0_16] : memref<1x2x112x28xbf16, #tpu.memory_space<vmem>>, vector<1x1x96x28xbf16>
    %14 = vector.shape_cast %13 : vector<1x1x96x28xbf16> to vector<96x28xbf16>
    %c2 = arith.constant 2 : index
    %c0_17 = arith.constant 0 : index
    %c0_18 = arith.constant 0 : index
    %15 = vector.load %arg2[%c2, %c0_17, %c0_18] : memref<5x28x256xbf16, #tpu.memory_space<vmem>>, vector<1x28x256xbf16>
    %16 = vector.shape_cast %15 : vector<1x28x256xbf16> to vector<28x256xbf16>
    %cst_19 = arith.constant dense<0.000000e+00> : vector<96x256xf32>
    %17 = tpu.matmul %14, %16, %cst_19 {dimension_numbers = #tpu.dot_dimension_numbers<[1], [0], [0], [1], [0, 0, 1, 1], [], []>} : vector<96x28xbf16>, vector<28x256xbf16>, vector<96x256xf32> -> vector<96x256xf32>
    %18 = arith.addf %12, %17 : vector<96x256xf32>
    %c0_20 = arith.constant 0 : index
    %c1_21 = arith.constant 1 : index
    %c8_22 = arith.constant 8 : index
    %c0_23 = arith.constant 0 : index
    %19 = vector.load %arg1[%c0_20, %c1_21, %c8_22, %c0_23] : memref<1x2x112x28xbf16, #tpu.memory_space<vmem>>, vector<1x1x96x28xbf16>
    %20 = vector.shape_cast %19 : vector<1x1x96x28xbf16> to vector<96x28xbf16>
    %c3 = arith.constant 3 : index
    %c0_24 = arith.constant 0 : index
    %c0_25 = arith.constant 0 : index
    %21 = vector.load %arg2[%c3, %c0_24, %c0_25] : memref<5x28x256xbf16, #tpu.memory_space<vmem>>, vector<1x28x256xbf16>
    %22 = vector.shape_cast %21 : vector<1x28x256xbf16> to vector<28x256xbf16>
    %cst_26 = arith.constant dense<0.000000e+00> : vector<96x256xf32>
    %23 = tpu.matmul %20, %22, %cst_26 {dimension_numbers = #tpu.dot_dimension_numbers<[1], [0], [0], [1], [0, 0, 1, 1], [], []>} : vector<96x28xbf16>, vector<28x256xbf16>, vector<96x256xf32> -> vector<96x256xf32>
    %24 = arith.addf %18, %23 : vector<96x256xf32>
    %c0_27 = arith.constant 0 : index
    %c0_28 = arith.constant 0 : index
    %c16 = arith.constant 16 : index
    %c0_29 = arith.constant 0 : index
    %25 = vector.load %arg1[%c0_27, %c0_28, %c16, %c0_29] : memref<1x2x112x28xbf16, #tpu.memory_space<vmem>>, vector<1x1x96x28xbf16>
    %26 = vector.shape_cast %25 : vector<1x1x96x28xbf16> to vector<96x28xbf16>
    %c4 = arith.constant 4 : index
    %c0_30 = arith.constant 0 : index
    %c0_31 = arith.constant 0 : index
    %27 = vector.load %arg2[%c4, %c0_30, %c0_31] : memref<5x28x256xbf16, #tpu.memory_space<vmem>>, vector<1x28x256xbf16>
    %28 = vector.shape_cast %27 : vector<1x28x256xbf16> to vector<28x256xbf16>
    %cst_32 = arith.constant dense<0.000000e+00> : vector<96x256xf32>
    %29 = tpu.matmul %26, %28, %cst_32 {dimension_numbers = #tpu.dot_dimension_numbers<[1], [0], [0], [1], [0, 0, 1, 1], [], []>} : vector<96x28xbf16>, vector<28x256xbf16>, vector<96x256xf32> -> vector<96x256xf32>
    %30 = arith.addf %24, %29 : vector<96x256xf32>
    %31 = vector.extract_strided_slice %30 {offsets = [0, 0], sizes = [96, 128], strides = [1, 1]} : vector<96x256xf32> to vector<96x128xf32>
    %c0_33 = arith.constant 0 : index
    %c0_34 = arith.constant 0 : index
    %32 = vector.load %arg3[%c0_33, %c0_34] : memref<1x128xf32, #tpu.memory_space<vmem>>, vector<1x128xf32>
    %33 = vector.broadcast %32 : vector<1x128xf32> to vector<96x128xf32>
    %34 = arith.addf %31, %33 : vector<96x128xf32>
    %cst_35 = arith.constant 0.000000e+00 : f32
    %35 = vector.broadcast %cst_35 : f32 to vector<96x128xf32>
    %36 = arith.maximumf %34, %35 : vector<96x128xf32>
    %37 = vector.extract_strided_slice %30 {offsets = [0, 128], sizes = [96, 128], strides = [1, 1]} : vector<96x256xf32> to vector<96x128xf32>
    %c0_36 = arith.constant 0 : index
    %c0_37 = arith.constant 0 : index
    %38 = vector.load %arg3[%c0_36, %c0_37] : memref<1x128xf32, #tpu.memory_space<vmem>>, vector<1x128xf32>
    %39 = vector.broadcast %38 : vector<1x128xf32> to vector<96x128xf32>
    %40 = arith.addf %37, %39 : vector<96x128xf32>
    %cst_38 = arith.constant 0.000000e+00 : f32
    %41 = vector.broadcast %cst_38 : f32 to vector<96x128xf32>
    %42 = arith.maximumf %40, %41 : vector<96x128xf32>
    %43 = arith.maximumf %36, %42 : vector<96x128xf32>
    %cst_39 = arith.constant 0.000000e+00 : f32
    %44 = vector.broadcast %cst_39 : f32 to vector<96x256xf32>
    %c0_40 = arith.constant 0 : index
    %c1_41 = arith.constant 1 : index
    %c0_42 = arith.constant 0 : index
    %c0_43 = arith.constant 0 : index
    %45 = vector.load %arg1[%c0_40, %c1_41, %c0_42, %c0_43] : memref<1x2x112x28xbf16, #tpu.memory_space<vmem>>, vector<1x1x96x28xbf16>
    %46 = vector.shape_cast %45 : vector<1x1x96x28xbf16> to vector<96x28xbf16>
    %c0_44 = arith.constant 0 : index
    %c0_45 = arith.constant 0 : index
    %c0_46 = arith.constant 0 : index
    %47 = vector.load %arg2[%c0_44, %c0_45, %c0_46] : memref<5x28x256xbf16, #tpu.memory_space<vmem>>, vector<1x28x256xbf16>
    %48 = vector.shape_cast %47 : vector<1x28x256xbf16> to vector<28x256xbf16>
    %cst_47 = arith.constant dense<0.000000e+00> : vector<96x256xf32>
    %49 = tpu.matmul %46, %48, %cst_47 {dimension_numbers = #tpu.dot_dimension_numbers<[1], [0], [0], [1], [0, 0, 1, 1], [], []>} : vector<96x28xbf16>, vector<28x256xbf16>, vector<96x256xf32> -> vector<96x256xf32>
    %50 = arith.addf %44, %49 : vector<96x256xf32>
    %c0_48 = arith.constant 0 : index
    %c0_49 = arith.constant 0 : index
    %c8_50 = arith.constant 8 : index
    %c0_51 = arith.constant 0 : index
    %51 = vector.load %arg1[%c0_48, %c0_49, %c8_50, %c0_51] : memref<1x2x112x28xbf16, #tpu.memory_space<vmem>>, vector<1x1x96x28xbf16>
    %52 = vector.shape_cast %51 : vector<1x1x96x28xbf16> to vector<96x28xbf16>
    %c1_52 = arith.constant 1 : index
    %c0_53 = arith.constant 0 : index
    %c0_54 = arith.constant 0 : index
    %53 = vector.load %arg2[%c1_52, %c0_53, %c0_54] : memref<5x28x256xbf16, #tpu.memory_space<vmem>>, vector<1x28x256xbf16>
    %54 = vector.shape_cast %53 : vector<1x28x256xbf16> to vector<28x256xbf16>
    %cst_55 = arith.constant dense<0.000000e+00> : vector<96x256xf32>
    %55 = tpu.matmul %52, %54, %cst_55 {dimension_numbers = #tpu.dot_dimension_numbers<[1], [0], [0], [1], [0, 0, 1, 1], [], []>} : vector<96x28xbf16>, vector<28x256xbf16>, vector<96x256xf32> -> vector<96x256xf32>
    %56 = arith.addf %50, %55 : vector<96x256xf32>
    %c0_56 = arith.constant 0 : index
    %c1_57 = arith.constant 1 : index
    %c8_58 = arith.constant 8 : index
    %c0_59 = arith.constant 0 : index
    %57 = vector.load %arg1[%c0_56, %c1_57, %c8_58, %c0_59] : memref<1x2x112x28xbf16, #tpu.memory_space<vmem>>, vector<1x1x96x28xbf16>
    %58 = vector.shape_cast %57 : vector<1x1x96x28xbf16> to vector<96x28xbf16>
    %c2_60 = arith.constant 2 : index
    %c0_61 = arith.constant 0 : index
    %c0_62 = arith.constant 0 : index
    %59 = vector.load %arg2[%c2_60, %c0_61, %c0_62] : memref<5x28x256xbf16, #tpu.memory_space<vmem>>, vector<1x28x256xbf16>
    %60 = vector.shape_cast %59 : vector<1x28x256xbf16> to vector<28x256xbf16>
    %cst_63 = arith.constant dense<0.000000e+00> : vector<96x256xf32>
    %61 = tpu.matmul %58, %60, %cst_63 {dimension_numbers = #tpu.dot_dimension_numbers<[1], [0], [0], [1], [0, 0, 1, 1], [], []>} : vector<96x28xbf16>, vector<28x256xbf16>, vector<96x256xf32> -> vector<96x256xf32>
    %62 = arith.addf %56, %61 : vector<96x256xf32>
    %c0_64 = arith.constant 0 : index
    %c0_65 = arith.constant 0 : index
    %c16_66 = arith.constant 16 : index
    %c0_67 = arith.constant 0 : index
    %63 = vector.load %arg1[%c0_64, %c0_65, %c16_66, %c0_67] : memref<1x2x112x28xbf16, #tpu.memory_space<vmem>>, vector<1x1x96x28xbf16>
    %64 = vector.shape_cast %63 : vector<1x1x96x28xbf16> to vector<96x28xbf16>
    %c3_68 = arith.constant 3 : index
    %c0_69 = arith.constant 0 : index
    %c0_70 = arith.constant 0 : index
    %65 = vector.load %arg2[%c3_68, %c0_69, %c0_70] : memref<5x28x256xbf16, #tpu.memory_space<vmem>>, vector<1x28x256xbf16>
    %66 = vector.shape_cast %65 : vector<1x28x256xbf16> to vector<28x256xbf16>
    %cst_71 = arith.constant dense<0.000000e+00> : vector<96x256xf32>
    %67 = tpu.matmul %64, %66, %cst_71 {dimension_numbers = #tpu.dot_dimension_numbers<[1], [0], [0], [1], [0, 0, 1, 1], [], []>} : vector<96x28xbf16>, vector<28x256xbf16>, vector<96x256xf32> -> vector<96x256xf32>
    %68 = arith.addf %62, %67 : vector<96x256xf32>
    %c0_72 = arith.constant 0 : index
    %c1_73 = arith.constant 1 : index
    %c16_74 = arith.constant 16 : index
    %c0_75 = arith.constant 0 : index
    %69 = vector.load %arg1[%c0_72, %c1_73, %c16_74, %c0_75] : memref<1x2x112x28xbf16, #tpu.memory_space<vmem>>, vector<1x1x96x28xbf16>
    %70 = vector.shape_cast %69 : vector<1x1x96x28xbf16> to vector<96x28xbf16>
    %c4_76 = arith.constant 4 : index
    %c0_77 = arith.constant 0 : index
    %c0_78 = arith.constant 0 : index
    %71 = vector.load %arg2[%c4_76, %c0_77, %c0_78] : memref<5x28x256xbf16, #tpu.memory_space<vmem>>, vector<1x28x256xbf16>
    %72 = vector.shape_cast %71 : vector<1x28x256xbf16> to vector<28x256xbf16>
    %cst_79 = arith.constant dense<0.000000e+00> : vector<96x256xf32>
    %73 = tpu.matmul %70, %72, %cst_79 {dimension_numbers = #tpu.dot_dimension_numbers<[1], [0], [0], [1], [0, 0, 1, 1], [], []>} : vector<96x28xbf16>, vector<28x256xbf16>, vector<96x256xf32> -> vector<96x256xf32>
    %74 = arith.addf %68, %73 : vector<96x256xf32>
    %75 = vector.extract_strided_slice %74 {offsets = [0, 0], sizes = [96, 128], strides = [1, 1]} : vector<96x256xf32> to vector<96x128xf32>
    %c0_80 = arith.constant 0 : index
    %c0_81 = arith.constant 0 : index
    %76 = vector.load %arg3[%c0_80, %c0_81] : memref<1x128xf32, #tpu.memory_space<vmem>>, vector<1x128xf32>
    %77 = vector.broadcast %76 : vector<1x128xf32> to vector<96x128xf32>
    %78 = arith.addf %75, %77 : vector<96x128xf32>
    %cst_82 = arith.constant 0.000000e+00 : f32
    %79 = vector.broadcast %cst_82 : f32 to vector<96x128xf32>
    %80 = arith.maximumf %78, %79 : vector<96x128xf32>
    %81 = vector.extract_strided_slice %74 {offsets = [0, 128], sizes = [96, 128], strides = [1, 1]} : vector<96x256xf32> to vector<96x128xf32>
    %c0_83 = arith.constant 0 : index
    %c0_84 = arith.constant 0 : index
    %82 = vector.load %arg3[%c0_83, %c0_84] : memref<1x128xf32, #tpu.memory_space<vmem>>, vector<1x128xf32>
    %83 = vector.broadcast %82 : vector<1x128xf32> to vector<96x128xf32>
    %84 = arith.addf %81, %83 : vector<96x128xf32>
    %cst_85 = arith.constant 0.000000e+00 : f32
    %85 = vector.broadcast %cst_85 : f32 to vector<96x128xf32>
    %86 = arith.maximumf %84, %85 : vector<96x128xf32>
    %87 = arith.maximumf %80, %86 : vector<96x128xf32>
    %88 = arith.maximumf %43, %87 : vector<96x128xf32>
    %89 = arith.truncf %88 : vector<96x128xf32> to vector<96x128xbf16>
    %cst_86 = arith.constant 0.000000e+00 : f32
    %90 = vector.broadcast %cst_86 : f32 to vector<80x256xf32>
    %91 = vector.extract_strided_slice %89 {offsets = [0, 0], sizes = [80, 128], strides = [1, 1]} : vector<96x128xbf16> to vector<80x128xbf16>
    %c0_87 = arith.constant 0 : index
    %c0_88 = arith.constant 0 : index
    %c0_89 = arith.constant 0 : index
    %92 = vector.load %arg4[%c0_87, %c0_88, %c0_89] : memref<3x128x256xbf16, #tpu.memory_space<vmem>>, vector<1x128x256xbf16>
    %93 = vector.shape_cast %92 : vector<1x128x256xbf16> to vector<128x256xbf16>
    %cst_90 = arith.constant dense<0.000000e+00> : vector<80x256xf32>
    %94 = tpu.matmul %91, %93, %cst_90 {dimension_numbers = #tpu.dot_dimension_numbers<[1], [0], [0], [1], [0, 0, 1, 1], [], []>} : vector<80x128xbf16>, vector<128x256xbf16>, vector<80x256xf32> -> vector<80x256xf32>
    %95 = arith.addf %90, %94 : vector<80x256xf32>
    %96 = vector.extract_strided_slice %89 {offsets = [8, 0], sizes = [80, 128], strides = [1, 1]} : vector<96x128xbf16> to vector<80x128xbf16>
    %c1_91 = arith.constant 1 : index
    %c0_92 = arith.constant 0 : index
    %c0_93 = arith.constant 0 : index
    %97 = vector.load %arg4[%c1_91, %c0_92, %c0_93] : memref<3x128x256xbf16, #tpu.memory_space<vmem>>, vector<1x128x256xbf16>
    %98 = vector.shape_cast %97 : vector<1x128x256xbf16> to vector<128x256xbf16>
    %cst_94 = arith.constant dense<0.000000e+00> : vector<80x256xf32>
    %99 = tpu.matmul %96, %98, %cst_94 {dimension_numbers = #tpu.dot_dimension_numbers<[1], [0], [0], [1], [0, 0, 1, 1], [], []>} : vector<80x128xbf16>, vector<128x256xbf16>, vector<80x256xf32> -> vector<80x256xf32>
    %100 = arith.addf %95, %99 : vector<80x256xf32>
    %101 = vector.extract_strided_slice %89 {offsets = [16, 0], sizes = [80, 128], strides = [1, 1]} : vector<96x128xbf16> to vector<80x128xbf16>
    %c2_95 = arith.constant 2 : index
    %c0_96 = arith.constant 0 : index
    %c0_97 = arith.constant 0 : index
    %102 = vector.load %arg4[%c2_95, %c0_96, %c0_97] : memref<3x128x256xbf16, #tpu.memory_space<vmem>>, vector<1x128x256xbf16>
    %103 = vector.shape_cast %102 : vector<1x128x256xbf16> to vector<128x256xbf16>
    %cst_98 = arith.constant dense<0.000000e+00> : vector<80x256xf32>
    %104 = tpu.matmul %101, %103, %cst_98 {dimension_numbers = #tpu.dot_dimension_numbers<[1], [0], [0], [1], [0, 0, 1, 1], [], []>} : vector<80x128xbf16>, vector<128x256xbf16>, vector<80x256xf32> -> vector<80x256xf32>
    %105 = arith.addf %100, %104 : vector<80x256xf32>
    %c0_99 = arith.constant 0 : index
    %c0_100 = arith.constant 0 : index
    %106 = vector.load %arg5[%c0_99, %c0_100] : memref<1x256xf32, #tpu.memory_space<vmem>>, vector<1x256xf32>
    %107 = vector.broadcast %106 : vector<1x256xf32> to vector<80x256xf32>
    %108 = arith.addf %105, %107 : vector<80x256xf32>
    %cst_101 = arith.constant 0.000000e+00 : f32
    %109 = vector.broadcast %cst_101 : f32 to vector<80x256xf32>
    %110 = arith.maximumf %108, %109 : vector<80x256xf32>
    %111 = arith.truncf %110 : vector<80x256xf32> to vector<80x256xbf16>
    %cst_102 = arith.constant 0.000000e+00 : f32
    %112 = vector.broadcast %cst_102 : f32 to vector<8x512xf32>
    %113 = vector.extract_strided_slice %111 {offsets = [0, 0], sizes = [8, 256], strides = [1, 1]} : vector<80x256xbf16> to vector<8x256xbf16>
    %c0_103 = arith.constant 0 : index
    %c0_104 = arith.constant 0 : index
    %c0_105 = arith.constant 0 : index
    %114 = vector.load %arg6[%c0_103, %c0_104, %c0_105] : memref<10x256x512xbf16, #tpu.memory_space<vmem>>, vector<1x256x512xbf16>
    %115 = vector.shape_cast %114 : vector<1x256x512xbf16> to vector<256x512xbf16>
    %cst_106 = arith.constant dense<0.000000e+00> : vector<8x512xf32>
    %116 = tpu.matmul %113, %115, %cst_106 {dimension_numbers = #tpu.dot_dimension_numbers<[1], [0], [0], [1], [0, 0, 1, 1], [], []>} : vector<8x256xbf16>, vector<256x512xbf16>, vector<8x512xf32> -> vector<8x512xf32>
    %117 = arith.addf %112, %116 : vector<8x512xf32>
    %118 = vector.extract_strided_slice %111 {offsets = [8, 0], sizes = [8, 256], strides = [1, 1]} : vector<80x256xbf16> to vector<8x256xbf16>
    %c1_107 = arith.constant 1 : index
    %c0_108 = arith.constant 0 : index
    %c0_109 = arith.constant 0 : index
    %119 = vector.load %arg6[%c1_107, %c0_108, %c0_109] : memref<10x256x512xbf16, #tpu.memory_space<vmem>>, vector<1x256x512xbf16>
    %120 = vector.shape_cast %119 : vector<1x256x512xbf16> to vector<256x512xbf16>
    %cst_110 = arith.constant dense<0.000000e+00> : vector<8x512xf32>
    %121 = tpu.matmul %118, %120, %cst_110 {dimension_numbers = #tpu.dot_dimension_numbers<[1], [0], [0], [1], [0, 0, 1, 1], [], []>} : vector<8x256xbf16>, vector<256x512xbf16>, vector<8x512xf32> -> vector<8x512xf32>
    %122 = arith.addf %117, %121 : vector<8x512xf32>
    %123 = vector.extract_strided_slice %111 {offsets = [16, 0], sizes = [8, 256], strides = [1, 1]} : vector<80x256xbf16> to vector<8x256xbf16>
    %c2_111 = arith.constant 2 : index
    %c0_112 = arith.constant 0 : index
    %c0_113 = arith.constant 0 : index
    %124 = vector.load %arg6[%c2_111, %c0_112, %c0_113] : memref<10x256x512xbf16, #tpu.memory_space<vmem>>, vector<1x256x512xbf16>
    %125 = vector.shape_cast %124 : vector<1x256x512xbf16> to vector<256x512xbf16>
    %cst_114 = arith.constant dense<0.000000e+00> : vector<8x512xf32>
    %126 = tpu.matmul %123, %125, %cst_114 {dimension_numbers = #tpu.dot_dimension_numbers<[1], [0], [0], [1], [0, 0, 1, 1], [], []>} : vector<8x256xbf16>, vector<256x512xbf16>, vector<8x512xf32> -> vector<8x512xf32>
    %127 = arith.addf %122, %126 : vector<8x512xf32>
    %128 = vector.extract_strided_slice %111 {offsets = [24, 0], sizes = [8, 256], strides = [1, 1]} : vector<80x256xbf16> to vector<8x256xbf16>
    %c3_115 = arith.constant 3 : index
    %c0_116 = arith.constant 0 : index
    %c0_117 = arith.constant 0 : index
    %129 = vector.load %arg6[%c3_115, %c0_116, %c0_117] : memref<10x256x512xbf16, #tpu.memory_space<vmem>>, vector<1x256x512xbf16>
    %130 = vector.shape_cast %129 : vector<1x256x512xbf16> to vector<256x512xbf16>
    %cst_118 = arith.constant dense<0.000000e+00> : vector<8x512xf32>
    %131 = tpu.matmul %128, %130, %cst_118 {dimension_numbers = #tpu.dot_dimension_numbers<[1], [0], [0], [1], [0, 0, 1, 1], [], []>} : vector<8x256xbf16>, vector<256x512xbf16>, vector<8x512xf32> -> vector<8x512xf32>
    %132 = arith.addf %127, %131 : vector<8x512xf32>
    %133 = vector.extract_strided_slice %111 {offsets = [32, 0], sizes = [8, 256], strides = [1, 1]} : vector<80x256xbf16> to vector<8x256xbf16>
    %c4_119 = arith.constant 4 : index
    %c0_120 = arith.constant 0 : index
    %c0_121 = arith.constant 0 : index
    %134 = vector.load %arg6[%c4_119, %c0_120, %c0_121] : memref<10x256x512xbf16, #tpu.memory_space<vmem>>, vector<1x256x512xbf16>
    %135 = vector.shape_cast %134 : vector<1x256x512xbf16> to vector<256x512xbf16>
    %cst_122 = arith.constant dense<0.000000e+00> : vector<8x512xf32>
    %136 = tpu.matmul %133, %135, %cst_122 {dimension_numbers = #tpu.dot_dimension_numbers<[1], [0], [0], [1], [0, 0, 1, 1], [], []>} : vector<8x256xbf16>, vector<256x512xbf16>, vector<8x512xf32> -> vector<8x512xf32>
    %137 = arith.addf %132, %136 : vector<8x512xf32>
    %138 = vector.extract_strided_slice %111 {offsets = [40, 0], sizes = [8, 256], strides = [1, 1]} : vector<80x256xbf16> to vector<8x256xbf16>
    %c5 = arith.constant 5 : index
    %c0_123 = arith.constant 0 : index
    %c0_124 = arith.constant 0 : index
    %139 = vector.load %arg6[%c5, %c0_123, %c0_124] : memref<10x256x512xbf16, #tpu.memory_space<vmem>>, vector<1x256x512xbf16>
    %140 = vector.shape_cast %139 : vector<1x256x512xbf16> to vector<256x512xbf16>
    %cst_125 = arith.constant dense<0.000000e+00> : vector<8x512xf32>
    %141 = tpu.matmul %138, %140, %cst_125 {dimension_numbers = #tpu.dot_dimension_numbers<[1], [0], [0], [1], [0, 0, 1, 1], [], []>} : vector<8x256xbf16>, vector<256x512xbf16>, vector<8x512xf32> -> vector<8x512xf32>
    %142 = arith.addf %137, %141 : vector<8x512xf32>
    %143 = vector.extract_strided_slice %111 {offsets = [48, 0], sizes = [8, 256], strides = [1, 1]} : vector<80x256xbf16> to vector<8x256xbf16>
    %c6 = arith.constant 6 : index
    %c0_126 = arith.constant 0 : index
    %c0_127 = arith.constant 0 : index
    %144 = vector.load %arg6[%c6, %c0_126, %c0_127] : memref<10x256x512xbf16, #tpu.memory_space<vmem>>, vector<1x256x512xbf16>
    %145 = vector.shape_cast %144 : vector<1x256x512xbf16> to vector<256x512xbf16>
    %cst_128 = arith.constant dense<0.000000e+00> : vector<8x512xf32>
    %146 = tpu.matmul %143, %145, %cst_128 {dimension_numbers = #tpu.dot_dimension_numbers<[1], [0], [0], [1], [0, 0, 1, 1], [], []>} : vector<8x256xbf16>, vector<256x512xbf16>, vector<8x512xf32> -> vector<8x512xf32>
    %147 = arith.addf %142, %146 : vector<8x512xf32>
    %148 = vector.extract_strided_slice %111 {offsets = [56, 0], sizes = [8, 256], strides = [1, 1]} : vector<80x256xbf16> to vector<8x256xbf16>
    %c7 = arith.constant 7 : index
    %c0_129 = arith.constant 0 : index
    %c0_130 = arith.constant 0 : index
    %149 = vector.load %arg6[%c7, %c0_129, %c0_130] : memref<10x256x512xbf16, #tpu.memory_space<vmem>>, vector<1x256x512xbf16>
    %150 = vector.shape_cast %149 : vector<1x256x512xbf16> to vector<256x512xbf16>
    %cst_131 = arith.constant dense<0.000000e+00> : vector<8x512xf32>
    %151 = tpu.matmul %148, %150, %cst_131 {dimension_numbers = #tpu.dot_dimension_numbers<[1], [0], [0], [1], [0, 0, 1, 1], [], []>} : vector<8x256xbf16>, vector<256x512xbf16>, vector<8x512xf32> -> vector<8x512xf32>
    %152 = arith.addf %147, %151 : vector<8x512xf32>
    %153 = vector.extract_strided_slice %111 {offsets = [64, 0], sizes = [8, 256], strides = [1, 1]} : vector<80x256xbf16> to vector<8x256xbf16>
    %c8_132 = arith.constant 8 : index
    %c0_133 = arith.constant 0 : index
    %c0_134 = arith.constant 0 : index
    %154 = vector.load %arg6[%c8_132, %c0_133, %c0_134] : memref<10x256x512xbf16, #tpu.memory_space<vmem>>, vector<1x256x512xbf16>
    %155 = vector.shape_cast %154 : vector<1x256x512xbf16> to vector<256x512xbf16>
    %cst_135 = arith.constant dense<0.000000e+00> : vector<8x512xf32>
    %156 = tpu.matmul %153, %155, %cst_135 {dimension_numbers = #tpu.dot_dimension_numbers<[1], [0], [0], [1], [0, 0, 1, 1], [], []>} : vector<8x256xbf16>, vector<256x512xbf16>, vector<8x512xf32> -> vector<8x512xf32>
    %157 = arith.addf %152, %156 : vector<8x512xf32>
    %158 = vector.extract_strided_slice %111 {offsets = [72, 0], sizes = [8, 256], strides = [1, 1]} : vector<80x256xbf16> to vector<8x256xbf16>
    %c9 = arith.constant 9 : index
    %c0_136 = arith.constant 0 : index
    %c0_137 = arith.constant 0 : index
    %159 = vector.load %arg6[%c9, %c0_136, %c0_137] : memref<10x256x512xbf16, #tpu.memory_space<vmem>>, vector<1x256x512xbf16>
    %160 = vector.shape_cast %159 : vector<1x256x512xbf16> to vector<256x512xbf16>
    %cst_138 = arith.constant dense<0.000000e+00> : vector<8x512xf32>
    %161 = tpu.matmul %158, %160, %cst_138 {dimension_numbers = #tpu.dot_dimension_numbers<[1], [0], [0], [1], [0, 0, 1, 1], [], []>} : vector<8x256xbf16>, vector<256x512xbf16>, vector<8x512xf32> -> vector<8x512xf32>
    %162 = arith.addf %157, %161 : vector<8x512xf32>
    %c0_139 = arith.constant 0 : index
    %c0_140 = arith.constant 0 : index
    %163 = vector.load %arg7[%c0_139, %c0_140] : memref<1x512xf32, #tpu.memory_space<vmem>>, vector<1x512xf32>
    %164 = vector.broadcast %163 : vector<1x512xf32> to vector<8x512xf32>
    %165 = arith.addf %162, %164 : vector<8x512xf32>
    %cst_141 = arith.constant 0.000000e+00 : f32
    %166 = vector.broadcast %cst_141 : f32 to vector<8x512xf32>
    %167 = arith.maximumf %165, %166 : vector<8x512xf32>
    %168 = arith.truncf %167 : vector<8x512xf32> to vector<8x512xbf16>
    %c0_142 = arith.constant 0 : index
    %c0_143 = arith.constant 0 : index
    %169 = vector.load %arg8[%c0_142, %c0_143] : memref<512x10xbf16, #tpu.memory_space<vmem>>, vector<512x10xbf16>
    %cst_144 = arith.constant dense<0.000000e+00> : vector<8x10xf32>
    %170 = tpu.matmul %168, %169, %cst_144 {dimension_numbers = #tpu.dot_dimension_numbers<[1], [0], [0], [1], [0, 0, 1, 1], [], []>} : vector<8x512xbf16>, vector<512x10xbf16>, vector<8x10xf32> -> vector<8x10xf32>
    %c0_145 = arith.constant 0 : index
    %c0_146 = arith.constant 0 : index
    %171 = vector.load %arg9[%c0_145, %c0_146] : memref<1x10xf32, #tpu.memory_space<vmem>>, vector<1x10xf32>
    %172 = vector.broadcast %171 : vector<1x10xf32> to vector<8x10xf32>
    %173 = arith.addf %170, %172 : vector<8x10xf32>
    %cst_147 = arith.constant dense<0xFF800000> : vector<8xf32>
    %174 = vector.multi_reduction <maximumf>, %173, %cst_147 [1] : vector<8x10xf32> to vector<8xf32>
    %175 = vector.shape_cast %174 : vector<8xf32> to vector<8x1xf32>
    %176 = vector.broadcast %175 : vector<8x1xf32> to vector<8x10xf32>
    %177 = arith.subf %173, %176 : vector<8x10xf32>
    %178 = math.exp %177 : vector<8x10xf32>
    %cst_148 = arith.constant dense<0.000000e+00> : vector<8xf32>
    %179 = vector.multi_reduction <add>, %178, %cst_148 [1] : vector<8x10xf32> to vector<8xf32>
    %180 = vector.shape_cast %179 : vector<8xf32> to vector<8x1xf32>
    %181 = math.log %180 : vector<8x1xf32>
    %182 = vector.broadcast %181 : vector<8x1xf32> to vector<8x10xf32>
    %183 = arith.subf %177, %182 : vector<8x10xf32>
    %c0_149 = arith.constant 0 : index
    %c0_150 = arith.constant 0 : index
    %184 = vector.load %arg10[%c0_149, %c0_150] : memref<8x10xf32, #tpu.memory_space<vmem>>, vector<8x10xf32>
    tpu.vector_store %arg10[%c0_149, %c0_150], %183 {strides = array<i32>} : memref<8x10xf32, #tpu.memory_space<vmem>>, vector<8x10xf32>,
    return
  }
  func.func @transform_0(%arg0: i32) -> (i32, i32, i32, i32) {
    %c0_i32 = arith.constant 0 : i32
    %c0_i32_0 = arith.constant 0 : i32
    %c0_i32_1 = arith.constant 0 : i32
    %c0_i32_2 = arith.constant 0 : i32
    return %arg0, %c0_i32, %c0_i32_0, %c0_i32_1 : i32, i32, i32, i32
  }
  func.func @transform_1(%arg0: i32) -> (i32, i32, i32) {
    %c0_i32 = arith.constant 0 : i32
    %c0_i32_0 = arith.constant 0 : i32
    %c0_i32_1 = arith.constant 0 : i32
    %c0_i32_2 = arith.constant 0 : i32
    return %c0_i32, %c0_i32_0, %c0_i32_1 : i32, i32, i32
  }
  func.func @transform_2(%arg0: i32) -> (i32, i32) {
    %c0_i32 = arith.constant 0 : i32
    %c0_i32_0 = arith.constant 0 : i32
    %c0_i32_1 = arith.constant 0 : i32
    return %c0_i32, %c0_i32_0 : i32, i32
  }
  func.func @transform_3(%arg0: i32) -> (i32, i32, i32) {
    %c0_i32 = arith.constant 0 : i32
    %c0_i32_0 = arith.constant 0 : i32
    %c0_i32_1 = arith.constant 0 : i32
    %c0_i32_2 = arith.constant 0 : i32
    return %c0_i32, %c0_i32_0, %c0_i32_1 : i32, i32, i32
  }
  func.func @transform_4(%arg0: i32) -> (i32, i32) {
    %c0_i32 = arith.constant 0 : i32
    %c0_i32_0 = arith.constant 0 : i32
    %c0_i32_1 = arith.constant 0 : i32
    return %c0_i32, %c0_i32_0 : i32, i32
  }
  func.func @transform_5(%arg0: i32) -> (i32, i32, i32) {
    %c0_i32 = arith.constant 0 : i32
    %c0_i32_0 = arith.constant 0 : i32
    %c0_i32_1 = arith.constant 0 : i32
    %c0_i32_2 = arith.constant 0 : i32
    return %c0_i32, %c0_i32_0, %c0_i32_1 : i32, i32, i32
  }
  func.func @transform_6(%arg0: i32) -> (i32, i32) {
    %c0_i32 = arith.constant 0 : i32
    %c0_i32_0 = arith.constant 0 : i32
    %c0_i32_1 = arith.constant 0 : i32
    return %c0_i32, %c0_i32_0 : i32, i32
  }
  func.func @transform_7(%arg0: i32) -> (i32, i32) {
    %c0_i32 = arith.constant 0 : i32
    %c0_i32_0 = arith.constant 0 : i32
    %c0_i32_1 = arith.constant 0 : i32
    return %c0_i32, %c0_i32_0 : i32, i32
  }
  func.func @transform_8(%arg0: i32) -> (i32, i32) {
    %c0_i32 = arith.constant 0 : i32
    %c0_i32_0 = arith.constant 0 : i32
    %c0_i32_1 = arith.constant 0 : i32
    return %c0_i32, %c0_i32_0 : i32, i32
  }
  func.func @transform_9(%arg0: i32) -> (i32, i32) {
    %c0_i32 = arith.constant 0 : i32
    %c0_i32_0 = arith.constant 0 : i32
    return %arg0, %c0_i32 : i32, i32
  }
}

</mosaic_0001>

<bundles_post_ra>
// kernel: digit_forward.1
= control target key start
LH: loop header
LB: loop body
LE: loop exit
PB: predicated region body
PF: predicated region fallthrough
CT: control target
= control target key end

     0   :  { %14 = vsyncpa [#allocation3], 0  ;;  %s11177_s0 = inlined_call_operand.vmem [shape: bf16[1,2,112,28], index: 0, kind: input, shape index: {}]   ;;  %s11178_s1 = inlined_call_operand.hbm [shape: bf16[5,28,256], index: 1, kind: input, shape index: {}]   ;;  %s11179_s2 = inlined_call_operand.hbm [shape: f32[1,128], index: 2, kind: input, shape index: {}]   ;;  %s11180_s3 = inlined_call_operand.hbm [shape: bf16[3,128,256], index: 3, kind: input, shape index: {}]   ;;  %s11181_s4 = inlined_call_operand.hbm [shape: f32[1,256], index: 4, kind: input, shape index: {}]   ;;  %s11182_s5 = inlined_call_operand.hbm [shape: bf16[10,256,512], index: 5, kind: input, shape index: {}]   ;;  %s11183_s6 = inlined_call_operand.hbm [shape: f32[1,512], index: 6, kind: input, shape index: {}]   ;;  %s11184_s7 = inlined_call_operand.vmem [shape: bf16[512,10], index: 7, kind: input, shape index: {}]   ;;  %s11185_s8 = inlined_call_operand.hbm [shape: f32[1,10], index: 8, kind: input, shape index: {}]   ;;  %s11186_s9 = inlined_call_operand.vmem [shape: f32[8,10], index: 9, kind: output, shape index: {}]  }
   0x1   :  { %15 = vsyncpa [#allocation5], 0 }
   0x2   :  { %16 = vsyncpa [#allocation8], 0 }
   0x3   :  { %17 = vsyncpa [#allocation11], 0  ;;  %s9854_s30 = smov [#allocation4]   ;;  %s9855_s11 = smov [#allocation7]  }
   0x4   :  { %s38_s10 = sshll.u32 %s9854_s30, 4  ;;  %s60_s12 = sshll.u32 %s9855_s11, 4  ;;  %s39_s10 = int_to_ptr.vmem [resolvable:$true] %s38_s10  ;;  %s61_s12 = int_to_ptr.vmem [resolvable:$true] %s60_s12 }
   0x5   :  { %s9714_s13 = scalar_lea.vmem %s39_s10, 16  ;;  %s9718_s14 = scalar_lea.vmem %s39_s10, 32 }
   0x6   :  { %p9715_p0 = scmp.ne.s32.totalorder %s39_s10, %s9714_s13  ;;  %p9719_p1 = scmp.lt.s32.totalorder %s39_s10, %s39_s10 }
   0x7   :  { %p9720_p2 = scmp.lt.s32.totalorder %s9718_s14, %s9714_s13 }
   0x9   :  { %p9721_p3 = por %p9720_p2, %p9719_p1 }
   0xb   :  { %p9722_p4 = pnand %p9721_p3, %p9715_p0 }
   0xd   :  { %9725 = shalt.err (!%p9722_p4)
}
   0xe   :  { %41 = dma.hbm_to_vmem [thread:$0]  %s11179_s2, 16, %s39_s10, [#allocation5]  }
   0xf   :  { %s9734_s17 = scalar_lea.vmem %s61_s12, 32  ;;  %p9739_p6 = scmp.lt.s32.totalorder %s61_s12, %s61_s12 }
  0x10   :  { %p9735_p5 = scmp.ne.s32.totalorder %s61_s12, %s9734_s17  ;;  %p9740_p7 = scmp.lt.s32.totalorder %s9734_s17, %s9734_s17 }
  0x12   :  { %p9741_p8 = por %p9740_p7, %p9739_p6 }
  0x14   :  { %p9742_p9 = pnand %p9741_p8, %p9735_p5 }
  0x16   :  { %9745 = shalt.err (!%p9742_p9)
}
  0x17   :  { %63 = dma.hbm_to_vmem [thread:$0]  %s11181_s4, 32, %s61_s12, [#allocation8]  }
  0x18   :  { %s9856_s20 = smov [#allocation10]   ;;  %s9857_s22 = smov [#allocation2]  }
  0x19   :  { %s82_s21 = sshll.u32 %s9856_s20, 4  ;;  %s25_s23 = sshll.u32 %s9857_s22, 4  ;;  %s83_s21 = int_to_ptr.vmem [resolvable:$true] %s82_s21  ;;  %s26_s23 = int_to_ptr.vmem [resolvable:$true] %s25_s23 }
  0x1a   :  { %s9754_s24 = scalar_lea.vmem %s83_s21, 64  ;;  %p9759_p11 = scmp.lt.s32.totalorder %s83_s21, %s83_s21 }
  0x1b   :  { %p9755_p10 = scmp.ne.s32.totalorder %s83_s21, %s9754_s24  ;;  %p9760_p12 = scmp.lt.s32.totalorder %s9754_s24, %s9754_s24 }
  0x1d   :  { %p9761_p13 = por %p9760_p12, %p9759_p11 }
  0x1f   :  { %p9762_p0 = pnand %p9761_p13, %p9755_p10 }
  0x21   :  { %9765 = shalt.err (!%p9762_p0)
}
  0x22   :  { %85 = dma.hbm_to_vmem [thread:$0]  %s11183_s6, 64, %s83_s21, [#allocation11]  }
  0x23   :  { %s9774_s26 = scalar_lea.vmem %s26_s23, 2560  ;;  %p9779_p2 = scmp.lt.s32.totalorder %s26_s23, %s26_s23 }
  0x24   :  { %p9775_p1 = scmp.ne.s32.totalorder %s26_s23, %s9774_s26  ;;  %p9780_p3 = scmp.lt.s32.totalorder %s9774_s26, %s9774_s26 }
  0x26   :  { %p9781_p4 = por %p9780_p3, %p9779_p2 }
  0x28   :  { %p9782_p5 = pnand %p9781_p4, %p9775_p1 }
  0x2a   :  { %9785 = shalt.err (!%p9782_p5)
}
  0x2b   :  { %s9858_s4 = smov 128   ;;  %s9859_s27 = smov 8  }
  0x2c   :  { %31 = dma.hbm_to_vmem [thread:$0]  %s11178_s1, 2560, %s26_s23, [#allocation3], %s9858_s4, %s9858_s4, %s9859_s27  }
  0x2d   :  { %s9860_s30 = smov [#allocation6]   ;;  %s9861_s11 = smov [#allocation9]  }
  0x2e   :  { %s47_s10 = sshll.u32 %s9860_s30, 4  ;;  %s69_s12 = sshll.u32 %s9861_s11, 4  ;;  %s48_s10 = int_to_ptr.vmem [resolvable:$true] %s47_s10  ;;  %s70_s12 = int_to_ptr.vmem [resolvable:$true] %s69_s12 }
  0x2f   :  { %s9794_s6 = scalar_lea.vmem %s48_s10, 6144  ;;  %p9799_p7 = scmp.lt.s32.totalorder %s48_s10, %s48_s10 }
  0x30   :  { %p9795_p6 = scmp.ne.s32.totalorder %s48_s10, %s9794_s6  ;;  %p9800_p8 = scmp.lt.s32.totalorder %s9794_s6, %s9794_s6 }
  0x32   :  { %p9801_p9 = por %p9800_p8, %p9799_p7 }
  0x34   :  { %p9802_p10 = pnand %p9801_p9, %p9795_p6 }
  0x36   :  { %9805 = shalt.err (!%p9802_p10)
}
  0x37   :  { %53 = dma.hbm_to_vmem [thread:$0]  %s11180_s3, 6144, %s48_s10, [#allocation5], %s9858_s4, %s9858_s4, %s9859_s27  }
  0x38   :  { %s9814_s15 = scalar_lea.vmem %s70_s12, 81920  ;;  %p9819_p12 = scmp.lt.s32.totalorder %s70_s12, %s70_s12 }
  0x39   :  { %p9815_p11 = scmp.ne.s32.totalorder %s70_s12, %s9814_s15  ;;  %p9820_p13 = scmp.lt.s32.totalorder %s9814_s15, %s9814_s15 }
  0x3b   :  { %p9821_p0 = por %p9820_p13, %p9819_p12 }
  0x3d   :  { %p9822_p1 = pnand %p9821_p0, %p9815_p11 }
  0x3f   :  { %9825 = shalt.err (!%p9822_p1)
}
  0x40   :  { %s9862_s1 = smov 256   ;;  %s9863_s16 = smov 16  }
  0x41   :  { %75 = dma.hbm_to_vmem [thread:$0]  %s11182_s5, 81920, %s70_s12, [#allocation8], %s9862_s1, %s9862_s1, %s9863_s16  }
  0x42   :  { %s9864_s19 = smov [#allocation12]  }
  0x43   :  { %s94_s20 = sshll.u32 %s9864_s19, 4  ;;  %s95_s20 = int_to_ptr.vmem [resolvable:$true] %s94_s20 }
  0x44   :  { %s9834_s21 = scalar_lea.vmem %s95_s20, 16  ;;  %s9838_s22 = scalar_lea.vmem %s95_s20, 32 }
  0x45   :  { %p9835_p2 = scmp.ne.s32.totalorder %s95_s20, %s9834_s21  ;;  %p9839_p3 = scmp.lt.s32.totalorder %s95_s20, %s95_s20 }
  0x46   :  { %p9840_p4 = scmp.lt.s32.totalorder %s9838_s22, %s9834_s21 }
  0x48   :  { %p9841_p5 = por %p9840_p4, %p9839_p3 }
  0x4a   :  { %p9842_p6 = pnand %p9841_p5, %p9835_p2 }
  0x4c   :  { %9845 = shalt.err (!%p9842_p6)
}
  0x4d   :  { %97 = dma.hbm_to_vmem [thread:$0]  %s11185_s8, 16, %s95_s20, [#allocation11]  }
  0x4e   :  { %9846 = dma.done.wait [#allocation3], 2560  }
  0x4f   :  { %9847 = vsyncadd [#allocation3], 4294964736 }
  0x50   :  { %9848 = dma.done.wait [#allocation5], 6160  }
  0x51   :  { %9849 = vsyncadd [#allocation5], 4294961136 }
  0x52   :  { %9850 = dma.done.wait [#allocation8], 81952  }
  0x53   :  { %9851 = vsyncadd [#allocation8], 4294885344 }
  0x54   :  { %9852 = dma.done.wait [#allocation11], 80  }
  0x55   :  { %9853 = vsyncadd [#allocation11], 4294967216  ;;  %v11187_v0 = vmov 0   ;;  %vm221_vm0 = vcmask 1045504   ;;  %v9940_v3 = vld [vmem:[#allocation2 + $0x24] ss:$8 sps:$4 sm:$0xff]  }
  0x56   :  { %260 = vmatprep.mubr.bf16.mxu0 %v11187_v0  ;;  %435 = vmatprep.mubr.bf16.mxu1 %v11187_v0  ;;  %v8564_v1 = vld [vmem:[#allocation2 + $0x34] ss:$8 sps:$4 sm:$0x3f]   ;;  %v8566_v2 = vld [vmem:[#allocation2 + $0x30] ss:$8 sps:$4 sm:$0x3f]  }
  0x57   :  { %7642 = vmatprep.subr.msk.bf16.mxu0 %vm221_vm0, %v8564_v1  ;;  %v9943_v4 = vsel %vm221_vm0, %v8566_v2, 0  ;;  %v9945_v5 = vld [vmem:[#allocation2 + $0x20] ss:$8 sps:$4 sm:$0xff]   ;;  %v9948_v6 = vld [vmem:[#allocation2 + $0x14] ss:$8 sps:$4 sm:$0x3f]  }
  0x58   :  { %241 = vmatpush1.bf16.msra.mxu0 %v9943_v4  ;;  %v8573_v7 = vld [vmem:[#allocation2 + $0x10] ss:$8 sps:$4 sm:$0x3f]   ;;  %v9951_v8 = vld [vmem:[#allocation2 + $0x4] ss:$8 sps:$4 sm:$0xff]   ;;  %vm202_vm1 = vcmask 228352   ;;  %8548 = vmatprep.subr.msk.bf16.mxu1 %vm221_vm0, %v9948_v6 }
  0x59   :  { %242 = vmatprep.subr.bf16.mxu0 %v9940_v3  ;;  %v8570_v9 = vld [vmem:[%s11177_s0 + $0x38] sm:$0xff]   ;;  %v9959_v10 = vsel %vm221_vm0, %v8573_v7, 0  ;;  %v9963_v11 = vld [vmem:[#allocation2] ss:$8 sps:$4 sm:$0xff]   ;;  %v8590_v18 = vld [vmem:[#allocation2 + $0x64] ss:$8 sps:$4 sm:$0xff]  }
  0x5a   :  { %8550 = vmatpush1.bf16.msra.mxu1 %v9959_v10  ;;  %v8578_v12 = vld [vmem:[%s11177_s0 + $0x8] sm:$0xff]   ;;  %v9972_v13 = vld [vmem:[#allocation2 + $0x74] ss:$8 sps:$4 sm:$0x3f]   ;;  %v8577_v16 = vld [vmem:[%s11177_s0 + $0x40] sm:$0xff]   ;;  %vm1885_vm2 = vcmask 1043456  }
  0x5b   :  { %8549 = vmatprep.subr.bf16.mxu1 %v9951_v8  ;;  %v8583_v14 = vld [vmem:[#allocation2 + $0x70] ss:$8 sps:$4 sm:$0x3f]   ;;  %v8588_v17 = vld [vmem:[#allocation2 + $0x60] ss:$8 sps:$4 sm:$0xff]   ;;  %vm7598_vm3 = vcmask 80896  }
  0x5c   :  { %243 = vmatpush1.bf16.msra.mxu0 %v9945_v5  ;;  %v9980_v15 = vsel %vm221_vm0, %v8583_v14, 0  ;;  %v8580_v19 = vld [vmem:[%s11177_s0 + $0x10] sm:$0xff]   ;;  %v8579_v21 = vld [vmem:[%s11177_s0 + $0x48] sm:$0xff]   ;;  %v8585_v22 = vld [vmem:[%s11177_s0 + $0x18] sm:$0xff]  }
  0x5d   :  { %7659 = vmatprep.subr.msk.bf16.mxu0 %vm221_vm0, %v9948_v6  ;;  %v8594_v20 = vld [vmem:[#allocation2 + $0x54] ss:$8 sps:$4 sm:$0x3f]   ;;  %v8587_v24 = vld [vmem:[%s11177_s0 + $0x20] sm:$0xff]   ;;  %v8592_v26 = vld [vmem:[%s11177_s0 + $0x28] sm:$0xff]  }
  0x5e   :  { %8551 = vmatpush1.bf16.msra.mxu1 %v9963_v11  ;;  %v8584_v23 = vld [vmem:[%s11177_s0 + $0x50] sm:$0xff]   ;;  %v8586_v25 = vld [vmem:[%s11177_s0 + $0x58] sm:$0xff]   ;;  %v8591_v27 = vld [vmem:[%s11177_s0 + $0x60] sm:$0xff]  }
  0x5f   :  { %7643 = vmatmul.mubr.msk.bf16.vlgmr.msra.gmra.mxu0 %vm202_vm1, %v8570_v9  ;;  %7705 = vmatprep.subr.msk.bf16.mxu1 %vm221_vm0, %v9972_v13  ;;  %v10035_v28 = vld [vmem:[%s11177_s0 + $0x3c] sm:$0xff]   ;;  %v8596_v29 = vld [vmem:[#allocation2 + $0x50] ss:$8 sps:$4 sm:$0x3f]   ;;  %v8599_v31 = vld [vmem:[#allocation2 + $0x44] ss:$8 sps:$4 sm:$0xff]  }
  0x60   :  { %406 = vmatpush1.bf16.msra.mxu0 %v9959_v10  ;;  %270 = vmatprep.mubr.bf16.mxu0 %v11187_v0  ;;  %v8593_v30 = vld [vmem:[%s11177_s0] sm:$0xff]   ;;  %v570_v32 = vsel %vm221_vm0, %v8596_v29, 0  ;;  %v8602_v35 = vld [vmem:[#allocation2 + $0x94] ss:$8 sps:$4 sm:$0x3f]   ;;  %v10072_v40 = vld [vmem:[%s11177_s0 + $0x4c] sm:$0xff]  }
  0x61   :  { %407 = vmatprep.subr.bf16.mxu0 %v9951_v8  ;;  %7661 = vmatmul.mubr.msk.bf16.vlgmr.msra.gmra.mxu1 %vm202_vm1, %v8578_v12  ;;  %v10050_v33 = vld [vmem:[%s11177_s0 + $0x44] sm:$0xff]   ;;  %v8604_v36 = vld [vmem:[#allocation2 + $0x90] ss:$8 sps:$4 sm:$0x3f]   ;;  %v10105_v45 = vld [vmem:[%s11177_s0 + $0x5c] sm:$0xff]  }
  0x62   :  { %445 = vmatprep.mubr.bf16.mxu1 %v11187_v0  ;;  %794 = vmatpush1.bf16.msra.mxu1 %v9980_v15  ;;  %v8597_v34 = vld [vmem:[#allocation2 + $0x40] ss:$8 sps:$4 sm:$0xff]   ;;  %v10062_v38 = vld [vmem:[#allocation2 + $0x84] ss:$8 sps:$4 sm:$0xff]   ;;  %v10067_v39 = vsel %vm221_vm0, %v8604_v36, 0  ;;  %v10090_v43 = vld [vmem:[%s11177_s0 + $0x54] sm:$0xff]  }
  0x63   :  { %795 = vmatprep.subr.bf16.mxu1 %v8590_v18  ;;  %v8601_v37 = vld [vmem:[%s11177_s0 + $0x4] sm:$0xff]   ;;  %v8606_v42 = vld [vmem:[%s11177_s0 + $0xc] sm:$0xff]   ;;  %v8608_v44 = vld [vmem:[%s11177_s0 + $0x14] sm:$0xff]  }
  0x64   :  { %408 = vmatpush1.bf16.msra.mxu0 %v9963_v11  ;;  %v10074_v41 = vld [vmem:[#allocation2 + $0x80] ss:$8 sps:$4 sm:$0xff]   ;;  %v8617_v49 = vld [vmem:[%s11177_s0 + $0x2c] sm:$0xff]   ;;  %v10166_v52 = vld [vmem:[%s11177_s0 + $0x18] sm:$0xff]  }
  0x65   :  { %7676 = vmatprep.subr.msk.bf16.mxu0 %vm221_vm0, %v8594_v20  ;;  %v8610_v46 = vld [vmem:[%s11177_s0 + $0x1c] sm:$0xff]   ;;  %v10118_v47 = vld [vmem:[%s11177_s0 + $0x64] sm:$0xff]   ;;  %v10152_v51 = vld [vmem:[%s11177_s0 + $0x10] sm:$0xff]  }
  0x66   :  { %796 = vmatpush1.bf16.msra.mxu1 %v8588_v17  ;;  %v8615_v48 = vld [vmem:[%s11177_s0 + $0x24] sm:$0xff]   ;;  %v10196_v55 = vld [vmem:[%s11177_s0 + $0x30] sm:$0xff]   ;;  %v9698_v56 = vld [vmem:[%s11177_s0 + $0x38] sm:$0xff]  }
  0x67   :  { %7644 = vmatmul.mubr.msk.bf16.gmra.mxu0 %vm202_vm1, %v8577_v16  ;;  %7730 = vmatprep.subr.msk.bf16.mxu1 %vm221_vm0, %v8564_v1  ;;  %v10140_v50 = vld [vmem:[%s11177_s0 + $0x8] sm:$0xff]   ;;  %v10176_v53 = vld [vmem:[%s11177_s0 + $0x20] sm:$0xff]   ;;  %v9703_v61 = vld [vmem:[%s11177_s0 + $0x50] sm:$0xff]  }
  0x68   :  { %280 = vmatprep.mubr.bf16.mxu0 %v11187_v0  ;;  %v10186_v54 = vld [vmem:[%s11177_s0 + $0x28] sm:$0xff]   ;;  %v9701_v59 = vld [vmem:[%s11177_s0 + $0x40] sm:$0xff]   ;;  %v9704_v63 = vld [vmem:[%s11177_s0 + $0x58] sm:$0xff]  }
  0x69   :  { %7662 = vmatmul.mubr.msk.bf16.gmra.mxu1 %vm202_vm1, %v8580_v19  ;;  %v9699_v57 = vld [vmem:[#allocation2 + $0x64] ss:$8 sps:$4 sm:$0xff]   ;;  %v9700_v58 = vld [vmem:[#allocation2 + $0x60] ss:$8 sps:$4 sm:$0xff]   ;;  %v8626_v9 = vld [vmem:[%s11177_s0 + $0x50] sm:$0xff]  }
  0x6a   :  { %455 = vmatprep.mubr.bf16.mxu1 %v11187_v0  ;;  %v9702_v60 = vld [vmem:[%s11177_s0 + $0x48] sm:$0xff]   ;;  %v8624_v62 = vld [vmem:[%s11177_s0 + $0x40] sm:$0xff]  }
  0x6b   :  { %v8625_v1 = vld [vmem:[%s11177_s0 + $0x48] sm:$0xff]  }
  0x6f   :  { %7645 = vmatmul.mubr.msk.bf16.gmra.mxu0 %vm202_vm1, %v8579_v21  ;;  %v8627_v21 = vld [vmem:[%s11177_s0 + $0x58] sm:$0xff]  }
  0x70   :  { %290 = vmatprep.mubr.bf16.mxu0 %v11187_v0 }
  0x71   :  { %7663 = vmatmul.mubr.msk.bf16.gmra.mxu1 %vm202_vm1, %v8585_v22 }
  0x72   :  { %465 = vmatprep.mubr.bf16.mxu1 %v11187_v0 }
  0x77   :  { %7646 = vmatmul.mubr.msk.bf16.gmra.mxu0 %vm202_vm1, %v8584_v23 }
  0x78   :  { %300 = vmatprep.mubr.bf16.mxu0 %v11187_v0 }
  0x79   :  { %7664 = vmatmul.mubr.msk.bf16.gmra.mxu1 %vm202_vm1, %v8587_v24 }
  0x7a   :  { %475 = vmatprep.mubr.bf16.mxu1 %v11187_v0 }
  0x7f   :  { %7647 = vmatmul.mubr.msk.bf16.gmra.mxu0 %vm202_vm1, %v8586_v25 }
  0x80   :  { %310 = vmatprep.mubr.bf16.mxu0 %v11187_v0 }
  0x81   :  { %7665 = vmatmul.mubr.msk.bf16.gmra.mxu1 %vm202_vm1, %v8592_v26 }
  0x82   :  { %813 = vmatprep.mubr.bf16.mxu1 %v11187_v0 }
  0x87   :  { %7648 = vmatmul.mubr.msk.bf16.gmra.mxu0 %vm202_vm1, %v8591_v27 }
  0x88   :  { %425 = vmatprep.mubr.bf16.mxu0 %v11187_v0 }
  0x89   :  { %7706 = vmatmul.mubr.msk.bf16.vlgmr.msra.gmra.mxu1 %vm202_vm1, %v10035_v28 }
  0x8a   :  { %1184 = vmatpush1.bf16.msra.mxu1 %v9943_v4  ;;  %823 = vmatprep.mubr.bf16.mxu1 %v11187_v0 }
  0x8b   :  { %1185 = vmatprep.subr.bf16.mxu1 %v9940_v3  ;;  %v9705_v3 = vld [vmem:[%s11177_s0 + $0x60] sm:$0xff]  }
  0x8e   :  { %1186 = vmatpush1.bf16.msra.mxu1 %v9945_v5 }
  0x8f   :  { %7660 = vmatmul.mubr.msk.bf16.vlgmr.msra.gmra.mxu0 %vm202_vm1, %v8593_v30  ;;  %7744 = vmatprep.subr.msk.bf16.mxu1 %vm221_vm0, %v8594_v20 }
  0x90   :  { %588 = vmatpush1.bf16.msra.mxu0 %v570_v32  ;;  %607 = vmatprep.mubr.bf16.mxu0 %v11187_v0 }
  0x91   :  { %589 = vmatprep.subr.bf16.mxu0 %v8599_v31  ;;  %7707 = vmatmul.mubr.msk.bf16.gmra.mxu1 %vm202_vm1, %v10050_v33 }
  0x92   :  { %833 = vmatprep.mubr.bf16.mxu1 %v11187_v0 }
  0x94   :  { %590 = vmatpush1.bf16.msra.mxu0 %v8597_v34 }
  0x95   :  { %7722 = vmatprep.subr.msk.bf16.mxu0 %vm221_vm0, %v8602_v35 }
  0x97   :  { %7677 = vmatmul.mubr.msk.bf16.vlgmr.msra.gmra.mxu0 %vm202_vm1, %v8601_v37 }
  0x98   :  { %1000 = vmatpush1.bf16.msra.mxu0 %v10067_v39  ;;  %617 = vmatprep.mubr.bf16.mxu0 %v11187_v0 }
  0x99   :  { %1001 = vmatprep.subr.bf16.mxu0 %v10062_v38  ;;  %7708 = vmatmul.mubr.msk.bf16.gmra.mxu1 %vm202_vm1, %v10072_v40 }
  0x9a   :  { %843 = vmatprep.mubr.bf16.mxu1 %v11187_v0 }
  0x9c   :  { %1002 = vmatpush1.bf16.msra.mxu0 %v10074_v41 }
  0x9d   :  { %7737 = vmatprep.subr.msk.bf16.mxu0 %vm221_vm0, %v9948_v6 }
  0x9f   :  { %7678 = vmatmul.mubr.msk.bf16.gmra.mxu0 %vm202_vm1, %v8606_v42 }
  0xa0   :  { %627 = vmatprep.mubr.bf16.mxu0 %v11187_v0 }
  0xa1   :  { %7709 = vmatmul.mubr.msk.bf16.gmra.mxu1 %vm202_vm1, %v10090_v43 }
  0xa2   :  { %853 = vmatprep.mubr.bf16.mxu1 %v11187_v0 }
  0xa7   :  { %7679 = vmatmul.mubr.msk.bf16.gmra.mxu0 %vm202_vm1, %v8608_v44 }
  0xa8   :  { %637 = vmatprep.mubr.bf16.mxu0 %v11187_v0 }
  0xa9   :  { %7710 = vmatmul.mubr.msk.bf16.gmra.mxu1 %vm202_vm1, %v10105_v45 }
  0xaa   :  { %863 = vmatprep.mubr.bf16.mxu1 %v11187_v0 }
  0xaf   :  { %7680 = vmatmul.mubr.msk.bf16.gmra.mxu0 %vm202_vm1, %v8610_v46 }
  0xb0   :  { %647 = vmatprep.mubr.bf16.mxu0 %v11187_v0 }
  0xb1   :  { %7711 = vmatmul.mubr.msk.bf16.gmra.mxu1 %vm202_vm1, %v10118_v47 }
  0xb2   :  { %1203 = vmatprep.mubr.bf16.mxu1 %v11187_v0 }
  0xb7   :  { %7681 = vmatmul.mubr.msk.bf16.gmra.mxu0 %vm202_vm1, %v8615_v48 }
  0xb8   :  { %657 = vmatprep.mubr.bf16.mxu0 %v11187_v0 }
  0xb9   :  { %7731 = vmatmul.mubr.msk.bf16.vlgmr.msra.gmra.mxu1 %vm202_vm1, %v8601_v37 }
  0xba   :  { %1370 = vmatpush1.bf16.msra.mxu1 %v570_v32  ;;  %1213 = vmatprep.mubr.bf16.mxu1 %v11187_v0 }
  0xbb   :  { %1371 = vmatprep.subr.bf16.mxu1 %v8599_v31 }
  0xbe   :  { %1372 = vmatpush1.bf16.msra.mxu1 %v8597_v34  ;;  %v8628_v34 = vld [vmem:[%s11177_s0 + $0x60] sm:$0xff]  }
  0xbf   :  { %7682 = vmatmul.mubr.msk.bf16.gmra.mxu0 %vm202_vm1, %v8617_v49  ;;  %7776 = vmatprep.subr.msk.bf16.mxu1 %vm221_vm0, %v8602_v35 }
  0xc0   :  { %1019 = vmatprep.mubr.bf16.mxu0 %v11187_v0 }
  0xc1   :  { %7732 = vmatmul.mubr.msk.bf16.gmra.mxu1 %vm202_vm1, %v8606_v42 }
  0xc2   :  { %1223 = vmatprep.mubr.bf16.mxu1 %v11187_v0 }
  0xc7   :  { %7723 = vmatmul.mubr.msk.bf16.vlgmr.msra.gmra.mxu0 %vm202_vm1, %v10140_v50 }
  0xc8   :  { %1277 = vmatpush1.bf16.msra.mxu0 %v9959_v10  ;;  %1029 = vmatprep.mubr.bf16.mxu0 %v11187_v0 }
  0xc9   :  { %1278 = vmatprep.subr.bf16.mxu0 %v9951_v8  ;;  %7733 = vmatmul.mubr.msk.bf16.gmra.mxu1 %vm202_vm1, %v8608_v44 }
  0xca   :  { %1233 = vmatprep.mubr.bf16.mxu1 %v11187_v0 }
  0xcc   :  { %1279 = vmatpush1.bf16.msra.mxu0 %v9963_v11 }
  0xcd   :  { %7751 = vmatprep.subr.msk.bf16.mxu0 %vm221_vm0, %v9972_v13 }
  0xcf   :  { %7724 = vmatmul.mubr.msk.bf16.gmra.mxu0 %vm202_vm1, %v10152_v51 }
  0xd0   :  { %1039 = vmatprep.mubr.bf16.mxu0 %v11187_v0 }
  0xd1   :  { %7734 = vmatmul.mubr.msk.bf16.gmra.mxu1 %vm202_vm1, %v8610_v46  ;;  %v8629_v46 = vld [vmem:[%s11177_s0 + $0x68] sm:$0xff]  }
  0xd2   :  { %1243 = vmatprep.mubr.bf16.mxu1 %v11187_v0 }
  0xd7   :  { %7725 = vmatmul.mubr.msk.bf16.gmra.mxu0 %vm202_vm1, %v10166_v52 }
  0xd8   :  { %1049 = vmatprep.mubr.bf16.mxu0 %v11187_v0 }
  0xd9   :  { %7735 = vmatmul.mubr.msk.bf16.gmra.mxu1 %vm202_vm1, %v8615_v48 }
  0xda   :  { %1253 = vmatprep.mubr.bf16.mxu1 %v11187_v0 }
  0xdf   :  { %7726 = vmatmul.mubr.msk.bf16.gmra.mxu0 %vm202_vm1, %v10176_v53 }
  0xe0   :  { %1059 = vmatprep.mubr.bf16.mxu0 %v11187_v0 }
  0xe1   :  { %7736 = vmatmul.mubr.msk.bf16.gmra.mxu1 %vm202_vm1, %v8617_v49 }
  0xe2   :  { %1389 = vmatprep.mubr.bf16.mxu1 %v11187_v0 }
  0xe7   :  { %7727 = vmatmul.mubr.msk.bf16.gmra.mxu0 %vm202_vm1, %v10186_v54 }
  0xe8   :  { %1069 = vmatprep.mubr.bf16.mxu0 %v11187_v0 }
  0xe9   :  { %7745 = vmatmul.mubr.msk.bf16.vlgmr.msra.gmra.mxu1 %vm202_vm1, %v10035_v28 }
  0xea   :  { %1664 = vmatpush1.bf16.msra.mxu1 %v10067_v39  ;;  %1399 = vmatprep.mubr.bf16.mxu1 %v11187_v0 }
  0xeb   :  { %1665 = vmatprep.subr.bf16.mxu1 %v10062_v38 }
  0xee   :  { %1666 = vmatpush1.bf16.msra.mxu1 %v10074_v41 }
  0xef   :  { %7728 = vmatmul.mubr.msk.bf16.gmra.mxu0 %vm202_vm1, %v10196_v55 }
  0xf0   :  { %1296 = vmatprep.mubr.bf16.mxu0 %v11187_v0 }
  0xf1   :  { %7746 = vmatmul.mubr.msk.bf16.gmra.mxu1 %vm202_vm1, %v10050_v33 }
  0xf2   :  { %1409 = vmatprep.mubr.bf16.mxu1 %v11187_v0 }
  0xf7   :  { %7738 = vmatmul.mubr.msk.bf16.vlgmr.msra.gmra.mxu0 %vm202_vm1, %v9698_v56 }
  0xf8   :  { %1487 = vmatpush1.bf16.msra.mxu0 %v9980_v15  ;;  %1306 = vmatprep.mubr.bf16.mxu0 %v11187_v0 }
  0xf9   :  { %1488 = vmatprep.subr.bf16.mxu0 %v9699_v57  ;;  %7747 = vmatmul.mubr.msk.bf16.gmra.mxu1 %vm202_vm1, %v10072_v40 }
  0xfa   :  { %1419 = vmatprep.mubr.bf16.mxu1 %v11187_v0 }
  0xfc   :  { %1489 = vmatpush1.bf16.msra.mxu0 %v9700_v58 }
  0xff   :  { %7739 = vmatmul.mubr.msk.bf16.gmra.mxu0 %vm202_vm1, %v9701_v59 }
 0x100   :  { %1316 = vmatprep.mubr.bf16.mxu0 %v11187_v0 }
 0x101   :  { %7748 = vmatmul.mubr.msk.bf16.gmra.mxu1 %vm202_vm1, %v10090_v43 }
 0x102   :  { %1429 = vmatprep.mubr.bf16.mxu1 %v11187_v0 }
 0x107   :  { %7740 = vmatmul.mubr.msk.bf16.gmra.mxu0 %vm202_vm1, %v9702_v60 }
 0x108   :  { %1326 = vmatprep.mubr.bf16.mxu0 %v11187_v0 }
 0x109   :  { %7749 = vmatmul.mubr.msk.bf16.gmra.mxu1 %vm202_vm1, %v10105_v45 }
 0x10a   :  { %1439 = vmatprep.mubr.bf16.mxu1 %v11187_v0 }
 0x10f   :  { %7741 = vmatmul.mubr.msk.bf16.gmra.mxu0 %vm202_vm1, %v9703_v61 }
 0x110   :  { %1336 = vmatprep.mubr.bf16.mxu0 %v11187_v0 }
 0x111   :  { %7750 = vmatmul.mubr.msk.bf16.gmra.mxu1 %vm202_vm1, %v10118_v47 }
 0x112   :  { %1683 = vmatprep.mubr.bf16.mxu1 %v11187_v0 }
 0x117   :  { %7742 = vmatmul.mubr.msk.bf16.gmra.mxu0 %vm202_vm1, %v9704_v63 }
 0x118   :  { %1346 = vmatprep.mubr.bf16.mxu0 %v11187_v0 }
 0x119   :  { %7777 = vmatmul.mubr.msk.bf16.vlgmr.msra.gmra.mxu1 %vm202_vm1, %v8624_v62 }
 0x11a   :  { %1693 = vmatprep.mubr.bf16.mxu1 %v11187_v0 }
 0x11f   :  { %v10256_v2 = vpop.f32.mrf.mxu0  ;;  %7743 = vmatmul.mubr.msk.bf16.gmra.mxu0 %vm202_vm1, %v9705_v3 }
 0x120   :  { %1506 = vmatprep.mubr.bf16.mxu0 %v11187_v0 }
 0x121   :  { %v10263_v4 = vpop.f32.mrf.mxu0  ;;  %v437_v6 = vpop.f32.mrf.mxu1  ;;  %7778 = vmatmul.mubr.msk.bf16.gmra.mxu1 %vm202_vm1, %v8625_v1 }
 0x122   :  { %1703 = vmatprep.mubr.bf16.mxu1 %v11187_v0 }
 0x123   :  { %v10265_v5 = vpop.f32.mrf.mxu0  ;;  %v439_v8 = vpop.f32.mrf.mxu1 }
 0x125   :  { %v10269_v7 = vpop.f32.mrf.mxu0  ;;  %v441_v11 = vpop.f32.mrf.mxu1 }
 0x127   :  { %v272_v10 = vpop.f32.mrf.mxu0  ;;  %7752 = vmatmul.mubr.msk.bf16.vlgmr.msra.gmra.mxu0 %vm202_vm1, %v10140_v50  ;;  %v443_v14 = vpop.f32.mrf.mxu1 }
 0x128   :  { %v10276_v12 = vadd.f32 %v437_v6, %v272_v10  ;;  %1516 = vmatprep.mubr.bf16.mxu0 %v11187_v0 }
 0x129   :  { %v274_v13 = vpop.f32.mrf.mxu0  ;;  %v447_v17 = vpop.f32.mrf.mxu1  ;;  %7779 = vmatmul.mubr.msk.bf16.gmra.mxu1 %vm202_vm1, %v8626_v9 }
 0x12a   :  { %v10279_v15 = vadd.f32 %v439_v8, %v274_v13  ;;  %1713 = vmatprep.mubr.bf16.mxu1 %v11187_v0 }
 0x12b   :  { %v276_v16 = vpop.f32.mrf.mxu0  ;;  %v449_v20 = vpop.f32.mrf.mxu1 }
 0x12c   :  { %v10282_v18 = vadd.f32 %v441_v11, %v276_v16 }
 0x12d   :  { %v278_v19 = vpop.f32.mrf.mxu0  ;;  %v451_v24 = vpop.f32.mrf.mxu1 }
 0x12e   :  { %v10288_v22 = vadd.f32 %v443_v14, %v278_v19 }
 0x12f   :  { %v282_v23 = vpop.f32.mrf.mxu0  ;;  %7753 = vmatmul.mubr.msk.bf16.gmra.mxu0 %vm202_vm1, %v10152_v51  ;;  %v10295_v27 = vpop.f32.mrf.mxu1 }
 0x130   :  { %v10292_v25 = vadd.f32 %v447_v17, %v282_v23  ;;  %1526 = vmatprep.mubr.bf16.mxu0 %v11187_v0 }
 0x131   :  { %v284_v26 = vpop.f32.mrf.mxu0  ;;  %v457_v30 = vpop.f32.mrf.mxu1  ;;  %7780 = vmatmul.mubr.msk.bf16.gmra.mxu1 %vm202_vm1, %v8627_v21 }
 0x132   :  { %v10297_v28 = vadd.f32 %v449_v20, %v284_v26  ;;  %1723 = vmatprep.mubr.bf16.mxu1 %v11187_v0 }
 0x133   :  { %v286_v29 = vpop.f32.mrf.mxu0  ;;  %v459_v33 = vpop.f32.mrf.mxu1 }
 0x134   :  { %v10300_v31 = vadd.f32 %v451_v24, %v286_v29 }
 0x135   :  { %v10303_v32 = vpop.f32.mrf.mxu0  ;;  %v461_v36 = vpop.f32.mrf.mxu1 }
 0x137   :  { %v292_v35 = vpop.f32.mrf.mxu0  ;;  %7754 = vmatmul.mubr.msk.bf16.gmra.mxu0 %vm202_vm1, %v10166_v52  ;;  %v10313_v39 = vpop.f32.mrf.mxu1 }
 0x138   :  { %v10310_v37 = vadd.f32 %v457_v30, %v292_v35  ;;  %1536 = vmatprep.mubr.bf16.mxu0 %v11187_v0 }
 0x139   :  { %v294_v38 = vpop.f32.mrf.mxu0  ;;  %v467_v42 = vpop.f32.mrf.mxu1  ;;  %7781 = vmatmul.mubr.msk.bf16.gmra.mxu1 %vm202_vm1, %v8628_v34  ;;  %v8632_v34 = vld [vmem:[#allocation6 + $0xf4] ss:$8 sps:$4 sm:$0xff]  }
 0x13a   :  { %v10315_v40 = vadd.f32 %v459_v33, %v294_v38  ;;  %1733 = vmatprep.mubr.bf16.mxu1 %v11187_v0  ;;  %v8630_v33 = vld [vmem:[#allocation6 + $0xf0] ss:$8 sps:$4 sm:$0xff]   ;;  %1982 = vmatprep.subr.bf16.mxu0 %v8632_v34 }
 0x13b   :  { %v296_v41 = vpop.f32.mrf.mxu0  ;;  %v469_v45 = vpop.f32.mrf.mxu1  ;;  %1983 = vmatpush1.bf16.msra.mxu0 %v8630_v33 }
 0x13c   :  { %v10318_v43 = vadd.f32 %v461_v36, %v296_v41 }
 0x13d   :  { %v10321_v44 = vpop.f32.mrf.mxu0  ;;  %v471_v48 = vpop.f32.mrf.mxu1 }
 0x13f   :  { %v302_v47 = vpop.f32.mrf.mxu0  ;;  %7755 = vmatmul.mubr.msk.bf16.gmra.mxu0 %vm202_vm1, %v10176_v53  ;;  %v10331_v51 = vpop.f32.mrf.mxu1 }
 0x140   :  { %v10328_v49 = vadd.f32 %v467_v42, %v302_v47  ;;  %1546 = vmatprep.mubr.bf16.mxu0 %v11187_v0 }
 0x141   :  { %v304_v50 = vpop.f32.mrf.mxu0  ;;  %v477_v57 = vpop.f32.mrf.mxu1  ;;  %7782 = vmatmul.mubr.msk.bf16.gmra.mxu1 %vm202_vm1, %v8629_v46 }
 0x142   :  { %v10333_v52 = vadd.f32 %v469_v45, %v304_v50  ;;  %2177 = vmatprep.mubr.bf16.mxu1 %v11187_v0 }
 0x143   :  { %v306_v56 = vpop.f32.mrf.mxu0  ;;  %v479_v53 = vpop.f32.mrf.mxu1 }
 0x144   :  { %v10336_v58 = vadd.f32 %v471_v48, %v306_v56  ;;  %v8636_v56 = vld [vmem:[#allocation6 + $0xe0] ss:$8 sps:$4 sm:$0xff]  }
 0x145   :  { %v10339_v59 = vpop.f32.mrf.mxu0  ;;  %v481_v61 = vpop.f32.mrf.mxu1 }
 0x147   :  { %v312_v60 = vpop.f32.mrf.mxu0  ;;  %7756 = vmatmul.mubr.msk.bf16.gmra.mxu0 %vm202_vm1, %v10186_v54  ;;  %v10346_v1 = vpop.f32.mrf.mxu1 }
 0x148   :  { %v10343_v62 = vadd.f32 %v477_v57, %v312_v60  ;;  %1556 = vmatprep.mubr.bf16.mxu0 %v11187_v0  ;;  %v8638_v57 = vld [vmem:[#allocation6 + $0xe4] ss:$8 sps:$4 sm:$0xff]  }
 0x149   :  { %v314_v63 = vpop.f32.mrf.mxu0  ;;  %v815_v8 = vpop.f32.mrf.mxu1  ;;  %1984 = vmatprep.subr.bf16.mxu0 %v8638_v57 }
 0x14a   :  { %v10348_v3 = vadd.f32 %v479_v53, %v314_v63  ;;  %v8641_v53 = vld [vmem:[#allocation6 + $0x64] ss:$8 sps:$4 sm:$0xff]   ;;  %v8639_v63 = vld [vmem:[#allocation6 + $0x60] ss:$8 sps:$4 sm:$0xff]   ;;  %1985 = vmatpush1.bf16.msra.mxu0 %v8636_v56  ;;  %v8656_v56 = vld [vmem:[#allocation6 + $0x34] ss:$8 sps:$4 sm:$0xff]  }
 0x14b   :  { %v316_v6 = vpop.f32.mrf.mxu0  ;;  %v817_v11 = vpop.f32.mrf.mxu1 }
 0x14c   :  { %v10350_v9 = vadd.f32 %v481_v61, %v316_v6 }
 0x14d   :  { %v10352_v10 = vpop.f32.mrf.mxu0  ;;  %v819_v54 = vpop.f32.mrf.mxu1 }
 0x14f   :  { %v427_v13 = vpop.f32.mrf.mxu0  ;;  %7757 = vmatmul.mubr.msk.bf16.gmra.mxu0 %vm202_vm1, %v10196_v55  ;;  %v10358_v17 = vpop.f32.mrf.mxu1 }
 0x150   :  { %v428_v14 = vadd.f32 %v427_v13, %v10256_v2  ;;  %2014 = vmatprep.mubr.bf16.mxu0 %v11187_v0 }
 0x151   :  { %v429_v16 = vpop.f32.mrf.mxu0  ;;  %v825_v21 = vpop.f32.mrf.mxu1 }
 0x152   :  { %v430_v19 = vadd.f32 %v429_v16, %v10263_v4  ;;  %v8635_v4 = vld [vmem:[#allocation6 + $0x74] ss:$8 sps:$4 sm:$0xff]  }
 0x153   :  { %v431_v20 = vpop.f32.mrf.mxu0  ;;  %v827_v26 = vpop.f32.mrf.mxu1  ;;  %2145 = vmatprep.subr.bf16.mxu1 %v8635_v4  ;;  %v8648_v4 = vld [vmem:[#allocation6 + $0x40] ss:$8 sps:$4 sm:$0xff]  }
 0x154   :  { %v432_v23 = vadd.f32 %v431_v20, %v10265_v5  ;;  %v8633_v5 = vld [vmem:[#allocation6 + $0x70] ss:$8 sps:$4 sm:$0xff]  }
 0x155   :  { %v10362_v24 = vpop.f32.mrf.mxu0  ;;  %v829_v30 = vpop.f32.mrf.mxu1  ;;  %2146 = vmatpush1.bf16.msra.mxu1 %v8633_v5  ;;  %v8645_v20 = vld [vmem:[#allocation6 + $0x50] ss:$8 sps:$4 sm:$0xff]  }
 0x156   :  { %2147 = vmatprep.subr.bf16.mxu1 %v8641_v53  ;;  %v8654_v53 = vld [vmem:[#allocation6 + $0x30] ss:$8 sps:$4 sm:$0xff]  }
 0x157   :  { %v609_v29 = vpop.f32.mrf.mxu0  ;;  %v10364_v35 = vpop.f32.mrf.mxu1 }
 0x158   :  { %v668_v55 = vadd.f32 %v609_v29, %v428_v14 }
 0x159   :  { %v611_v2 = vpop.f32.mrf.mxu0  ;;  %v835_v42 = vpop.f32.mrf.mxu1  ;;  %2148 = vmatpush1.bf16.msra.mxu1 %v8639_v63 }
 0x15a   :  { %v669_v36 = vadd.f32 %v611_v2, %v430_v19  ;;  %v10366_v38 = vadd.f32 %v815_v8, %v668_v55  ;;  %v8644_v55 = vld [vmem:[#allocation6 + $0xd4] ss:$8 sps:$4 sm:$0xff]  }
 0x15b   :  { %v613_v41 = vpop.f32.mrf.mxu0  ;;  %v837_v48 = vpop.f32.mrf.mxu1  ;;  %1986 = vmatprep.subr.bf16.mxu0 %v8644_v55  ;;  %v8651_v55 = vld [vmem:[#allocation6 + $0xc0] ss:$8 sps:$4 sm:$0xff]  }
 0x15c   :  { %v670_v45 = vadd.f32 %v613_v41, %v432_v23  ;;  %v10368_v46 = vadd.f32 %v817_v11, %v669_v36 }
 0x15d   :  { %v10370_v47 = vpop.f32.mrf.mxu0  ;;  %v839_v61 = vpop.f32.mrf.mxu1 }
 0x15e   :  { %v10372_v50 = vadd.f32 %v819_v54, %v670_v45  ;;  %v8647_v54 = vld [vmem:[#allocation6 + $0x54] ss:$8 sps:$4 sm:$0xff]  }
 0x15f   :  { %v619_v60 = vpop.f32.mrf.mxu0  ;;  %v10375_v11 = vpop.f32.mrf.mxu1  ;;  %2149 = vmatprep.subr.bf16.mxu1 %v8647_v54 }
 0x160   :  { %v672_v6 = vadd.f32 %v619_v60, %v10276_v12  ;;  %v8642_v12 = vld [vmem:[#allocation6 + $0xd0] ss:$8 sps:$4 sm:$0xff]   ;;  %2150 = vmatpush1.bf16.msra.mxu1 %v8645_v20 }
 0x161   :  { %v621_v8 = vpop.f32.mrf.mxu0  ;;  %v845_v19 = vpop.f32.mrf.mxu1  ;;  %1987 = vmatpush1.bf16.msra.mxu0 %v8642_v12 }
 0x162   :  { %v673_v13 = vadd.f32 %v621_v8, %v10279_v15  ;;  %v10378_v14 = vadd.f32 %v825_v21, %v672_v6  ;;  %v8650_v15 = vld [vmem:[#allocation6 + $0x44] ss:$8 sps:$4 sm:$0xff]  }
 0x163   :  { %v623_v16 = vpop.f32.mrf.mxu0  ;;  %v847_v34 = vpop.f32.mrf.mxu1  ;;  %2151 = vmatprep.subr.bf16.mxu1 %v8650_v15 }
 0x164   :  { %v674_v23 = vadd.f32 %v623_v16, %v10282_v18  ;;  %v10381_v29 = vadd.f32 %v827_v26, %v673_v13  ;;  %2152 = vmatpush1.bf16.msra.mxu1 %v8648_v4  ;;  %v8662_v13 = vld [vmem:[#allocation6 + $0x24] ss:$8 sps:$4 sm:$0xff]  }
 0x165   :  { %v10383_v33 = vpop.f32.mrf.mxu0  ;;  %v849_v36 = vpop.f32.mrf.mxu1  ;;  %2153 = vmatprep.subr.bf16.mxu1 %v8656_v56  ;;  %v8659_v56 = vld [vmem:[#allocation6 + $0xb4] ss:$8 sps:$4 sm:$0xff]  }
 0x166   :  { %v10385_v2 = vadd.f32 %v829_v30, %v674_v23 }
 0x167   :  { %v629_v21 = vpop.f32.mrf.mxu0  ;;  %v10388_v26 = vpop.f32.mrf.mxu1 }
 0x168   :  { %v676_v41 = vadd.f32 %v629_v21, %v10292_v25  ;;  %2154 = vmatpush1.bf16.msra.mxu1 %v8654_v53  ;;  %v8665_v21 = vld [vmem:[#allocation6 + $0x14] ss:$8 sps:$4 sm:$0xff]  }
 0x169   :  { %v631_v18 = vpop.f32.mrf.mxu0  ;;  %v855_v57 = vpop.f32.mrf.mxu1  ;;  %2155 = vmatprep.subr.bf16.mxu1 %v8662_v13 }
 0x16a   :  { %v677_v5 = vadd.f32 %v631_v18, %v10297_v28  ;;  %v10391_v45 = vadd.f32 %v835_v42, %v676_v41  ;;  %v8660_v42 = vld [vmem:[#allocation6 + $0x20] ss:$8 sps:$4 sm:$0xff]  }
 0x16b   :  { %v633_v30 = vpop.f32.mrf.mxu0  ;;  %v857_v25 = vpop.f32.mrf.mxu1 }
 0x16c   :  { %v678_v60 = vadd.f32 %v633_v30, %v10300_v31  ;;  %v10394_v63 = vadd.f32 %v837_v48, %v677_v5  ;;  %v8653_v31 = vld [vmem:[#allocation6 + $0xc4] ss:$8 sps:$4 sm:$0xff]   ;;  %2156 = vmatpush1.bf16.msra.mxu1 %v8660_v42 }
 0x16d   :  { %v10396_v6 = vpop.f32.mrf.mxu0  ;;  %v859_v28 = vpop.f32.mrf.mxu1  ;;  %1988 = vmatprep.subr.bf16.mxu0 %v8653_v31  ;;  %2157 = vmatprep.subr.bf16.mxu1 %v8665_v21 }
 0x16e   :  { %v10398_v8 = vadd.f32 %v839_v61, %v678_v60  ;;  %1989 = vmatpush1.bf16.msra.mxu0 %v8651_v55  ;;  %v8671_v60 = vld [vmem:[#allocation6 + $0x4] ss:$8 sps:$4 sm:$0xff]  }
 0x16f   :  { %v639_v54 = vpop.f32.mrf.mxu0  ;;  %v10401_v23 = vpop.f32.mrf.mxu1  ;;  %1990 = vmatprep.subr.bf16.mxu0 %v8659_v56  ;;  %v8672_v56 = vld [vmem:[#allocation6 + $0x90] ss:$8 sps:$4 sm:$0xff]  }
 0x170   :  { %v680_v16 = vadd.f32 %v639_v54, %v10310_v37  ;;  %v8663_v37 = vld [vmem:[#allocation6 + $0x10] ss:$8 sps:$4 sm:$0xff]  }
 0x171   :  { %v641_v20 = vpop.f32.mrf.mxu0  ;;  %v865_v61 = vpop.f32.mrf.mxu1  ;;  %2158 = vmatpush1.bf16.msra.mxu1 %v8663_v37 }
 0x172   :  { %v681_v48 = vadd.f32 %v641_v20, %v10315_v40  ;;  %v10404_v12 = vadd.f32 %v845_v19, %v680_v16  ;;  %v8657_v40 = vld [vmem:[#allocation6 + $0xb0] ss:$8 sps:$4 sm:$0xff]   ;;  %2159 = vmatprep.subr.bf16.mxu1 %v8671_v60 }
 0x173   :  { %v643_v15 = vpop.f32.mrf.mxu0  ;;  %v867_v5 = vpop.f32.mrf.mxu1  ;;  %1991 = vmatpush1.bf16.msra.mxu0 %v8657_v40 }
 0x174   :  { %v682_v4 = vadd.f32 %v643_v15, %v10318_v43  ;;  %v10407_v41 = vadd.f32 %v847_v34, %v681_v48  ;;  %v8669_v43 = vld [vmem:[#allocation6] ss:$8 sps:$4 sm:$0xff]  }
 0x175   :  { %v10409_v18 = vpop.f32.mrf.mxu0  ;;  %v869_v53 = vpop.f32.mrf.mxu1  ;;  %2160 = vmatpush1.bf16.msra.mxu1 %v8669_v43  ;;  %v8666_v48 = vld [vmem:[#allocation6 + $0xa0] ss:$8 sps:$4 sm:$0xff]  }
 0x176   :  { %v10411_v30 = vadd.f32 %v849_v36, %v682_v4  ;;  %v8668_v36 = vld [vmem:[#allocation6 + $0xa4] ss:$8 sps:$4 sm:$0xff]  }
 0x177   :  { %v649_v19 = vpop.f32.mrf.mxu0  ;;  %v10414_v54 = vpop.f32.mrf.mxu1  ;;  %1992 = vmatprep.subr.bf16.mxu0 %v8668_v36 }
 0x178   :  { %v684_v13 = vadd.f32 %v649_v19, %v10328_v49  ;;  %1993 = vmatpush1.bf16.msra.mxu0 %v8666_v48 }
 0x179   :  { %v651_v34 = vpop.f32.mrf.mxu0  ;;  %v10419_v31 = vpop.f32.mrf.mxu1 }
 0x17a   :  { %v685_v42 = vadd.f32 %v651_v34, %v10333_v52  ;;  %v10417_v16 = vadd.f32 %v855_v57, %v684_v13  ;;  %v8674_v52 = vld [vmem:[#allocation6 + $0x94] ss:$8 sps:$4 sm:$0xff]   ;;  %v8677_v13 = vld [vmem:[#allocation6 + $0x84] ss:$8 sps:$4 sm:$0xff]   ;;  %v8675_v34 = vld [vmem:[#allocation6 + $0x80] ss:$8 sps:$4 sm:$0xff]  }
 0x17b   :  { %v653_v20 = vpop.f32.mrf.mxu0  ;;  %v10426_v21 = vpop.f32.mrf.mxu1  ;;  %1994 = vmatprep.subr.bf16.mxu0 %v8674_v52 }
 0x17c   :  { %v686_v55 = vadd.f32 %v653_v20, %v10336_v58  ;;  %v10422_v15 = vadd.f32 %v857_v25, %v685_v42  ;;  %1995 = vmatpush1.bf16.msra.mxu0 %v8672_v56 }
 0x17d   :  { %v10424_v49 = vpop.f32.mrf.mxu0  ;;  %v10430_v37 = vpop.f32.mrf.mxu1  ;;  %1996 = vmatprep.subr.bf16.mxu0 %v8677_v13 }
 0x17e   :  { %v10428_v4 = vadd.f32 %v859_v28, %v686_v55 }
 0x17f   :  { %v659_v57 = vpop.f32.mrf.mxu0  ;;  %v10433_v58 = vpop.f32.mrf.mxu1 }
 0x180   :  { %v688_v40 = vadd.f32 %v659_v57, %v10343_v62  ;;  %1997 = vmatpush1.bf16.msra.mxu0 %v8675_v34 }
 0x181   :  { %v661_v19 = vpop.f32.mrf.mxu0  ;;  %v10438_v28 = vpop.f32.mrf.mxu1 }
 0x182   :  { %v689_v25 = vadd.f32 %v661_v19, %v10348_v3  ;;  %v10436_v60 = vadd.f32 %v865_v61, %v688_v40  ;;  %v434_v3 = vadd.f32 %v10362_v24, %v10269_v7  ;;  %v10449_v61 = vld [vmem:[#allocation4] ss:$0 sm:$0xff] }
 0x183   :  { %v663_v43 = vpop.f32.mrf.mxu0  ;;  %v10445_v20 = vpop.f32.mrf.mxu1 }
 0x184   :  { %v690_v42 = vadd.f32 %v663_v43, %v10350_v9  ;;  %v10441_v36 = vadd.f32 %v867_v5, %v689_v25  ;;  %v671_v9 = vadd.f32 %v10370_v47, %v434_v3 }
 0x185   :  { %v10443_v62 = vpop.f32.mrf.mxu0  ;;  %v10453_v52 = vpop.f32.mrf.mxu1 }
 0x186   :  { %v10451_v48 = vadd.f32 %v869_v53, %v690_v42  ;;  %v877_v13 = vadd.f32 %v10358_v17, %v671_v9 }
 0x187   :  { %v1021_v55 = vpop.f32.mrf.mxu0  ;;  %v10457_v56 = vpop.f32.mrf.mxu1 }
 0x188   :  { %v1080_v5 = vadd.f32 %v1021_v55, %v10366_v38  ;;  %v8680_v55 = vld [vmem:[#allocation6 + $0x174] ss:$8 sps:$4 sm:$0xff]  }
 0x189   :  { %v1023_v57 = vpop.f32.mrf.mxu0  ;;  %v10461_v7 = vpop.f32.mrf.mxu1  ;;  %2325 = vmatprep.subr.bf16.mxu0 %v8680_v55 }
 0x18a   :  { %v1111_v40 = vadd.f32 %v10449_v61, %v1080_v5  ;;  %v1081_v19 = vadd.f32 %v1023_v57, %v10368_v46  ;;  %v675_v57 = vadd.f32 %v10383_v33, %v10288_v22 }
 0x18b   :  { %v1025_v25 = vpop.f32.mrf.mxu0  ;;  %v10466_v47 = vpop.f32.mrf.mxu1 }
 0x18c   :  { %v1135_v24 = vadd.f32 %v10449_v61, %v1081_v19  ;;  %v1082_v53 = vadd.f32 %v1025_v25, %v10372_v50  ;;  %v1123_v38 = vmax.f32 %v1111_v40, 0.0 }
 0x18d   :  { %v1027_v43 = vpop.f32.mrf.mxu0  ;;  %v10469_v46 = vpop.f32.mrf.mxu1 }
 0x18e   :  { %v1147_v34 = vmax.f32 %v1135_v24, 0.0  ;;  %v1112_v42 = vadd.f32 %v10449_v61, %v1082_v53  ;;  %v1083_v3 = vadd.f32 %v1027_v43, %v877_v13 }
 0x18f   :  { %v1031_v5 = vpop.f32.mrf.mxu0  ;;  %v10477_v40 = vpop.f32.mrf.mxu1 }
 0x190   :  { %v10473_v19 = vmax.f32 %v1123_v38, %v1147_v34  ;;  %v1136_v50 = vadd.f32 %v10449_v61, %v1083_v3  ;;  %v1084_v17 = vadd.f32 %v1031_v5, %v10378_v14  ;;  %v1124_v25 = vmax.f32 %v1112_v42, 0.0 }
 0x191   :  { %v1033_v9 = vpop.f32.mrf.mxu0  ;;  %v10481_v0 = vpop.f32.mrf.mxu1  ;;  %v881_v14 = vadd.f32 %v10364_v35, %v675_v57  ;;  %v454_v34 = vadd.f32 %v10295_v27, %v10303_v32 }
 0x192   :  { %v1148_v24 = vmax.f32 %v1136_v50, 0.0  ;;  %v1113_v53 = vadd.f32 %v10449_v61, %v1084_v17  ;;  %v1085_v13 = vadd.f32 %v1033_v9, %v10381_v29  ;;  %11189 = vst [vmem:[#allocation17_spill] sm:$0xff] %v10481_v0 }
 0x193   :  { %v1035_v43 = vpop.f32.mrf.mxu0  ;;  %v10490_v3 = vpop.f32.mrf.mxu1 }
 0x194   :  { %v10483_v22 = vmax.f32 %v1124_v25, %v1148_v24  ;;  %v1137_v33 = vadd.f32 %v10449_v61, %v1085_v13  ;;  %v1086_v38 = vadd.f32 %v1035_v43, %v10385_v2  ;;  %11191 = vst [vmem:[#allocation19_spill] sm:$0xff] %v10490_v3  ;;  %v1125_v55 = vmax.f32 %v1113_v53, 0.0 }
 0x195   :  { %v1037_v42 = vpop.f32.mrf.mxu0  ;;  %v10493_v9 = vpop.f32.mrf.mxu1  ;;  %v679_v25 = vadd.f32 %v10396_v6, %v454_v34 }
 0x196   :  { %11190 = vst [vmem:[#allocation18_spill] sm:$0xff] %v10483_v22  ;;  %v1149_v5 = vmax.f32 %v1137_v33, 0.0  ;;  %v1114_v29 = vadd.f32 %v10449_v61, %v1086_v38  ;;  %v1087_v50 = vadd.f32 %v1037_v42, %v881_v14  ;;  %11192 = vst [vmem:[#allocation20_spill] sm:$0xff] %v10493_v9 }
 0x197   :  { %v1041_v17 = vpop.f32.mrf.mxu0  ;;  %v10500_v32 = vpop.f32.mrf.mxu1 }
 0x198   :  { %v10496_v24 = vmax.f32 %v1125_v55, %v1149_v5  ;;  %v1138_v35 = vadd.f32 %v10449_v61, %v1087_v50  ;;  %v1088_v2 = vadd.f32 %v1041_v17, %v10391_v45  ;;  %11194 = vst [vmem:[#allocation22_spill] sm:$0xff] %v10500_v32  ;;  %v1126_v57 = vmax.f32 %v1114_v29, 0.0 }
 0x199   :  { %v1043_v27 = vpop.f32.mrf.mxu0  ;;  %v10504_v38 = vpop.f32.mrf.mxu1  ;;  %v885_v45 = vadd.f32 %v10375_v11, %v679_v25 }
 0x19a   :  { %11193 = vst [vmem:[#allocation21_spill] sm:$0xff] %v10496_v24  ;;  %v1150_v53 = vmax.f32 %v1138_v35, 0.0  ;;  %v1115_v13 = vadd.f32 %v10449_v61, %v1088_v2  ;;  %v1089_v43 = vadd.f32 %v1043_v27, %v10394_v63  ;;  %11195 = vst [vmem:[#allocation23_spill] sm:$0xff] %v10504_v38 }
 0x19b   :  { %v1045_v33 = vpop.f32.mrf.mxu0  ;;  %v10511_v55 = vpop.f32.mrf.mxu1 }
 0x19c   :  { %v10506_v14 = vmax.f32 %v1126_v57, %v1150_v53  ;;  %v1139_v6 = vadd.f32 %v10449_v61, %v1089_v43  ;;  %v1090_v34 = vadd.f32 %v1045_v33, %v10398_v8  ;;  %11197 = vst [vmem:[#allocation25_spill] sm:$0xff] %v10511_v55  ;;  %v1127_v5 = vmax.f32 %v1115_v13, 0.0 }
 0x19d   :  { %v1047_v42 = vpop.f32.mrf.mxu0  ;;  %v10514_v35 = vpop.f32.mrf.mxu1 }
 0x19e   :  { %11196 = vst [vmem:[#allocation24_spill] sm:$0xff] %v10506_v14  ;;  %v1151_v29 = vmax.f32 %v1139_v6, 0.0  ;;  %v1116_v50 = vadd.f32 %v10449_v61, %v1090_v34  ;;  %v1091_v17 = vadd.f32 %v1047_v42, %v885_v45  ;;  %11198 = vst [vmem:[#allocation26_spill] sm:$0xff] %v10514_v35 }
 0x19f   :  { %v1051_v63 = vpop.f32.mrf.mxu0  ;;  %v10520_v53 = vpop.f32.mrf.mxu1 }
 0x1a0   :  { %v10516_v2 = vmax.f32 %v1127_v5, %v1151_v29  ;;  %v1140_v27 = vadd.f32 %v10449_v61, %v1091_v17  ;;  %v1092_v57 = vadd.f32 %v1051_v63, %v10404_v12  ;;  %11200 = vst [vmem:[#allocation28_spill] sm:$0xff] %v10520_v53  ;;  %v1128_v11 = vmax.f32 %v1116_v50, 0.0 }
 0x1a1   :  { %v1053_v8 = vpop.f32.mrf.mxu0  ;;  %v10524_v6 = vpop.f32.mrf.mxu1 }
 0x1a2   :  { %11199 = vst [vmem:[#allocation27_spill] sm:$0xff] %v10516_v2  ;;  %v1152_v25 = vmax.f32 %v1140_v27, 0.0  ;;  %v1117_v13 = vadd.f32 %v10449_v61, %v1092_v57  ;;  %v1093_v43 = vadd.f32 %v1053_v8, %v10407_v41  ;;  %11201 = vst [vmem:[#allocation29_spill] sm:$0xff] %v10524_v6 }
 0x1a3   :  { %v1055_v33 = vpop.f32.mrf.mxu0  ;;  %v10534_v5 = vpop.f32.mrf.mxu1 }
 0x1a4   :  { %v10526_v34 = vmax.f32 %v1128_v11, %v1152_v25  ;;  %v1141_v45 = vadd.f32 %v10449_v61, %v1093_v43  ;;  %v10530_v42 = vadd.f32 %v1055_v33, %v10411_v30  ;;  %11203 = vst [vmem:[#allocation31_spill] sm:$0xff] %v10534_v5  ;;  %v1129_v29 = vmax.f32 %v1117_v13, 0.0 }
 0x1a5   :  { %v10532_v12 = vpop.f32.mrf.mxu0  ;;  %v10536_v63 = vpop.f32.mrf.mxu1 }
 0x1a6   :  { %11202 = vst [vmem:[#allocation30_spill] sm:$0xff] %v10526_v34  ;;  %v1153_v50 = vmax.f32 %v1141_v45, 0.0  ;;  %11204 = vst [vmem:[#allocation32_spill] sm:$0xff] %v10536_v63 }
 0x1a7   :  { %v1061_v17 = vpop.f32.mrf.mxu0  ;;  %v10541_v8 = vpop.f32.mrf.mxu1 }
 0x1a8   :  { %v10538_v41 = vmax.f32 %v1129_v29, %v1153_v50  ;;  %v1096_v27 = vadd.f32 %v1061_v17, %v10417_v16  ;;  %11206 = vst [vmem:[#allocation34_spill] sm:$0xff] %v10541_v8 }
 0x1a9   :  { %v1063_v57 = vpop.f32.mrf.mxu0  ;;  %v10545_v43 = vpop.f32.mrf.mxu1 }
 0x1aa   :  { %11205 = vst [vmem:[#allocation33_spill] sm:$0xff] %v10538_v41  ;;  %v1119_v11 = vadd.f32 %v10449_v61, %v1096_v27  ;;  %v1097_v30 = vadd.f32 %v1063_v57, %v10422_v15 }
 0x1ab   :  { %v1065_v25 = vpop.f32.mrf.mxu0  ;;  %v10553_v29 = vpop.f32.mrf.mxu1 }
 0x1ac   :  { %v1143_v13 = vadd.f32 %v10449_v61, %v1097_v30  ;;  %v10549_v33 = vadd.f32 %v1065_v25, %v10428_v4  ;;  %v1131_v16 = vmax.f32 %v1119_v11, 0.0 }
 0x1ad   :  { %v10551_v45 = vpop.f32.mrf.mxu0  ;;  %v10555_v8 = vpop.f32.mrf.mxu1 }
 0x1ae   :  { %v1155_v50 = vmax.f32 %v1143_v13, 0.0 }
 0x1af   :  { %v1071_v17 = vpop.f32.mrf.mxu0  ;;  %v10560_v63 = vpop.f32.mrf.mxu1 }
 0x1b0   :  { %v10557_v27 = vmax.f32 %v1131_v16, %v1155_v50  ;;  %v1100_v15 = vadd.f32 %v1071_v17, %v10436_v60 }
 0x1b1   :  { %v1073_v57 = vpop.f32.mrf.mxu0  ;;  %v10564_v41 = vpop.f32.mrf.mxu1 }
 0x1b2   :  { %11207 = vst [vmem:[#allocation35_spill] sm:$0xff] %v10557_v27  ;;  %v1121_v30 = vadd.f32 %v10449_v61, %v1100_v15  ;;  %v1101_v4 = vadd.f32 %v1073_v57, %v10441_v36 }
 0x1b3   :  { %v1075_v25 = vpop.f32.mrf.mxu0  ;;  %v10572_v16 = vpop.f32.mrf.mxu1 }
 0x1b4   :  { %v1145_v11 = vadd.f32 %v10449_v61, %v1101_v4  ;;  %v10568_v13 = vadd.f32 %v1075_v25, %v10451_v48  ;;  %v1133_v60 = vmax.f32 %v1121_v30, 0.0 }
 0x1b5   :  { %v10570_v5 = vpop.f32.mrf.mxu0  ;;  %v10574_v27 = vpop.f32.mrf.mxu1 }
 0x1b6   :  { %11208 = vst [vmem:[#allocation36_spill] sm:$0xff] %v10568_v13  ;;  %11209 = vst [vmem:[#allocation37_spill] sm:$0xff] %v10570_v5  ;;  %v1157_v50 = vmax.f32 %v1145_v11, 0.0 }
 0x1b7   :  { %v1298_v17 = vpop.f32.mrf.mxu0  ;;  %v10578_v57 = vpop.f32.mrf.mxu1 }
 0x1b8   :  { %v10576_v15 = vmax.f32 %v1133_v60, %v1157_v50 }
 0x1b9   :  { %v1300_v36 = vpop.f32.mrf.mxu0  ;;  %v10580_v6 = vpop.f32.mrf.mxu1 }
 0x1ba   :  { %11210 = vst [vmem:[#allocation38_spill] sm:$0xff] %v10576_v15  ;;  %v1301_v22 = vadd.f32 %v1300_v36, %v10426_v21 }
 0x1bb   :  { %v1302_v34 = vpop.f32.mrf.mxu0  ;;  %v10582_v48 = vpop.f32.mrf.mxu1 }
 0x1bc   :  { %11211 = vst [vmem:[#allocation39_spill] sm:$0xff] %v10582_v48  ;;  %v1451_v21 = vadd.f32 %v10553_v29, %v1301_v22 }
 0x1bd   :  { %v1304_v4 = vpop.f32.mrf.mxu0  ;;  %v10584_v13 = vpop.f32.mrf.mxu1 }
 0x1be   :  { %11212 = vst [vmem:[#allocation40_spill] sm:$0xff] %v10584_v13 }
 0x1bf   :  { %v1308_v25 = vpop.f32.mrf.mxu0  ;;  %v10588_v30 = vpop.f32.mrf.mxu1 }
 0x1c0   :  { %11213 = vst [vmem:[#allocation41_spill] sm:$0xff] %v10588_v30 }
 0x1c1   :  { %v10586_v5 = vpop.f32.mrf.mxu0  ;;  %v10592_v60 = vpop.f32.mrf.mxu1 }
 0x1c2   :  { %11214 = vst [vmem:[#allocation42_spill] sm:$0xff] %v10592_v60 }
 0x1c3   :  { %v10590_v11 = vpop.f32.mrf.mxu0  ;;  %v10596_v15 = vpop.f32.mrf.mxu1 }
 0x1c4   :  { %11215 = vst [vmem:[#allocation43_spill] sm:$0xff] %v10596_v15 }
 0x1c5   :  { %v10594_v50 = vpop.f32.mrf.mxu0  ;;  %v10600_v2 = vpop.f32.mrf.mxu1 }
 0x1c6   :  { %11216 = vst [vmem:[#allocation44_spill] sm:$0xff] %v10600_v2 }
 0x1c7   :  { %v10598_v53 = vpop.f32.mrf.mxu0  ;;  %v10604_v55 = vpop.f32.mrf.mxu1 }
 0x1c8   :  { %11217 = vst [vmem:[#allocation45_spill] sm:$0xff] %v10604_v55 }
 0x1c9   :  { %v10602_v35 = vpop.f32.mrf.mxu0  ;;  %v10608_v38 = vpop.f32.mrf.mxu1 }
 0x1ca   :  { %11218 = vst [vmem:[#allocation46_spill] sm:$0xff] %v10608_v38 }
 0x1cb   :  { %v10606_v14 = vpop.f32.mrf.mxu0  ;;  %v10612_v32 = vpop.f32.mrf.mxu1 }
 0x1cc   :  { %11220 = vst [vmem:[#allocation48_spill] sm:$0xff] %v10612_v32 }
 0x1cd   :  { %v10610_v24 = vpop.f32.mrf.mxu0  ;;  %v10616_v9 = vpop.f32.mrf.mxu1 }
 0x1ce   :  { %11219 = vst [vmem:[#allocation47_spill] sm:$0xff] %v10610_v24  ;;  %11222 = vst [vmem:[#allocation50_spill] sm:$0xff] %v10616_v9 }
 0x1cf   :  { %v10614_v60 = vpop.f32.mrf.mxu0  ;;  %v10620_v30 = vpop.f32.mrf.mxu1 }
 0x1d0   :  { %11221 = vst [vmem:[#allocation49_spill] sm:$0xff] %v10614_v60  ;;  %11224 = vst [vmem:[#allocation52_spill] sm:$0xff] %v10620_v30 }
 0x1d1   :  { %v10618_v15 = vpop.f32.mrf.mxu0  ;;  %v10624_v3 = vpop.f32.mrf.mxu1 }
 0x1d2   :  { %11223 = vst [vmem:[#allocation51_spill] sm:$0xff] %v10618_v15  ;;  %11226 = vst [vmem:[#allocation54_spill] sm:$0xff] %v10624_v3  ;;  %v464_v3 = vadd.f32 %v10313_v39, %v10321_v44  ;;  %v1303_v44 = vadd.f32 %v1302_v34, %v10430_v37  ;;  %v484_v34 = vadd.f32 %v10346_v1, %v10352_v10 }
 0x1d3   :  { %v10622_v2 = vpop.f32.mrf.mxu0  ;;  %v10628_v0 = vpop.f32.mrf.mxu1 }
 0x1d4   :  { %11225 = vst [vmem:[#allocation53_spill] sm:$0xff] %v10622_v2  ;;  %11228 = vst [vmem:[#allocation56_spill] sm:$0xff] %v10628_v0  ;;  %v1452_v37 = vadd.f32 %v10555_v8, %v1303_v44  ;;  %v1118_v8 = vadd.f32 %v10449_v61, %v10530_v42  ;;  %v1315_v42 = vadd.f32 %v10594_v50, %v10457_v56 }
 0x1d5   :  { %v10626_v55 = vpop.f32.mrf.mxu0  ;;  %v10632_v13 = vpop.f32.mrf.mxu1  ;;  %v1319_v56 = vadd.f32 %v10598_v53, %v10461_v7  ;;  %v1321_v53 = vadd.f32 %v10602_v35, %v10466_v47 }
 0x1d6   :  { %11227 = vst [vmem:[#allocation55_spill] sm:$0xff] %v10626_v55  ;;  %11230 = vst [vmem:[#allocation58_spill] sm:$0xff] %v10632_v13 }
 0x1d7   :  { %v10630_v38 = vpop.f32.mrf.mxu0  ;;  %v10636_v60 = vpop.f32.mrf.mxu1 }
 0x1d8   :  { %11229 = vst [vmem:[#allocation57_spill] sm:$0xff] %v10630_v38  ;;  %11232 = vst [vmem:[#allocation60_spill] sm:$0xff] %v10636_v60  ;;  %v683_v38 = vadd.f32 %v10409_v18, %v464_v3 }
 0x1d9   :  { %v10634_v32 = vpop.f32.mrf.mxu0  ;;  %v1685_v15 = vpop.f32.mrf.mxu1 }
 0x1da   :  { %11231 = vst [vmem:[#allocation59_spill] sm:$0xff] %v10634_v32  ;;  %v1299_v32 = vadd.f32 %v1298_v17, %v10419_v31  ;;  %v1305_v31 = vadd.f32 %v1304_v4, %v10433_v58 }
 0x1db   :  { %v10638_v9 = vpop.f32.mrf.mxu0  ;;  %v1687_v2 = vpop.f32.mrf.mxu1 }
 0x1dc   :  { %11233 = vst [vmem:[#allocation61_spill] sm:$0xff] %v10638_v9  ;;  %v1450_v18 = vadd.f32 %v10545_v43, %v1299_v32  ;;  %v474_v32 = vadd.f32 %v10331_v51, %v10339_v59  ;;  %v1311_v51 = vadd.f32 %v10586_v5, %v10445_v20  ;;  %v1313_v59 = vadd.f32 %v10590_v11, %v10453_v52 }
 0x1dd   :  { %v10640_v30 = vpop.f32.mrf.mxu0  ;;  %v1689_v0 = vpop.f32.mrf.mxu1 }
 0x1de   :  { %11234 = vst [vmem:[#allocation62_spill] sm:$0xff] %v10640_v30  ;;  %v889_v30 = vadd.f32 %v10388_v26, %v683_v38  ;;  %v1309_v38 = vadd.f32 %v1308_v25, %v10438_v28  ;;  %v1453_v28 = vadd.f32 %v10560_v63, %v1305_v31 }
 0x1df   :  { %v10644_v55 = vpop.f32.mrf.mxu0  ;;  %v1691_v13 = vpop.f32.mrf.mxu1 }
 0x1e0   :  { %11235 = vst [vmem:[#allocation63_spill] sm:$0xff] %v10644_v55  ;;  %v1095_v3 = vadd.f32 %v10532_v12, %v889_v30  ;;  %v1454_v63 = vadd.f32 %v10564_v41, %v1309_v38  ;;  %v1455_v41 = vadd.f32 %v10572_v16, %v1311_v51  ;;  %v1457_v16 = vadd.f32 %v10578_v57, %v1315_v42 }
 0x1e1   :  { %v10647_v48 = vpop.f32.mrf.mxu0  ;;  %v1695_v9 = vpop.f32.mrf.mxu1 }
 0x1e2   :  { %11236 = vst [vmem:[#allocation64_spill] sm:$0xff] %v10647_v48  ;;  %v1142_v58 = vadd.f32 %v10449_v61, %v1095_v3 }
 0x1e3   :  { %v10650_v60 = vpop.f32.mrf.mxu0  ;;  %v10656_v39 = vpop.f32.mrf.mxu1 }
 0x1e4   :  { %11237 = vst [vmem:[#allocation65_spill] sm:$0xff] %v10650_v60  ;;  %v1154_v25 = vmax.f32 %v1142_v58, 0.0 }
 0x1e5   :  { %v10654_v24 = vpop.f32.mrf.mxu0  ;;  %v10661_v55 = vpop.f32.mrf.mxu1 }
 0x1e6   :  { %11238 = vst [vmem:[#allocation66_spill] sm:$0xff] %v10654_v24 }
 0x1e7   :  { %v1508_v48 = vpop.f32.mrf.mxu0  ;;  %v10665_v26 = vpop.f32.mrf.mxu1 }
 0x1e8   :  { %v1567_v17 = vadd.f32 %v1508_v48, %v1450_v18  ;;  %v1130_v18 = vmax.f32 %v1118_v8, 0.0  ;;  %v11240_v8 = vld [vmem:[#allocation18_spill] sm:$0xff] }
 0x1e9   :  { %v1510_v36 = vpop.f32.mrf.mxu0  ;;  %v10674_v43 = vpop.f32.mrf.mxu1 }
 0x1ea   :  { %v1744_v24 = vadd.f32 %v1685_v15, %v1567_v17  ;;  %v1568_v60 = vadd.f32 %v1510_v36, %v1451_v21  ;;  %v687_v15 = vadd.f32 %v10424_v49, %v474_v32  ;;  %v691_v49 = vadd.f32 %v10443_v62, %v484_v34 }
 0x1eb   :  { %v1512_v12 = vpop.f32.mrf.mxu0  ;;  %v10685_v10 = vpop.f32.mrf.mxu1  ;;  %v1456_v62 = vadd.f32 %v10574_v27, %v1313_v59  ;;  %v10703_v36 = vmax.f32 %v1130_v18, %v1154_v25  ;;  %v11244_v25 = vld [vmem:[#allocation49_spill] sm:$0xff] }
 0x1ec   :  { %v1768_v22 = vadd.f32 %v10449_v61, %v1744_v24  ;;  %v1745_v29 = vadd.f32 %v1687_v2, %v1568_v60  ;;  %v1569_v4 = vadd.f32 %v1512_v12, %v1452_v37 }
 0x1ed   :  { %v1514_v1 = vpop.f32.mrf.mxu0  ;;  %v10692_v5 = vpop.f32.mrf.mxu1 }
 0x1ee   :  { %v1792_v24 = vadd.f32 %v10449_v61, %v1745_v29  ;;  %v1746_v2 = vadd.f32 %v1689_v0, %v1569_v4  ;;  %v1570_v48 = vadd.f32 %v1514_v1, %v1453_v28  ;;  %v1780_v30 = vmax.f32 %v1768_v22, 0.0 }
 0x1ef   :  { %v1518_v20 = vpop.f32.mrf.mxu0  ;;  %v893_v0 = vadd.f32 %v10401_v23, %v687_v15  ;;  %v10698_v31 = vpop.f32.mrf.mxu1  ;;  %v1458_v4 = vadd.f32 %v10580_v6, %v1319_v56  ;;  %v10724_v28 = vadd.f32 %v10449_v61, %v10549_v33  ;;  %v11248_v56 = vld [vmem:[#allocation20_spill] sm:$0xff] }
 0x1f0   :  { %v1804_v52 = vmax.f32 %v1792_v24, 0.0  ;;  %v1769_v11 = vadd.f32 %v10449_v61, %v1746_v2  ;;  %v1747_v60 = vadd.f32 %v1691_v13, %v1570_v48  ;;  %v1571_v44 = vadd.f32 %v1518_v20, %v1454_v63  ;;  %v11241_v24 = vld [vmem:[#allocation39_spill] sm:$0xff]  ;;  %v11242_v48 = vld [vmem:[#allocation40_spill] sm:$0xff] }
 0x1f1   :  { %v1520_v3 = vpop.f32.mrf.mxu0  ;;  %v10706_v13 = vadd.f32 %v10414_v54, %v691_v49  ;;  %v10709_v37 = vpop.f32.mrf.mxu1  ;;  %v1099_v47 = vadd.f32 %v10551_v45, %v893_v0  ;;  %v1459_v2 = vadd.f32 %v11241_v24, %v1321_v53  ;;  %v11243_v49 = vld [vmem:[#allocation17_spill] sm:$0xff] }
 0x1f2   :  { %v1816_v50 = vmax.f32 %v1780_v30, %v1804_v52  ;;  %v1793_v17 = vadd.f32 %v10449_v61, %v1747_v60  ;;  %v1748_v21 = vadd.f32 %v1695_v9, %v1571_v44  ;;  %v1572_v23 = vadd.f32 %v1520_v3, %v1455_v41  ;;  %v11247_v41 = vld [vmem:[#allocation41_spill] sm:$0xff] }
 0x1f3   :  { %v1522_v38 = vpop.f32.mrf.mxu0  ;;  %v1781_v32 = vmax.f32 %v1769_v11, 0.0  ;;  %v1323_v9 = vadd.f32 %v10606_v14, %v10469_v46  ;;  %v10718_v22 = vpop.f32.mrf.mxu1  ;;  %v11239_v46 = vld [vmem:[#allocation47_spill] sm:$0xff]  ;;  %v1329_v42 = vadd.f32 %v11244_v25, %v11243_v49  ;;  %v11261_v25 = vld [vmem:[#allocation25_spill] sm:$0xff] }
 0x1f4   :  { %v1828_v27 = vmax.f32 %v10473_v19, %v1816_v50  ;;  %v1805_v34 = vmax.f32 %v1793_v17, 0.0  ;;  %v1573_v7 = vadd.f32 %v1522_v38, %v1456_v62  ;;  %v1770_v54 = vadd.f32 %v10449_v61, %v1748_v21  ;;  %v11246_v11 = vld [vmem:[#allocation51_spill] sm:$0xff]  ;;  %v11249_v50 = vld [vmem:[#allocation53_spill] sm:$0xff] }
 0x1f5   :  { %v1749_v58 = vadd.f32 %v10656_v39, %v1572_v23  ;;  %v1524_v12 = vpop.f32.mrf.mxu0  ;;  %v1325_v14 = vadd.f32 %v11239_v46, %v10477_v40  ;;  %v10730_v15 = vpop.f32.mrf.mxu1  ;;  %v1460_v63 = vadd.f32 %v11242_v48, %v1323_v9  ;;  %v1333_v17 = vadd.f32 %v11249_v50, %v11248_v56  ;;  %v11255_v46 = vld [vmem:[#allocation23_spill] sm:$0xff] }
 0x1f6   :  { %v1817_v57 = vmax.f32 %v1781_v32, %v1805_v34  ;;  %v1750_v29 = vadd.f32 %v10661_v55, %v1573_v7  ;;  %v1574_v19 = vadd.f32 %v1524_v12, %v1457_v16  ;;  %v1782_v1 = vmax.f32 %v1770_v54, 0.0  ;;  %v11251_v16 = vld [vmem:[#allocation55_spill] sm:$0xff]  ;;  %v11252_v32 = vld [vmem:[#allocation21_spill] sm:$0xff] }
 0x1f7   :  { %v1794_v35 = vadd.f32 %v10449_v61, %v1749_v58  ;;  %v1528_v39 = vpop.f32.mrf.mxu0  ;;  %v10737_v40 = vpop.f32.mrf.mxu1  ;;  %v1461_v3 = vadd.f32 %v11247_v41, %v1325_v14  ;;  %v11253_v54 = vmov 0   ;;  %v11256_v14 = vld [vmem:[#allocation57_spill] sm:$0xff] }
 0x1f8   :  { %v1829_v51 = vmax.f32 %v11240_v8, %v1817_v57  ;;  %v1771_v55 = vadd.f32 %v10449_v61, %v1750_v29  ;;  %v1751_v6 = vadd.f32 %v10665_v26, %v1574_v19  ;;  %v1575_v59 = vadd.f32 %v1528_v39, %v1458_v4  ;;  %v11245_v26 = vld [vmem:[#allocation19_spill] sm:$0xff]  ;;  %v11254_v29 = vld [vmem:[#allocation42_spill] sm:$0xff] }
 0x1f9   :  { %v1806_v33 = vmax.f32 %v1794_v35, 0.0  ;;  %v1530_v45 = vpop.f32.mrf.mxu0  ;;  %v1331_v60 = vadd.f32 %v11246_v11, %v11245_v26  ;;  %v10748_v62 = vpop.f32.mrf.mxu1  ;;  %v1462_v19 = vadd.f32 %v11254_v29, %v1329_v42  ;;  %v10762_v4 = vadd.f32 %v10449_v61, %v1099_v47  ;;  %v11262_v42 = vld [vmem:[#allocation59_spill] sm:$0xff]  ;;  %v8683_v29 = vld [vmem:[#allocation6 + $0x164] ss:$8 sps:$4 sm:$0xff]  }
 0x1fa   :  { %v10741_v30 = vpack.c.bf16 %v1829_v51, %v1828_v27  ;;  %v1795_v20 = vadd.f32 %v10449_v61, %v1751_v6  ;;  %v1752_v52 = vadd.f32 %v10674_v43, %v1575_v59  ;;  %v1576_v18 = vadd.f32 %v1530_v45, %v1459_v2  ;;  %v11250_v43 = vld [vmem:[#allocation22_spill] sm:$0xff]  ;;  %v11257_v51 = vld [vmem:[#allocation43_spill] sm:$0xff]  ;;  %v11258_v6 = vld [vmem:[#allocation24_spill] sm:$0xff] }
 0x1fb   :  { %v1818_v44 = vmax.f32 %v1782_v1, %v1806_v33  ;;  %v1532_v0 = vpop.f32.mrf.mxu0  ;;  %v1783_v21 = vmax.f32 %v1771_v55, 0.0  ;;  %v1335_v27 = vadd.f32 %v11251_v16, %v11250_v43  ;;  %v1339_v35 = vadd.f32 %v11256_v14, %v11255_v46  ;;  %v10768_v55 = vpop.f32.mrf.mxu1  ;;  %v11259_v45 = vld [vmem:[#allocation44_spill] sm:$0xff]  ;;  %v11266_v16 = vld [vmem:[#allocation27_spill] sm:$0xff] }
 0x1fc   :  { %v1807_v23 = vmax.f32 %v1795_v20, 0.0  ;;  %v1577_v38 = vadd.f32 %v1532_v0, %v1460_v63  ;;  %2178 = vmatmul.mubr.bf16.vlgmr.msra.gmra.mxu1 %v10741_v30  ;;  %v1772_v7 = vadd.f32 %v10449_v61, %v1752_v52  ;;  %v1753_v53 = vadd.f32 %v10685_v10, %v1576_v18  ;;  %v11260_v63 = vld [vmem:[#allocation45_spill] sm:$0xff]  ;;  %v11263_v0 = vld [vmem:[#allocation46_spill] sm:$0xff]  ;;  %v11270_v46 = vld [vmem:[#allocation63_spill] sm:$0xff] }
 0x1fd   :  { %v1830_v34 = vmax.f32 %v11252_v32, %v1818_v44  ;;  %v1534_v9 = vpop.f32.mrf.mxu0  ;;  %2187 = vmatprep.mubr.bf16.mxu1 %v11253_v54  ;;  %v1463_v10 = vadd.f32 %v11257_v51, %v1331_v60  ;;  %v1464_v48 = vadd.f32 %v11259_v45, %v1333_v17  ;;  %v1465_v49 = vadd.f32 %v11260_v63, %v1335_v27 }
 0x1fe   :  { %v1819_v58 = vmax.f32 %v1783_v21, %v1807_v23  ;;  %v1754_v12 = vadd.f32 %v10692_v5, %v1577_v38  ;;  %v1578_v57 = vadd.f32 %v1534_v9, %v1461_v3  ;;  %v1796_v39 = vadd.f32 %v10449_v61, %v1753_v53  ;;  %v1729_v3 = vpop.f32.mrf.mxu1  ;;  %v11264_v23 = vld [vmem:[#allocation26_spill] sm:$0xff]  ;;  %v11265_v38 = vld [vmem:[#allocation61_spill] sm:$0xff]  ;;  %v11267_v53 = vld [vmem:[#allocation28_spill] sm:$0xff] }
 0x1ff   :  { %v1538_v8 = vpop.f32.mrf.mxu0  ;;  %v1784_v24 = vmax.f32 %v1772_v7, 0.0  ;;  %v1341_v20 = vadd.f32 %v11262_v42, %v11261_v25  ;;  %v1466_v41 = vadd.f32 %v11263_v0, %v1339_v35  ;;  %v1343_v43 = vadd.f32 %v11265_v38, %v11264_v23  ;;  %v8678_v7 = vld [vmem:[#allocation6 + $0x170] ss:$8 sps:$4 sm:$0xff]   ;;  %v11274_v42 = vld [vmem:[#allocation52_spill] sm:$0xff] }
 0x200   :  { %v1831_v59 = vmax.f32 %v11258_v6, %v1819_v58  ;;  %v1773_v5 = vadd.f32 %v10449_v61, %v1754_v12  ;;  %v1755_v1 = vadd.f32 %v10698_v31, %v1578_v57  ;;  %v1579_v33 = vadd.f32 %v1538_v8, %v1462_v19  ;;  %v11268_v9 = vld [vmem:[#allocation62_spill] sm:$0xff]  ;;  %v11269_v19 = vld [vmem:[#allocation29_spill] sm:$0xff]  ;;  %v11271_v8 = vld [vmem:[#allocation48_spill] sm:$0xff] }
 0x201   :  { %v1808_v47 = vmax.f32 %v1796_v39, 0.0  ;;  %v1540_v2 = vpop.f32.mrf.mxu0  ;;  %v1345_v58 = vadd.f32 %v11268_v9, %v11267_v53  ;;  %v1349_v14 = vadd.f32 %v11270_v46, %v11269_v19  ;;  %v1467_v51 = vadd.f32 %v11271_v8, %v1341_v20  ;;  %v11272_v6 = vld [vmem:[#allocation30_spill] sm:$0xff]  ;;  %v11279_v38 = vld [vmem:[#allocation32_spill] sm:$0xff] }
 0x202   :  { %v1797_v52 = vadd.f32 %v10449_v61, %v1755_v1  ;;  %v1756_v26 = vadd.f32 %v10709_v37, %v1579_v33  ;;  %v1580_v11 = vadd.f32 %v1540_v2, %v1463_v10  ;;  %v1785_v44 = vmax.f32 %v1773_v5, 0.0  ;;  %v1731_v10 = vpop.f32.mrf.mxu1  ;;  %v11273_v2 = vld [vmem:[#allocation50_spill] sm:$0xff] }
 0x203   :  { %v1820_v60 = vmax.f32 %v1784_v24, %v1808_v47  ;;  %v1542_v18 = vpop.f32.mrf.mxu0  ;;  %v10779_v31 = vpack.c.bf16 %v1831_v59, %v1830_v34  ;;  %v1886_v34 = vrot.slane %v10741_v30, 4  ;;  %v1468_v45 = vadd.f32 %v11273_v2, %v1343_v43  ;;  %v11280_v43 = vld [vmem:[#allocation65_spill] sm:$0xff]  ;;  %v8684_v53 = vld [vmem:[#allocation6 + $0x150] ss:$8 sps:$4 sm:$0xff]  }
 0x204   :  { %v1809_v56 = vmax.f32 %v1797_v52, 0.0  ;;  %v1774_v50 = vadd.f32 %v10449_v61, %v1756_v26  ;;  %v1757_v17 = vadd.f32 %v10718_v22, %v1580_v11  ;;  %v1581_v21 = vadd.f32 %v1542_v18, %v1464_v48  ;;  %v8681_v48 = vld [vmem:[#allocation6 + $0x160] ss:$8 sps:$4 sm:$0xff]   ;;  %v8686_v52 = vld [vmem:[#allocation6 + $0x154] ss:$8 sps:$4 sm:$0xff]   ;;  %v1735_v18 = vpop.f32.mrf.mxu1 }
 0x205   :  { %v1832_v37 = vmax.f32 %v11266_v16, %v1820_v60  ;;  %v1887_v27 = vrot.slane %v10779_v31, 4  ;;  %2188 = vmatmul.mubr.bf16.gmra.mxu1 %v10779_v31  ;;  %v1544_v32 = vpop.f32.mrf.mxu0  ;;  %v1469_v20 = vadd.f32 %v11274_v42, %v1345_v58  ;;  %v11275_v26 = vld [vmem:[#allocation31_spill] sm:$0xff]  ;;  %v11276_v11 = vld [vmem:[#allocation64_spill] sm:$0xff]  ;;  %v1353_v16 = vadd.f32 %v11280_v43, %v11279_v38 }
 0x206   :  { %v1821_v12 = vmax.f32 %v1785_v44, %v1809_v56  ;;  %v1798_v22 = vadd.f32 %v10449_v61, %v1757_v17  ;;  %v1758_v57 = vadd.f32 %v10730_v15, %v1581_v21  ;;  %2197 = vmatprep.mubr.bf16.mxu1 %v11253_v54  ;;  %v1582_v35 = vadd.f32 %v1544_v32, %v1465_v49  ;;  %v11286_v42 = vld [vmem:[#allocation60_spill] sm:$0xff] }
 0x207   :  { %v1548_v39 = vpop.f32.mrf.mxu0  ;;  %v1888_v30 = vsel %vm1885_vm2, %v1886_v34, %v1887_v27  ;;  %v1786_v5 = vmax.f32 %v1774_v50, 0.0  ;;  %v1351_v60 = vadd.f32 %v11276_v11, %v11275_v26  ;;  %v11278_v50 = vld [vmem:[#allocation33_spill] sm:$0xff]  ;;  %v1156_v9 = vmax.f32 %v10762_v4, 0.0 }
 0x208   :  { %v1833_v59 = vmax.f32 %v11272_v6, %v1821_v12  ;;  %v1810_v1 = vmax.f32 %v1798_v22, 0.0  ;;  %v1583_v15 = vadd.f32 %v1548_v39, %v1466_v41  ;;  %2015 = vmatmul.mubr.bf16.vlgmr.msra.gmra.mxu0 %v1888_v30  ;;  %v1775_v33 = vadd.f32 %v10449_v61, %v1758_v57  ;;  %v11277_v41 = vld [vmem:[#allocation54_spill] sm:$0xff]  ;;  %v8695_v38 = vld [vmem:[#allocation6 + $0x124] ss:$8 sps:$4 sm:$0xff]  }
 0x209   :  { %v1759_v24 = vadd.f32 %v10737_v40, %v1582_v35  ;;  %2326 = vmatpush1.bf16.msra.mxu0 %v8678_v7  ;;  %v1550_v47 = vpop.f32.mrf.mxu0  ;;  %2024 = vmatprep.mubr.bf16.mxu0 %v11253_v54  ;;  %v1470_v56 = vadd.f32 %v11277_v41, %v1349_v14  ;;  %v11281_v57 = vld [vmem:[#allocation34_spill] sm:$0xff]  ;;  %v1737_v35 = vpop.f32.mrf.mxu1  ;;  %v1132_v6 = vmax.f32 %v10724_v28, 0.0 }
 0x20a   :  { %v1822_v63 = vmax.f32 %v1786_v5, %v1810_v1  ;;  %v1760_v49 = vadd.f32 %v10748_v62, %v1583_v15  ;;  %v1584_v25 = vadd.f32 %v1550_v47, %v1467_v51  ;;  %2327 = vmatprep.subr.bf16.mxu0 %v8683_v29  ;;  %v10811_v0 = vpack.c.bf16 %v1833_v59, %v1832_v37  ;;  %v11282_v29 = vld [vmem:[#allocation66_spill] sm:$0xff]  ;;  %v11283_v59 = vld [vmem:[#allocation37_spill] sm:$0xff]  ;;  %v11284_v15 = vld [vmem:[#allocation56_spill] sm:$0xff] }
 0x20b   :  { %v1799_v40 = vadd.f32 %v10449_v61, %v1759_v24  ;;  %v1552_v44 = vpop.f32.mrf.mxu0  ;;  %v1787_v32 = vmax.f32 %v1775_v33, 0.0  ;;  %v1355_v19 = vadd.f32 %v11282_v29, %v11281_v57  ;;  %v1103_v5 = vadd.f32 %v11283_v59, %v10706_v13  ;;  %v8692_v28 = vld [vmem:[#allocation6 + $0x134] ss:$8 sps:$4 sm:$0xff]  }
 0x20c   :  { %v1834_v17 = vmax.f32 %v11278_v50, %v1822_v63  ;;  %v1776_v62 = vadd.f32 %v10449_v61, %v1760_v49  ;;  %v1761_v21 = vadd.f32 %v10768_v55, %v1584_v25  ;;  %v1585_v23 = vadd.f32 %v1552_v44, %v1468_v45  ;;  %v8689_v55 = vld [vmem:[#allocation6 + $0x144] ss:$8 sps:$4 sm:$0xff]   ;;  %v11285_v45 = vld [vmem:[#allocation58_spill] sm:$0xff]  ;;  %v1739_v49 = vpop.f32.mrf.mxu1 }
 0x20d   :  { %v1811_v34 = vmax.f32 %v1799_v40, 0.0  ;;  %2198 = vmatmul.mubr.bf16.gmra.mxu1 %v10811_v0  ;;  %v1554_v7 = vpop.f32.mrf.mxu0  ;;  %2328 = vmatpush1.bf16.msra.mxu0 %v8681_v48  ;;  %v1889_v37 = vrot.slane %v10811_v0, 4  ;;  %v1471_v33 = vadd.f32 %v11284_v15, %v1351_v60  ;;  %v1472_v48 = vadd.f32 %v11285_v45, %v1353_v16  ;;  %v8710_v45 = vld [vmem:[#allocation9 + $0x2c4] ss:$16 sps:$4 sm:$0xff]  }
 0x20e   :  { %v1800_v58 = vadd.f32 %v10449_v61, %v1761_v21  ;;  %v1762_v12 = vadd.f32 %v1729_v3, %v1585_v23  ;;  %v1586_v22 = vadd.f32 %v1554_v7, %v1469_v20  ;;  %2329 = vmatprep.subr.bf16.mxu0 %v8686_v52  ;;  %2207 = vmatprep.mubr.bf16.mxu1 %v11253_v54  ;;  %v1788_v14 = vmax.f32 %v1776_v62, 0.0  ;;  %v11287_v52 = vld [vmem:[#allocation35_spill] sm:$0xff]  ;;  %v1741_v16 = vpop.f32.mrf.mxu1 }
 0x20f   :  { %v1823_v46 = vmax.f32 %v1787_v32, %v1811_v34  ;;  %v1558_v39 = vpop.f32.mrf.mxu0  ;;  %v1890_v30 = vsel %vm1885_vm2, %v1887_v27, %v1889_v37  ;;  %v8687_v27 = vld [vmem:[#allocation6 + $0x140] ss:$8 sps:$4 sm:$0xff]   ;;  %v1168_v63 = vmax.f32 %v1132_v6, %v1156_v9  ;;  %v1473_v20 = vadd.f32 %v11286_v42, %v1355_v19 }
 0x210   :  { %v1812_v4 = vmax.f32 %v1800_v58, 0.0  ;;  %v1777_v8 = vadd.f32 %v10449_v61, %v1762_v12  ;;  %v1763_v3 = vadd.f32 %v1731_v10, %v1586_v22  ;;  %v1587_v51 = vadd.f32 %v1558_v39, %v1470_v56  ;;  %2025 = vmatmul.mubr.bf16.gmra.mxu0 %v1890_v30  ;;  %v11288_v34 = vld [vmem:[#allocation36_spill] sm:$0xff] }
 0x211   :  { %v1835_v1 = vmax.f32 %v10703_v36, %v1823_v46  ;;  %v1560_v24 = vpop.f32.mrf.mxu0  ;;  %2330 = vmatpush1.bf16.msra.mxu0 %v8684_v53  ;;  %2034 = vmatprep.mubr.bf16.mxu0 %v11253_v54  ;;  %v1146_v44 = vadd.f32 %v10449_v61, %v1103_v5  ;;  %v1122_v7 = vadd.f32 %v10449_v61, %v11288_v34  ;;  %v8701_v5 = vld [vmem:[#allocation6 + $0x104] ss:$8 sps:$4 sm:$0xff]  }
 0x212   :  { %v1824_v47 = vmax.f32 %v1788_v14, %v1812_v4  ;;  %v1801_v2 = vadd.f32 %v10449_v61, %v1763_v3  ;;  %v1764_v10 = vadd.f32 %v1735_v18, %v1587_v51  ;;  %2331 = vmatprep.subr.bf16.mxu0 %v8689_v55  ;;  %v1588_v13 = vadd.f32 %v1560_v24, %v1471_v33  ;;  %v8693_v55 = vld [vmem:[#allocation6 + $0x120] ss:$8 sps:$4 sm:$0xff]   ;;  %v11289_v4 = vld [vmem:[#allocation38_spill] sm:$0xff] }
 0x213   :  { %v1562_v25 = vpop.f32.mrf.mxu0  ;;  %v10838_v36 = vpack.c.bf16 %v1835_v1, %v1834_v17  ;;  %v1789_v11 = vmax.f32 %v1777_v8, 0.0  ;;  %v8690_v17 = vld [vmem:[#allocation6 + $0x130] ss:$8 sps:$4 sm:$0xff]   ;;  %v1158_v57 = vmax.f32 %v1146_v44, 0.0  ;;  %v1134_v14 = vmax.f32 %v1122_v7, 0.0 }
 0x214   :  { %v1836_v26 = vmax.f32 %v11287_v52, %v1824_v47  ;;  %v1813_v60 = vmax.f32 %v1801_v2, 0.0  ;;  %v1589_v40 = vadd.f32 %v1562_v25, %v1472_v48  ;;  %v1778_v18 = vadd.f32 %v10449_v61, %v1764_v10  ;;  %v8696_v3 = vld [vmem:[#allocation6 + $0x110] ss:$8 sps:$4 sm:$0xff]   ;;  %v8699_v1 = vld [vmem:[#allocation6 + $0x100] ss:$8 sps:$4 sm:$0xff]  }
 0x215   :  { %v1765_v41 = vadd.f32 %v1737_v35, %v1588_v13  ;;  %2208 = vmatmul.mubr.bf16.gmra.mxu1 %v10838_v36  ;;  %v1564_v56 = vpop.f32.mrf.mxu0  ;;  %v1891_v50 = vrot.slane %v10838_v36, 4  ;;  %2332 = vmatpush1.bf16.msra.mxu0 %v8687_v27  ;;  %v1170_v51 = vmax.f32 %v1134_v14, %v1158_v57  ;;  %v8704_v27 = vld [vmem:[#allocation9 + $0x2e4] ss:$16 sps:$4 sm:$0xff]   ;;  %v8707_v47 = vld [vmem:[#allocation9 + $0x2ec] ss:$16 sps:$4 sm:$0xff]  }
 0x216   :  { %v1825_v62 = vmax.f32 %v1789_v11, %v1813_v60  ;;  %v1766_v21 = vadd.f32 %v1739_v49, %v1589_v40  ;;  %v1590_v23 = vadd.f32 %v1564_v56, %v1473_v20  ;;  %2217 = vmatprep.mubr.bf16.mxu1 %v11253_v54  ;;  %2333 = vmatprep.subr.bf16.mxu0 %v8692_v28  ;;  %v1790_v12 = vmax.f32 %v1778_v18, 0.0  ;;  %v8702_v2 = vld [vmem:[#allocation9 + $0x2e0] ss:$16 sps:$4 sm:$0xff]   ;;  %v8705_v10 = vld [vmem:[#allocation9 + $0x2e8] ss:$16 sps:$4 sm:$0xff]  }
 0x217   :  { %v1802_v43 = vadd.f32 %v10449_v61, %v1765_v41  ;;  %v1892_v32 = vsel %vm1885_vm2, %v1889_v37, %v1891_v50  ;;  %v8698_v37 = vld [vmem:[#allocation6 + $0x114] ss:$8 sps:$4 sm:$0xff]   ;;  %2945 = vmatprep.subr.bf16.mxu1 %v8704_v27 }
 0x218   :  { %v1837_v53 = vmax.f32 %v1168_v63, %v1825_v62  ;;  %v1779_v9 = vadd.f32 %v10449_v61, %v1766_v21  ;;  %v1767_v58 = vadd.f32 %v1741_v16, %v1590_v23  ;;  %2035 = vmatmul.mubr.bf16.gmra.mxu0 %v1892_v32  ;;  %2946 = vmatpush1.bf16.msra.mxu1 %v8702_v2  ;;  %v8708_v48 = vld [vmem:[#allocation9 + $0x2c0] ss:$16 sps:$4 sm:$0xff]   ;;  %v8711_v28 = vld [vmem:[#allocation9 + $0x2c8] ss:$16 sps:$4 sm:$0xff]   ;;  %v8719_v63 = vld [vmem:[#allocation9 + $0x2ac] ss:$16 sps:$4 sm:$0xff]  }
 0x219   :  { %v1814_v22 = vmax.f32 %v1802_v43, 0.0  ;;  %2334 = vmatpush1.bf16.msra.mxu0 %v8690_v17  ;;  %2044 = vmatprep.mubr.bf16.mxu0 %v11253_v54  ;;  %v8714_v49 = vld [vmem:[#allocation9 + $0x2a0] ss:$16 sps:$4 sm:$0xff]   ;;  %v8717_v13 = vld [vmem:[#allocation9 + $0x2a8] ss:$16 sps:$4 sm:$0xff]  }
 0x21a   :  { %v1803_v29 = vadd.f32 %v10449_v61, %v1767_v58  ;;  %v1844_v19 = vpack.c.bf16 %v1837_v53, %v1836_v26  ;;  %2335 = vmatprep.subr.bf16.mxu0 %v8695_v38  ;;  %v1791_v35 = vmax.f32 %v1779_v9, 0.0  ;;  %2947 = vmatprep.subr.bf16.mxu1 %v8710_v45  ;;  %v8722_v25 = vld [vmem:[#allocation9 + $0x284] ss:$16 sps:$4 sm:$0xff]   ;;  %v8720_v42 = vld [vmem:[#allocation9 + $0x280] ss:$16 sps:$4 sm:$0xff]  }
 0x21b   :  { %v1826_v46 = vmax.f32 %v1790_v12, %v1814_v22  ;;  %v8723_v20 = vld [vmem:[#allocation9 + $0x288] ss:$16 sps:$4 sm:$0xff]   ;;  %v8728_v52 = vld [vmem:[#allocation9 + $0x264] ss:$16 sps:$4 sm:$0xff]   ;;  %v8731_v26 = vld [vmem:[#allocation9 + $0x26c] ss:$16 sps:$4 sm:$0xff]  }
 0x21c   :  { %v1815_v39 = vmax.f32 %v1803_v29, 0.0  ;;  %v1893_v30 = vrot.slane %v1844_v19, 4  ;;  %2948 = vmatpush1.bf16.msra.mxu1 %v8708_v48  ;;  %v8726_v11 = vld [vmem:[#allocation9 + $0x260] ss:$16 sps:$4 sm:$0xff]   ;;  %v8729_v60 = vld [vmem:[#allocation9 + $0x268] ss:$16 sps:$4 sm:$0xff]  }
 0x21d   :  { %v1838_v8 = vmax.f32 %v11289_v4, %v1826_v46  ;;  %2218 = vmatmul.mubr.bf16.gmra.mxu1 %v1844_v19  ;;  %2336 = vmatpush1.bf16.msra.mxu0 %v8693_v55  ;;  %v8737_v40 = vld [vmem:[#allocation9 + $0x24c] ss:$16 sps:$4 sm:$0xff]   ;;  %v8732_v44 = vld [vmem:[#allocation9 + $0x240] ss:$16 sps:$4 sm:$0xff]   ;;  %v8735_v18 = vld [vmem:[#allocation9 + $0x248] ss:$16 sps:$4 sm:$0xff]  }
 0x21e   :  { %v1827_v6 = vmax.f32 %v1791_v35, %v1815_v39  ;;  %v1894_v59 = vsel %vm1885_vm2, %v1891_v50, %v1893_v30  ;;  %2337 = vmatprep.subr.bf16.mxu0 %v8698_v37  ;;  %v8740_v41 = vld [vmem:[#allocation9 + $0x224] ss:$16 sps:$4 sm:$0xff]   ;;  %v8743_v56 = vld [vmem:[#allocation9 + $0x22c] ss:$16 sps:$4 sm:$0xff]   ;;  %v8738_v50 = vld [vmem:[#allocation9 + $0x220] ss:$16 sps:$4 sm:$0xff]  }
 0x21f   :  { %v8741_v17 = vld [vmem:[#allocation9 + $0x228] ss:$16 sps:$4 sm:$0xff]   ;;  %v8746_v62 = vld [vmem:[#allocation9 + $0x204] ss:$16 sps:$4 sm:$0xff]   ;;  %v8749_v21 = vld [vmem:[#allocation9 + $0x20c] ss:$16 sps:$4 sm:$0xff]  }
 0x220   :  { %v1839_v61 = vmax.f32 %v1170_v51, %v1827_v6  ;;  %2045 = vmatmul.mubr.bf16.gmra.mxu0 %v1894_v59  ;;  %v8744_v23 = vld [vmem:[#allocation9 + $0x200] ss:$16 sps:$4 sm:$0xff]   ;;  %v8747_v38 = vld [vmem:[#allocation9 + $0x208] ss:$16 sps:$4 sm:$0xff]   ;;  %v8752_v43 = vld [vmem:[#allocation9 + $0x3e4] ss:$16 sps:$4 sm:$0xff]  }
 0x221   :  { %2054 = vmatprep.mubr.bf16.mxu0 %v11253_v54  ;;  %2338 = vmatpush1.bf16.msra.mxu0 %v8696_v3  ;;  %v8755_v16 = vld [vmem:[#allocation9 + $0x3ec] ss:$16 sps:$4 sm:$0xff]   ;;  %v8750_v32 = vld [vmem:[#allocation9 + $0x3e0] ss:$16 sps:$4 sm:$0xff]   ;;  %v8753_v34 = vld [vmem:[#allocation9 + $0x3e8] ss:$16 sps:$4 sm:$0xff]  }
 0x222   :  { %v1845_v15 = vpack.c.bf16 %v1839_v61, %v1838_v8  ;;  %2339 = vmatprep.subr.bf16.mxu0 %v8701_v5  ;;  %v8758_v7 = vld [vmem:[#allocation9 + $0x3c4] ss:$16 sps:$4 sm:$0xff]   ;;  %v8761_v53 = vld [vmem:[#allocation9 + $0x3cc] ss:$16 sps:$4 sm:$0xff]   ;;  %v8756_v9 = vld [vmem:[#allocation9 + $0x3c0] ss:$16 sps:$4 sm:$0xff]  }
 0x223   :  { %v8759_v58 = vld [vmem:[#allocation9 + $0x3c8] ss:$16 sps:$4 sm:$0xff]   ;;  %v8764_v12 = vld [vmem:[#allocation9 + $0x3a4] ss:$16 sps:$4 sm:$0xff]   ;;  %v8767_v22 = vld [vmem:[#allocation9 + $0x3ac] ss:$16 sps:$4 sm:$0xff]  }
 0x224   :  { %v1895_v33 = vrot.slane %v1845_v15, 4  ;;  %v8762_v55 = vld [vmem:[#allocation9 + $0x3a0] ss:$16 sps:$4 sm:$0xff]   ;;  %v8765_v57 = vld [vmem:[#allocation9 + $0x3a8] ss:$16 sps:$4 sm:$0xff]  }
 0x225   :  { %2340 = vmatpush1.bf16.msra.mxu0 %v8699_v1  ;;  %v8770_v29 = vld [vmem:[#allocation9 + $0x384] ss:$16 sps:$4 sm:$0xff]   ;;  %v8768_v37 = vld [vmem:[#allocation9 + $0x380] ss:$16 sps:$4 sm:$0xff]   ;;  %v8771_v46 = vld [vmem:[#allocation9 + $0x388] ss:$16 sps:$4 sm:$0xff]  }
 0x226   :  { %v1896_v24 = vsel %vm1885_vm2, %v1893_v30, %v1895_v33  ;;  %2986 = vmatprep.subr.bf16.mxu0 %v8707_v47  ;;  %v8776_v14 = vld [vmem:[#allocation9 + $0x364] ss:$16 sps:$4 sm:$0xff]   ;;  %v8779_v35 = vld [vmem:[#allocation9 + $0x36c] ss:$16 sps:$4 sm:$0xff]   ;;  %v8774_v39 = vld [vmem:[#allocation9 + $0x360] ss:$16 sps:$4 sm:$0xff]  }
 0x227   :  { %v8777_v30 = vld [vmem:[#allocation9 + $0x368] ss:$16 sps:$4 sm:$0xff]   ;;  %v8782_v4 = vld [vmem:[#allocation9 + $0x344] ss:$16 sps:$4 sm:$0xff]   ;;  %v8785_v8 = vld [vmem:[#allocation9 + $0x34c] ss:$16 sps:$4 sm:$0xff]  }
 0x228   :  { %2055 = vmatmul.mubr.bf16.gmra.mxu0 %v1896_v24  ;;  %v8780_v3 = vld [vmem:[#allocation9 + $0x340] ss:$16 sps:$4 sm:$0xff]   ;;  %v8783_v51 = vld [vmem:[#allocation9 + $0x348] ss:$16 sps:$4 sm:$0xff]   ;;  %v8788_v6 = vld [vmem:[#allocation9 + $0x324] ss:$16 sps:$4 sm:$0xff]  }
 0x229   :  { %2357 = vmatprep.mubr.bf16.mxu0 %v11253_v54  ;;  %v8791_v59 = vld [vmem:[#allocation9 + $0x32c] ss:$16 sps:$4 sm:$0xff]   ;;  %v8786_v5 = vld [vmem:[#allocation9 + $0x320] ss:$16 sps:$4 sm:$0xff]   ;;  %v8789_v61 = vld [vmem:[#allocation9 + $0x328] ss:$16 sps:$4 sm:$0xff]  }
 0x22a   :  { %v8794_v1 = vld [vmem:[#allocation9 + $0x304] ss:$16 sps:$4 sm:$0xff]   ;;  %v8792_v33 = vld [vmem:[#allocation9 + $0x300] ss:$16 sps:$4 sm:$0xff]   ;;  %v8795_v24 = vld [vmem:[#allocation9 + $0x308] ss:$16 sps:$4 sm:$0xff]  }
 0x22b   :  { %v8800_v27 = vld [vmem:[#allocation9 + $0xe4] ss:$16 sps:$4 sm:$0xff]   ;;  %v8803_v47 = vld [vmem:[#allocation9 + $0xec] ss:$16 sps:$4 sm:$0xff]  }
 0x230   :  { %2358 = vmatmul.mubr.bf16.vlgmr.msra.gmra.mxu0 %v10779_v31  ;;  %v8713_v31 = vld [vmem:[#allocation9 + $0x2cc] ss:$16 sps:$4 sm:$0xff]  }
 0x231   :  { %2367 = vmatprep.mubr.bf16.mxu0 %v11253_v54  ;;  %2987 = vmatpush1.bf16.msra.mxu0 %v8705_v10 }
 0x232   :  { %2988 = vmatprep.subr.bf16.mxu0 %v8713_v31 }
 0x235   :  { %2989 = vmatpush1.bf16.msra.mxu0 %v8711_v28 }
 0x236   :  { %2990 = vmatprep.subr.bf16.mxu0 %v8719_v63 }
 0x238   :  { %2368 = vmatmul.mubr.bf16.gmra.mxu0 %v10811_v0  ;;  %v8716_v0 = vld [vmem:[#allocation9 + $0x2a4] ss:$16 sps:$4 sm:$0xff]  }
 0x239   :  { %2377 = vmatprep.mubr.bf16.mxu0 %v11253_v54  ;;  %2949 = vmatprep.subr.bf16.mxu1 %v8716_v0 }
 0x23a   :  { %2950 = vmatpush1.bf16.msra.mxu1 %v8714_v49  ;;  %2991 = vmatpush1.bf16.msra.mxu0 %v8717_v13 }
 0x23b   :  { %2951 = vmatprep.subr.bf16.mxu1 %v8722_v25 }
 0x23e   :  { %2952 = vmatpush1.bf16.msra.mxu1 %v8720_v42 }
 0x23f   :  { %2953 = vmatprep.subr.bf16.mxu1 %v8728_v52 }
 0x240   :  { %2378 = vmatmul.mubr.bf16.gmra.mxu0 %v10838_v36  ;;  %v8725_v36 = vld [vmem:[#allocation9 + $0x28c] ss:$16 sps:$4 sm:$0xff]  }
 0x241   :  { %2387 = vmatprep.mubr.bf16.mxu0 %v11253_v54  ;;  %2992 = vmatprep.subr.bf16.mxu0 %v8725_v36 }
 0x242   :  { %2993 = vmatpush1.bf16.msra.mxu0 %v8723_v20  ;;  %2954 = vmatpush1.bf16.msra.mxu1 %v8726_v11 }
 0x243   :  { %2994 = vmatprep.subr.bf16.mxu0 %v8731_v26 }
 0x246   :  { %2995 = vmatpush1.bf16.msra.mxu0 %v8729_v60 }
 0x247   :  { %2996 = vmatprep.subr.bf16.mxu0 %v8737_v40 }
 0x248   :  { %2388 = vmatmul.mubr.bf16.gmra.mxu0 %v1844_v19  ;;  %v8773_v19 = vld [vmem:[#allocation9 + $0x38c] ss:$16 sps:$4 sm:$0xff]  }
 0x249   :  { %2397 = vmatprep.mubr.bf16.mxu0 %v11253_v54  ;;  %v8734_v54 = vld [vmem:[#allocation9 + $0x244] ss:$16 sps:$4 sm:$0xff]  }
 0x24a   :  { %2955 = vmatprep.subr.bf16.mxu1 %v8734_v54  ;;  %2997 = vmatpush1.bf16.msra.mxu0 %v8735_v18 }
 0x24b   :  { %2956 = vmatpush1.bf16.msra.mxu1 %v8732_v44  ;;  %2998 = vmatprep.subr.bf16.mxu0 %v8743_v56 }
 0x24c   :  { %2957 = vmatprep.subr.bf16.mxu1 %v8740_v41 }
 0x24e   :  { %2999 = vmatpush1.bf16.msra.mxu0 %v8741_v17 }
 0x24f   :  { %2958 = vmatpush1.bf16.msra.mxu1 %v8738_v50  ;;  %3000 = vmatprep.subr.bf16.mxu0 %v8749_v21 }
 0x250   :  { %2398 = vmatmul.mubr.bf16.gmra.mxu0 %v1845_v15  ;;  %2959 = vmatprep.subr.bf16.mxu1 %v8746_v62  ;;  %v8797_v15 = vld [vmem:[#allocation9 + $0x30c] ss:$16 sps:$4 sm:$0xff]  }
 0x252   :  { %3001 = vmatpush1.bf16.msra.mxu0 %v8747_v38 }
 0x253   :  { %2960 = vmatpush1.bf16.msra.mxu1 %v8744_v23  ;;  %3002 = vmatprep.subr.bf16.mxu0 %v8755_v16 }
 0x254   :  { %2961 = vmatprep.subr.bf16.mxu1 %v8752_v43 }
 0x256   :  { %3003 = vmatpush2.bf16.msra.mxu0 %v8753_v34 }
 0x257   :  { %2962 = vmatpush2.bf16.msra.mxu1 %v8750_v32  ;;  %3004 = vmatprep.subr.bf16.mxu0 %v8761_v53 }
 0x258   :  { %2963 = vmatprep.subr.bf16.mxu1 %v8758_v7 }
 0x25a   :  { %3005 = vmatpush2.bf16.msra.mxu0 %v8759_v58 }
 0x25b   :  { %2964 = vmatpush2.bf16.msra.mxu1 %v8756_v9  ;;  %3006 = vmatprep.subr.bf16.mxu0 %v8767_v22 }
 0x25c   :  { %2965 = vmatprep.subr.bf16.mxu1 %v8764_v12 }
 0x25e   :  { %3007 = vmatpush2.bf16.msra.mxu0 %v8765_v57 }
 0x25f   :  { %2966 = vmatpush2.bf16.msra.mxu1 %v8762_v55  ;;  %3008 = vmatprep.subr.bf16.mxu0 %v8773_v19  ;;  %v2430_v55 = vlaneseq }
 0x260   :  { %2967 = vmatprep.subr.bf16.mxu1 %v8770_v29 }
 0x262   :  { %3009 = vmatpush2.bf16.msra.mxu0 %v8771_v46 }
 0x263   :  { %2968 = vmatpush2.bf16.msra.mxu1 %v8768_v37  ;;  %3010 = vmatprep.subr.bf16.mxu0 %v8779_v35 }
 0x264   :  { %2969 = vmatprep.subr.bf16.mxu1 %v8776_v14  ;;  %v10896_v14 = vshrl.u32 %v2430_v55, 7  ;;  %v8798_v55 = vld [vmem:[#allocation9 + $0xe0] ss:$16 sps:$4 sm:$0xff]  }
 0x266   :  { %3011 = vmatpush2.bf16.msra.mxu0 %v8777_v30 }
 0x267   :  { %2970 = vmatpush2.bf16.msra.mxu1 %v8774_v39  ;;  %3012 = vmatprep.subr.bf16.mxu0 %v8785_v8 }
 0x268   :  { %2971 = vmatprep.subr.bf16.mxu1 %v8782_v4 }
 0x26a   :  { %3013 = vmatpush2.bf16.msra.mxu0 %v8783_v51  ;;  %v2428_v51 = vld [vmem:[#allocation7] sm:$0x3] }
 0x26b   :  { %2972 = vmatpush2.bf16.msra.mxu1 %v8780_v3  ;;  %3014 = vmatprep.subr.bf16.mxu0 %v8791_v59  ;;  %v2432_v3 = vsub.s32 0, %v10896_v14 }
 0x26c   :  { %2973 = vmatprep.subr.bf16.mxu1 %v8788_v6  ;;  %v2436_v6 = vsub.s32 1, %v10896_v14 }
 0x26e   :  { %3015 = vmatpush2.bf16.msra.mxu0 %v8789_v61 }
 0x26f   :  { %2974 = vmatpush2.bf16.msra.mxu1 %v8786_v5  ;;  %3016 = vmatprep.subr.bf16.mxu0 %v8797_v15  ;;  %v10908_v15 = vrot.slane %v2428_v51, %v2432_v3 }
 0x270   :  { %2975 = vmatprep.subr.bf16.mxu1 %v8794_v1 }
 0x272   :  { %3017 = vmatpush2.bf16.msra.mxu0 %v8795_v24 }
 0x273   :  { %2976 = vmatpush2.bf16.msra.mxu1 %v8792_v33  ;;  %3388 = vmatprep.subr.bf16.mxu0 %v8803_v47  ;;  %v10912_v47 = vrot.slane %v2428_v51, %v2436_v6  ;;  %v8809_v51 = vld [vmem:[#allocation9 + $0xcc] ss:$16 sps:$4 sm:$0xff]  }
 0x274   :  { %3347 = vmatprep.subr.bf16.mxu1 %v8800_v27 }
 0x2bc   :  { %v2179_v2 = vpop.f32.mrf.mxu1 }
 0x2be   :  { %v2181_v10 = vpop.f32.mrf.mxu1 }
 0x2c0   :  { %v2183_v45 = vpop.f32.mrf.mxu1 }
 0x2c2   :  { %v2185_v31 = vpop.f32.mrf.mxu1 }
 0x2c5   :  { %v2189_v48 = vpop.f32.mrf.mxu1 }
 0x2c7   :  { %v10866_v28 = vpop.f32.mrf.mxu1 }
 0x2c8   :  { %v2016_v0 = vpop.f32.mrf.mxu0 }
 0x2c9   :  { %v2193_v63 = vpop.f32.mrf.mxu1  ;;  %v2180_v59 = vadd.f32 %v2179_v2, %v2016_v0 }
 0x2ca   :  { %v2018_v49 = vpop.f32.mrf.mxu0 }
 0x2cb   :  { %v10868_v13 = vpop.f32.mrf.mxu1  ;;  %v2182_v61 = vadd.f32 %v2181_v10, %v2018_v49 }
 0x2cc   :  { %v2020_v25 = vpop.f32.mrf.mxu0 }
 0x2cd   :  { %v2199_v36 = vpop.f32.mrf.mxu1  ;;  %v2184_v24 = vadd.f32 %v2183_v45, %v2020_v25 }
 0x2ce   :  { %v2022_v42 = vpop.f32.mrf.mxu0 }
 0x2cf   :  { %v10870_v20 = vpop.f32.mrf.mxu1 }
 0x2d0   :  { %v2026_v52 = vpop.f32.mrf.mxu0 }
 0x2d1   :  { %v2190_v26 = vadd.f32 %v2189_v48, %v2026_v52  ;;  %v2203_v11 = vpop.f32.mrf.mxu1 }
 0x2d2   :  { %v2028_v60 = vpop.f32.mrf.mxu0 }
 0x2d3   :  { %v10872_v54 = vpop.f32.mrf.mxu1 }
 0x2d4   :  { %v2030_v40 = vpop.f32.mrf.mxu0 }
 0x2d5   :  { %v10874_v44 = vadd.f32 %v2193_v63, %v2030_v40  ;;  %v2209_v18 = vpop.f32.mrf.mxu1  ;;  %v2186_v63 = vadd.f32 %v2185_v31, %v2022_v42  ;;  %v2192_v40 = vadd.f32 %v10866_v28, %v2028_v60 }
 0x2d6   :  { %v10876_v41 = vpop.f32.mrf.mxu0 }
 0x2d7   :  { %v2211_v56 = vpop.f32.mrf.mxu1 }
 0x2d8   :  { %v2036_v50 = vpop.f32.mrf.mxu0 }
 0x2d9   :  { %v10878_v17 = vadd.f32 %v2199_v36, %v2036_v50  ;;  %v2213_v21 = vpop.f32.mrf.mxu1 }
 0x2da   :  { %v10880_v62 = vpop.f32.mrf.mxu0 }
 0x2db   :  { %v2215_v16 = vpop.f32.mrf.mxu1 }
 0x2dc   :  { %v2040_v23 = vpop.f32.mrf.mxu0 }
 0x2dd   :  { %v10882_v38 = vadd.f32 %v2203_v11, %v2040_v23  ;;  %v2219_v9 = vpop.f32.mrf.mxu1 }
 0x2de   :  { %v10884_v43 = vpop.f32.mrf.mxu0 }
 0x2df   :  { %v2221_v29 = vpop.f32.mrf.mxu1 }
 0x2e0   :  { %v2046_v32 = vpop.f32.mrf.mxu0 }
 0x2e1   :  { %v10886_v34 = vadd.f32 %v2209_v18, %v2046_v32  ;;  %v2223_v39 = vpop.f32.mrf.mxu1 }
 0x2e2   :  { %v2048_v7 = vpop.f32.mrf.mxu0 }
 0x2e3   :  { %v10888_v53 = vadd.f32 %v2211_v56, %v2048_v7  ;;  %v2196_v7 = vadd.f32 %v10868_v13, %v10876_v41 }
 0x2e4   :  { %v2050_v58 = vpop.f32.mrf.mxu0 }
 0x2e5   :  { %v10890_v12 = vadd.f32 %v2213_v21, %v2050_v58 }
 0x2e6   :  { %v2052_v22 = vpop.f32.mrf.mxu0 }
 0x2e7   :  { %v10892_v57 = vadd.f32 %v2215_v16, %v2052_v22 }
 0x2e8   :  { %v2056_v19 = vpop.f32.mrf.mxu0 }
 0x2e9   :  { %v10894_v37 = vadd.f32 %v2219_v9, %v2056_v19 }
 0x2ea   :  { %v2058_v46 = vpop.f32.mrf.mxu0 }
 0x2eb   :  { %v10898_v35 = vadd.f32 %v2221_v29, %v2058_v46  ;;  %v8801_v29 = vld [vmem:[#allocation9 + $0xe8] ss:$16 sps:$4 sm:$0xff]  }
 0x2ec   :  { %v2060_v30 = vpop.f32.mrf.mxu0 }
 0x2ed   :  { %v10900_v4 = vadd.f32 %v2223_v39, %v2060_v30  ;;  %v2202_v30 = vadd.f32 %v10870_v20, %v10880_v62  ;;  %v8804_v20 = vld [vmem:[#allocation9 + $0xc0] ss:$16 sps:$4 sm:$0xff]   ;;  %v8807_v62 = vld [vmem:[#allocation9 + $0xc8] ss:$16 sps:$4 sm:$0xff]  }
 0x2ee   :  { %v10902_v8 = vpop.f32.mrf.mxu0 }
 0x2f0   :  { %v2359_v5 = vpop.f32.mrf.mxu0 }
 0x2f1   :  { %v2408_v1 = vadd.f32 %v2359_v5, %v2180_v59 }
 0x2f2   :  { %v2361_v33 = vpop.f32.mrf.mxu0 }
 0x2f3   :  { %v2409_v27 = vadd.f32 %v2361_v33, %v2182_v61  ;;  %v2440_v52 = vadd.f32 %v10908_v15, %v2408_v1 }
 0x2f4   :  { %v2363_v48 = vpop.f32.mrf.mxu0 }
 0x2f5   :  { %v2410_v36 = vadd.f32 %v2363_v48, %v2184_v24  ;;  %v2441_v10 = vadd.f32 %v10912_v47, %v2409_v27  ;;  %v2460_v56 = vmax.f32 %v2440_v52, 0.0  ;;  %v8815_v52 = vld [vmem:[#allocation9 + $0xac] ss:$16 sps:$4 sm:$0xff]  }
 0x2f6   :  { %v2365_v2 = vpop.f32.mrf.mxu0 }
 0x2f7   :  { %v2442_v0 = vadd.f32 %v10908_v15, %v2410_v36  ;;  %v2411_v49 = vadd.f32 %v2365_v2, %v2186_v63  ;;  %v2461_v21 = vmax.f32 %v2441_v10, 0.0  ;;  %v8812_v36 = vld [vmem:[#allocation9 + $0xa4] ss:$16 sps:$4 sm:$0xff]  }
 0x2f8   :  { %v2369_v11 = vpop.f32.mrf.mxu0 }
 0x2f9   :  { %v2462_v45 = vmax.f32 %v2442_v0, 0.0  ;;  %v2443_v25 = vadd.f32 %v10912_v47, %v2411_v49  ;;  %v2412_v18 = vadd.f32 %v2369_v11, %v2190_v26 }
 0x2fa   :  { %v2371_v50 = vpop.f32.mrf.mxu0 }
 0x2fb   :  { %v2463_v31 = vmax.f32 %v2443_v25, 0.0  ;;  %v2444_v42 = vadd.f32 %v10908_v15, %v2412_v18  ;;  %v2413_v23 = vadd.f32 %v2371_v50, %v2192_v40  ;;  %v10920_v16 = vpack.c.bf16 %v2462_v45, %v2460_v56  ;;  %v8818_v25 = vld [vmem:[#allocation9 + $0x84] ss:$16 sps:$4 sm:$0xff]   ;;  %v8821_v18 = vld [vmem:[#allocation9 + $0x8c] ss:$16 sps:$4 sm:$0xff]  }
 0x2fc   :  { %v2373_v32 = vpop.f32.mrf.mxu0 }
 0x2fd   :  { %v2481_v9 = vpack.c.bf16 %v2463_v31, %v2461_v21  ;;  %v2445_v28 = vadd.f32 %v10912_v47, %v2413_v23  ;;  %v2414_v60 = vadd.f32 %v2373_v32, %v10874_v44  ;;  %v2621_v19 = vrot.slane %v10920_v16, 4  ;;  %v8806_v44 = vld [vmem:[#allocation9 + $0xc4] ss:$16 sps:$4 sm:$0xff]  }
 0x2fe   :  { %v2375_v58 = vpop.f32.mrf.mxu0  ;;  %v2464_v59 = vmax.f32 %v2444_v42, 0.0 }
 0x2ff   :  { %v2415_v26 = vadd.f32 %v2375_v58, %v2196_v7  ;;  %v2622_v22 = vrot.slane %v2481_v9, 4  ;;  %v2446_v46 = vadd.f32 %v10908_v15, %v2414_v60  ;;  %v2465_v1 = vmax.f32 %v2445_v28, 0.0  ;;  %v8819_v28 = vld [vmem:[#allocation9 + $0x88] ss:$16 sps:$4 sm:$0xff]  }
 0x300   :  { %v2379_v39 = vpop.f32.mrf.mxu0 }
 0x301   :  { %v2447_v13 = vadd.f32 %v10912_v47, %v2415_v26  ;;  %v2416_v41 = vadd.f32 %v2379_v39, %v10878_v17  ;;  %2977 = vmatprep.mubr.bf16.mxu1 %v2622_v22  ;;  %3018 = vmatprep.mubr.bf16.mxu0 %v2622_v22  ;;  %v2466_v5 = vmax.f32 %v2446_v46, 0.0  ;;  %v2206_v17 = vadd.f32 %v10872_v54, %v10884_v43  ;;  %v8810_v54 = vld [vmem:[#allocation9 + $0xa0] ss:$16 sps:$4 sm:$0xff]   ;;  %v8813_v43 = vld [vmem:[#allocation9 + $0xa8] ss:$16 sps:$4 sm:$0xff]  }
 0x302   :  { %v2381_v61 = vpop.f32.mrf.mxu0  ;;  %2978 = vmatmul.mubr.bf16.vlgmr.msra.gmra.mxu1 %v2621_v19  ;;  %3019 = vmatmul.mubr.bf16.vlgmr.msra.gmra.mxu0 %v2621_v19  ;;  %v8824_v26 = vld [vmem:[#allocation9 + $0x64] ss:$16 sps:$4 sm:$0xff]   ;;  %v8827_v22 = vld [vmem:[#allocation9 + $0x6c] ss:$16 sps:$4 sm:$0xff]   ;;  %v8822_v39 = vld [vmem:[#allocation9 + $0x60] ss:$16 sps:$4 sm:$0xff]  }
 0x303   :  { %v2467_v33 = vmax.f32 %v2447_v13, 0.0  ;;  %v2448_v24 = vadd.f32 %v10908_v15, %v2416_v41  ;;  %v2417_v27 = vadd.f32 %v2381_v61, %v2202_v30  ;;  %3348 = vmatpush1.bf16.msra.mxu1 %v8798_v55  ;;  %3389 = vmatpush1.bf16.msra.mxu0 %v8801_v29  ;;  %v10935_v48 = vpack.c.bf16 %v2466_v5, %v2464_v59  ;;  %v8825_v30 = vld [vmem:[#allocation9 + $0x68] ss:$16 sps:$4 sm:$0xff]   ;;  %v8830_v41 = vld [vmem:[#allocation9 + $0x44] ss:$16 sps:$4 sm:$0xff]  }
 0x304   :  { %3379 = vmatprep.mubr.bf16.mxu1 %v2481_v9  ;;  %3420 = vmatprep.mubr.bf16.mxu0 %v2481_v9  ;;  %v2383_v63 = vpop.f32.mrf.mxu0  ;;  %v8816_v9 = vld [vmem:[#allocation9 + $0x80] ss:$16 sps:$4 sm:$0xff]  }
 0x305   :  { %v2449_v2 = vadd.f32 %v10912_v47, %v2417_v27  ;;  %v2418_v10 = vadd.f32 %v2383_v63, %v10882_v38  ;;  %3349 = vmatprep.subr.bf16.mxu1 %v8806_v44  ;;  %3390 = vmatprep.subr.bf16.mxu0 %v8809_v51  ;;  %v10939_v0 = vpack.c.bf16 %v2467_v33, %v2465_v1  ;;  %v2468_v56 = vmax.f32 %v2448_v24, 0.0  ;;  %v8833_v44 = vld [vmem:[#allocation9 + $0x4c] ss:$16 sps:$4 sm:$0xff]   ;;  %v8828_v27 = vld [vmem:[#allocation9 + $0x40] ss:$16 sps:$4 sm:$0xff]  }
 0x306   :  { %v2385_v49 = vpop.f32.mrf.mxu0 }
 0x307   :  { %v2450_v11 = vadd.f32 %v10908_v15, %v2418_v10  ;;  %v2419_v40 = vadd.f32 %v2385_v49, %v2206_v17  ;;  %3350 = vmatpush1.bf16.msra.mxu1 %v8804_v20  ;;  %3391 = vmatpush1.bf16.msra.mxu0 %v8807_v62  ;;  %v2469_v60 = vmax.f32 %v2449_v2, 0.0  ;;  %v8831_v20 = vld [vmem:[#allocation9 + $0x48] ss:$16 sps:$4 sm:$0xff]   ;;  %v2225_v62 = vpop.f32.mrf.mxu1 }
 0x308   :  { %v2389_v45 = vpop.f32.mrf.mxu0  ;;  %3351 = vmatprep.subr.bf16.mxu1 %v8812_v36  ;;  %3392 = vmatprep.subr.bf16.mxu0 %v8815_v52  ;;  %v8836_v36 = vld [vmem:[#allocation9 + $0x24] ss:$16 sps:$4 sm:$0xff]   ;;  %v8839_v52 = vld [vmem:[#allocation9 + $0x2c] ss:$16 sps:$4 sm:$0xff]  }
 0x309   :  { %v2470_v50 = vmax.f32 %v2450_v11, 0.0  ;;  %v2451_v38 = vadd.f32 %v10912_v47, %v2419_v40  ;;  %v2420_v21 = vadd.f32 %v2389_v45, %v10886_v34  ;;  %v8842_v45 = vld [vmem:[#allocation9 + $0x4] ss:$16 sps:$4 sm:$0xff]  }
 0x30a   :  { %v2391_v31 = vpop.f32.mrf.mxu0 }
 0x30b   :  { %v10944_v42 = vpack.c.bf16 %v2470_v50, %v2468_v56  ;;  %v2471_v23 = vmax.f32 %v2451_v38, 0.0  ;;  %v2452_v32 = vadd.f32 %v10908_v15, %v2420_v21  ;;  %v2421_v7 = vadd.f32 %v2391_v31, %v10888_v53  ;;  %3352 = vmatpush1.bf16.msra.mxu1 %v8810_v54  ;;  %3393 = vmatpush1.bf16.msra.mxu0 %v8813_v43  ;;  %v8834_v54 = vld [vmem:[#allocation9 + $0x20] ss:$16 sps:$4 sm:$0xff]   ;;  %v8837_v43 = vld [vmem:[#allocation9 + $0x28] ss:$16 sps:$4 sm:$0xff]  }
 0x30c   :  { %v2393_v58 = vpop.f32.mrf.mxu0  ;;  %3353 = vmatprep.subr.bf16.mxu1 %v8818_v25  ;;  %3394 = vmatprep.subr.bf16.mxu0 %v8821_v18  ;;  %v8845_v25 = vld [vmem:[#allocation9 + $0xc] ss:$16 sps:$4 sm:$0xff]   ;;  %v8843_v21 = vld [vmem:[#allocation9 + $0x8] ss:$16 sps:$4 sm:$0xff]   ;;  %v8848_v31 = vld [vmem:[#allocation9 + $0x1e4] ss:$16 sps:$4 sm:$0xff]  }
 0x30d   :  { %v2453_v34 = vadd.f32 %v10912_v47, %v2421_v7  ;;  %v2422_v55 = vadd.f32 %v2393_v58, %v10890_v12  ;;  %v10950_v19 = vpack.c.bf16 %v2471_v23, %v2469_v60  ;;  %v2472_v51 = vmax.f32 %v2452_v32, 0.0  ;;  %v8851_v23 = vld [vmem:[#allocation9 + $0x1ec] ss:$16 sps:$4 sm:$0xff]   ;;  %v8846_v7 = vld [vmem:[#allocation9 + $0x1e0] ss:$16 sps:$4 sm:$0xff]  }
 0x30e   :  { %v2395_v29 = vpop.f32.mrf.mxu0  ;;  %v8852_v60 = vld [vmem:[#allocation9 + $0x1c0] ss:$16 sps:$4 sm:$0xff]   ;;  %v8855_v58 = vld [vmem:[#allocation9 + $0x1c8] ss:$16 sps:$4 sm:$0xff]  }
 0x30f   :  { %v2454_v46 = vadd.f32 %v10908_v15, %v2422_v55  ;;  %v2423_v53 = vadd.f32 %v2395_v29, %v10892_v57  ;;  %3354 = vmatpush1.bf16.msra.mxu1 %v8816_v9  ;;  %3395 = vmatpush1.bf16.msra.mxu0 %v8819_v28  ;;  %v2473_v17 = vmax.f32 %v2453_v34, 0.0  ;;  %v8849_v9 = vld [vmem:[#allocation9 + $0x1e8] ss:$16 sps:$4 sm:$0xff]   ;;  %v8857_v28 = vld [vmem:[#allocation9 + $0x1cc] ss:$16 sps:$4 sm:$0xff]  }
 0x310   :  { %v2399_v13 = vpop.f32.mrf.mxu0  ;;  %3355 = vmatprep.subr.bf16.mxu1 %v8824_v26  ;;  %3396 = vmatprep.subr.bf16.mxu0 %v8827_v22  ;;  %v8860_v26 = vld [vmem:[#allocation9 + $0x1a4] ss:$16 sps:$4 sm:$0xff]   ;;  %v8863_v22 = vld [vmem:[#allocation9 + $0x1ac] ss:$16 sps:$4 sm:$0xff]   ;;  %v8858_v34 = vld [vmem:[#allocation9 + $0x1a0] ss:$16 sps:$4 sm:$0xff]  }
 0x311   :  { %v2474_v59 = vmax.f32 %v2454_v46, 0.0  ;;  %v2455_v12 = vadd.f32 %v10912_v47, %v2423_v53  ;;  %v2424_v5 = vadd.f32 %v2399_v13, %v10894_v37  ;;  %v2226_v37 = vadd.f32 %v2225_v62, %v10902_v8  ;;  %v8861_v55 = vld [vmem:[#allocation9 + $0x1a8] ss:$16 sps:$4 sm:$0xff]   ;;  %v8866_v29 = vld [vmem:[#allocation9 + $0x184] ss:$16 sps:$4 sm:$0xff]  }
 0x312   :  { %v2401_v61 = vpop.f32.mrf.mxu0  ;;  %v8869_v46 = vld [vmem:[#allocation9 + $0x18c] ss:$16 sps:$4 sm:$0xff]   ;;  %v8864_v53 = vld [vmem:[#allocation9 + $0x180] ss:$16 sps:$4 sm:$0xff]  }
 0x313   :  { %v10956_v1 = vpack.c.bf16 %v2474_v59, %v2472_v51  ;;  %v2475_v33 = vmax.f32 %v2455_v12, 0.0  ;;  %v2456_v57 = vadd.f32 %v10908_v15, %v2424_v5  ;;  %v2425_v24 = vadd.f32 %v2401_v61, %v10898_v35  ;;  %3356 = vmatpush1.bf16.msra.mxu1 %v8822_v39  ;;  %3397 = vmatpush1.bf16.msra.mxu0 %v8825_v30  ;;  %v8867_v39 = vld [vmem:[#allocation9 + $0x188] ss:$16 sps:$4 sm:$0xff]   ;;  %v8872_v30 = vld [vmem:[#allocation9 + $0x164] ss:$16 sps:$4 sm:$0xff]  }
 0x314   :  { %v2403_v63 = vpop.f32.mrf.mxu0  ;;  %3357 = vmatprep.subr.bf16.mxu1 %v8830_v41  ;;  %3398 = vmatprep.subr.bf16.mxu0 %v8833_v44  ;;  %v8875_v13 = vld [vmem:[#allocation9 + $0x16c] ss:$16 sps:$4 sm:$0xff]   ;;  %v8870_v41 = vld [vmem:[#allocation9 + $0x160] ss:$16 sps:$4 sm:$0xff]   ;;  %v8873_v44 = vld [vmem:[#allocation9 + $0x168] ss:$16 sps:$4 sm:$0xff]  }
 0x315   :  { %v2457_v2 = vadd.f32 %v10912_v47, %v2425_v24  ;;  %v2426_v10 = vadd.f32 %v2403_v63, %v10900_v4  ;;  %v10963_v11 = vpack.c.bf16 %v2475_v33, %v2473_v17  ;;  %v2476_v18 = vmax.f32 %v2456_v57, 0.0  ;;  %v8878_v51 = vld [vmem:[#allocation9 + $0x144] ss:$16 sps:$4 sm:$0xff]   ;;  %v8881_v59 = vld [vmem:[#allocation9 + $0x14c] ss:$16 sps:$4 sm:$0xff]  }
 0x316   :  { %v2405_v49 = vpop.f32.mrf.mxu0  ;;  %v8876_v12 = vld [vmem:[#allocation9 + $0x140] ss:$16 sps:$4 sm:$0xff]   ;;  %v8879_v5 = vld [vmem:[#allocation9 + $0x148] ss:$16 sps:$4 sm:$0xff]   ;;  %v8884_v61 = vld [vmem:[#allocation9 + $0x124] ss:$16 sps:$4 sm:$0xff]  }
 0x317   :  { %v2458_v35 = vadd.f32 %v10908_v15, %v2426_v10  ;;  %v2427_v40 = vadd.f32 %v2405_v49, %v2226_v37  ;;  %3358 = vmatpush1.bf16.msra.mxu1 %v8828_v27  ;;  %3399 = vmatpush1.bf16.msra.mxu0 %v8831_v20  ;;  %v2477_v50 = vmax.f32 %v2457_v2, 0.0  ;;  %v8840_v15 = vld [vmem:[#allocation9] ss:$16 sps:$4 sm:$0xff]   ;;  %v8887_v33 = vld [vmem:[#allocation9 + $0x12c] ss:$16 sps:$4 sm:$0xff]  }
 0x318   :  { %3359 = vmatprep.subr.bf16.mxu1 %v8836_v36  ;;  %3400 = vmatprep.subr.bf16.mxu0 %v8839_v52  ;;  %v8882_v57 = vld [vmem:[#allocation9 + $0x120] ss:$16 sps:$4 sm:$0xff]   ;;  %v8885_v24 = vld [vmem:[#allocation9 + $0x128] ss:$16 sps:$4 sm:$0xff]   ;;  %v8890_v27 = vld [vmem:[#allocation9 + $0x104] ss:$16 sps:$4 sm:$0xff]  }
 0x319   :  { %v2478_v8 = vmax.f32 %v2458_v35, 0.0  ;;  %v2459_v56 = vadd.f32 %v10912_v47, %v2427_v40  ;;  %v8854_v47 = vld [vmem:[#allocation9 + $0x1c4] ss:$16 sps:$4 sm:$0xff]   ;;  %v8893_v20 = vld [vmem:[#allocation9 + $0x10c] ss:$16 sps:$4 sm:$0xff]  }
 0x31a   :  { %v8888_v62 = vld [vmem:[#allocation9 + $0x100] ss:$16 sps:$4 sm:$0xff]   ;;  %v8891_v17 = vld [vmem:[#allocation9 + $0x108] ss:$16 sps:$4 sm:$0xff]   ;;  %v8896_v63 = vld [vmem:[#allocation9 + $0x4e4] ss:$16 sps:$4 sm:$0xff]  }
 0x31b   :  { %v10967_v4 = vpack.c.bf16 %v2478_v8, %v2476_v18  ;;  %v2479_v38 = vmax.f32 %v2459_v56, 0.0  ;;  %3360 = vmatpush1.bf16.msra.mxu1 %v8834_v54  ;;  %3401 = vmatpush1.bf16.msra.mxu0 %v8837_v43  ;;  %v8899_v36 = vld [vmem:[#allocation9 + $0x4ec] ss:$16 sps:$4 sm:$0xff]   ;;  %v8894_v52 = vld [vmem:[#allocation9 + $0x4e0] ss:$16 sps:$4 sm:$0xff]  }
 0x31c   :  { %3361 = vmatprep.subr.bf16.mxu1 %v8842_v45  ;;  %3402 = vmatprep.subr.bf16.mxu0 %v8845_v25  ;;  %v8897_v37 = vld [vmem:[#allocation9 + $0x4e8] ss:$16 sps:$4 sm:$0xff]   ;;  %v8902_v2 = vld [vmem:[#allocation9 + $0x4c4] ss:$16 sps:$4 sm:$0xff]   ;;  %v8905_v10 = vld [vmem:[#allocation9 + $0x4cc] ss:$16 sps:$4 sm:$0xff]  }
 0x31d   :  { %v10969_v32 = vpack.c.bf16 %v2479_v38, %v2477_v50  ;;  %v8900_v49 = vld [vmem:[#allocation9 + $0x4c0] ss:$16 sps:$4 sm:$0xff]   ;;  %v8903_v35 = vld [vmem:[#allocation9 + $0x4c8] ss:$16 sps:$4 sm:$0xff]   ;;  %v8908_v40 = vld [vmem:[#allocation9 + $0x4a4] ss:$16 sps:$4 sm:$0xff]  }
 0x31e   :  { %v8911_v54 = vld [vmem:[#allocation9 + $0x4ac] ss:$16 sps:$4 sm:$0xff]   ;;  %v8906_v43 = vld [vmem:[#allocation9 + $0x4a0] ss:$16 sps:$4 sm:$0xff]   ;;  %v8909_v45 = vld [vmem:[#allocation9 + $0x4a8] ss:$16 sps:$4 sm:$0xff]  }
 0x31f   :  { %3362 = vmatpush1.bf16.msra.mxu1 %v8840_v15  ;;  %3403 = vmatpush1.bf16.msra.mxu0 %v8843_v21  ;;  %v8914_v25 = vld [vmem:[#allocation9 + $0x484] ss:$16 sps:$4 sm:$0xff]   ;;  %v8912_v18 = vld [vmem:[#allocation9 + $0x480] ss:$16 sps:$4 sm:$0xff]   ;;  %v8915_v8 = vld [vmem:[#allocation9 + $0x488] ss:$16 sps:$4 sm:$0xff]  }
 0x320   :  { %3363 = vmatprep.subr.bf16.mxu1 %v8848_v31  ;;  %3404 = vmatprep.subr.bf16.mxu0 %v8851_v23  ;;  %v8920_v56 = vld [vmem:[#allocation9 + $0x464] ss:$16 sps:$4 sm:$0xff]   ;;  %v8923_v50 = vld [vmem:[#allocation9 + $0x46c] ss:$16 sps:$4 sm:$0xff]   ;;  %v8918_v38 = vld [vmem:[#allocation9 + $0x460] ss:$16 sps:$4 sm:$0xff]  }
 0x321   :  { %v8921_v15 = vld [vmem:[#allocation9 + $0x468] ss:$16 sps:$4 sm:$0xff]   ;;  %v8926_v21 = vld [vmem:[#allocation9 + $0x444] ss:$16 sps:$4 sm:$0xff]   ;;  %v8929_v31 = vld [vmem:[#allocation9 + $0x44c] ss:$16 sps:$4 sm:$0xff]  }
 0x322   :  { %v8924_v23 = vld [vmem:[#allocation9 + $0x440] ss:$16 sps:$4 sm:$0xff]  }
 0x323   :  { %3364 = vmatpush2.bf16.msra.mxu1 %v8846_v7  ;;  %3405 = vmatpush2.bf16.msra.mxu0 %v8849_v9  ;;  %v8927_v7 = vld [vmem:[#allocation9 + $0x448] ss:$16 sps:$4 sm:$0xff]   ;;  %v8932_v9 = vld [vmem:[#allocation9 + $0x424] ss:$16 sps:$4 sm:$0xff]  }
 0x324   :  { %3365 = vmatprep.subr.bf16.mxu1 %v8854_v47  ;;  %3406 = vmatprep.subr.bf16.mxu0 %v8857_v28  ;;  %v8935_v47 = vld [vmem:[#allocation9 + $0x42c] ss:$16 sps:$4 sm:$0xff]   ;;  %v8930_v28 = vld [vmem:[#allocation9 + $0x420] ss:$16 sps:$4 sm:$0xff]  }
 0x327   :  { %3366 = vmatpush2.bf16.msra.mxu1 %v8852_v60  ;;  %3407 = vmatpush2.bf16.msra.mxu0 %v8855_v58  ;;  %v8933_v60 = vld [vmem:[#allocation9 + $0x428] ss:$16 sps:$4 sm:$0xff]   ;;  %v8938_v58 = vld [vmem:[#allocation9 + $0x404] ss:$16 sps:$4 sm:$0xff]  }
 0x328   :  { %3367 = vmatprep.subr.bf16.mxu1 %v8860_v26  ;;  %3408 = vmatprep.subr.bf16.mxu0 %v8863_v22  ;;  %v8941_v26 = vld [vmem:[#allocation9 + $0x40c] ss:$16 sps:$4 sm:$0xff]   ;;  %v8936_v22 = vld [vmem:[#allocation9 + $0x400] ss:$16 sps:$4 sm:$0xff]  }
 0x32b   :  { %3368 = vmatpush2.bf16.msra.mxu1 %v8858_v34  ;;  %3409 = vmatpush2.bf16.msra.mxu0 %v8861_v55  ;;  %v8939_v34 = vld [vmem:[#allocation9 + $0x408] ss:$16 sps:$4 sm:$0xff]   ;;  %v8944_v55 = vld [vmem:[#allocation9 + $0x5e4] ss:$16 sps:$4 sm:$0xff]  }
 0x32c   :  { %3369 = vmatprep.subr.bf16.mxu1 %v8866_v29  ;;  %3410 = vmatprep.subr.bf16.mxu0 %v8869_v46  ;;  %v8947_v29 = vld [vmem:[#allocation9 + $0x5ec] ss:$16 sps:$4 sm:$0xff]   ;;  %v8942_v46 = vld [vmem:[#allocation9 + $0x5e0] ss:$16 sps:$4 sm:$0xff]  }
 0x32f   :  { %3370 = vmatpush2.bf16.msra.mxu1 %v8864_v53  ;;  %3411 = vmatpush2.bf16.msra.mxu0 %v8867_v39  ;;  %v8945_v53 = vld [vmem:[#allocation9 + $0x5e8] ss:$16 sps:$4 sm:$0xff]   ;;  %v8950_v39 = vld [vmem:[#allocation9 + $0x5c4] ss:$16 sps:$4 sm:$0xff]  }
 0x330   :  { %3371 = vmatprep.subr.bf16.mxu1 %v8872_v30  ;;  %3412 = vmatprep.subr.bf16.mxu0 %v8875_v13  ;;  %v8953_v30 = vld [vmem:[#allocation9 + $0x5cc] ss:$16 sps:$4 sm:$0xff]   ;;  %v8948_v13 = vld [vmem:[#allocation9 + $0x5c0] ss:$16 sps:$4 sm:$0xff]  }
 0x333   :  { %3372 = vmatpush2.bf16.msra.mxu1 %v8870_v41  ;;  %3413 = vmatpush2.bf16.msra.mxu0 %v8873_v44  ;;  %v8951_v41 = vld [vmem:[#allocation9 + $0x5c8] ss:$16 sps:$4 sm:$0xff]   ;;  %v8956_v44 = vld [vmem:[#allocation9 + $0x5a4] ss:$16 sps:$4 sm:$0xff]  }
 0x334   :  { %3373 = vmatprep.subr.bf16.mxu1 %v8878_v51  ;;  %3414 = vmatprep.subr.bf16.mxu0 %v8881_v59  ;;  %v8959_v51 = vld [vmem:[#allocation9 + $0x5ac] ss:$16 sps:$4 sm:$0xff]   ;;  %v8954_v59 = vld [vmem:[#allocation9 + $0x5a0] ss:$16 sps:$4 sm:$0xff]  }
 0x337   :  { %3374 = vmatpush2.bf16.msra.mxu1 %v8876_v12  ;;  %3415 = vmatpush2.bf16.msra.mxu0 %v8879_v5  ;;  %v8957_v12 = vld [vmem:[#allocation9 + $0x5a8] ss:$16 sps:$4 sm:$0xff]   ;;  %v8962_v5 = vld [vmem:[#allocation9 + $0x584] ss:$16 sps:$4 sm:$0xff]  }
 0x338   :  { %3375 = vmatprep.subr.bf16.mxu1 %v8884_v61  ;;  %3416 = vmatprep.subr.bf16.mxu0 %v8887_v33  ;;  %v8965_v61 = vld [vmem:[#allocation9 + $0x58c] ss:$16 sps:$4 sm:$0xff]   ;;  %v8960_v33 = vld [vmem:[#allocation9 + $0x580] ss:$16 sps:$4 sm:$0xff]  }
 0x33b   :  { %3376 = vmatpush2.bf16.msra.mxu1 %v8882_v57  ;;  %3417 = vmatpush2.bf16.msra.mxu0 %v8885_v24  ;;  %v8963_v57 = vld [vmem:[#allocation9 + $0x588] ss:$16 sps:$4 sm:$0xff]   ;;  %v8968_v24 = vld [vmem:[#allocation9 + $0x564] ss:$16 sps:$4 sm:$0xff]  }
 0x33c   :  { %3377 = vmatprep.subr.bf16.mxu1 %v8890_v27  ;;  %3418 = vmatprep.subr.bf16.mxu0 %v8893_v20  ;;  %v8971_v27 = vld [vmem:[#allocation9 + $0x56c] ss:$16 sps:$4 sm:$0xff]   ;;  %v8966_v20 = vld [vmem:[#allocation9 + $0x560] ss:$16 sps:$4 sm:$0xff]  }
 0x33f   :  { %3378 = vmatpush2.bf16.msra.mxu1 %v8888_v62  ;;  %3419 = vmatpush2.bf16.msra.mxu0 %v8891_v17  ;;  %v8969_v62 = vld [vmem:[#allocation9 + $0x568] ss:$16 sps:$4 sm:$0xff]   ;;  %v8974_v17 = vld [vmem:[#allocation9 + $0x544] ss:$16 sps:$4 sm:$0xff]  }
 0x340   :  { %3814 = vmatprep.subr.bf16.mxu1 %v8896_v63  ;;  %3855 = vmatprep.subr.bf16.mxu0 %v8899_v36  ;;  %v8977_v63 = vld [vmem:[#allocation9 + $0x54c] ss:$16 sps:$4 sm:$0xff]   ;;  %v8972_v36 = vld [vmem:[#allocation9 + $0x540] ss:$16 sps:$4 sm:$0xff]  }
 0x342   :  { %3380 = vmatmul.mubr.bf16.vlgmr.msra.gmra.mxu1 %v10920_v16  ;;  %3421 = vmatmul.mubr.bf16.vlgmr.msra.gmra.mxu0 %v10920_v16  ;;  %v8917_v16 = vld [vmem:[#allocation9 + $0x48c] ss:$16 sps:$4 sm:$0xff]  }
 0x343   :  { %3815 = vmatpush1.bf16.msra.mxu1 %v8894_v52  ;;  %3846 = vmatprep.mubr.bf16.mxu1 %v10939_v0  ;;  %v8975_v52 = vld [vmem:[#allocation9 + $0x548] ss:$16 sps:$4 sm:$0xff]  }
 0x344   :  { %3856 = vmatpush1.bf16.msra.mxu0 %v8897_v37  ;;  %3887 = vmatprep.mubr.bf16.mxu0 %v10939_v0  ;;  %v8980_v37 = vld [vmem:[#allocation9 + $0x524] ss:$16 sps:$4 sm:$0xff]  }
 0x345   :  { %3816 = vmatprep.subr.bf16.mxu1 %v8902_v2  ;;  %3857 = vmatprep.subr.bf16.mxu0 %v8905_v10  ;;  %v8983_v2 = vld [vmem:[#allocation9 + $0x52c] ss:$16 sps:$4 sm:$0xff]   ;;  %v8978_v10 = vld [vmem:[#allocation9 + $0x520] ss:$16 sps:$4 sm:$0xff]  }
 0x347   :  { %3817 = vmatpush1.bf16.msra.mxu1 %v8900_v49  ;;  %v8981_v49 = vld [vmem:[#allocation9 + $0x528] ss:$16 sps:$4 sm:$0xff]  }
 0x348   :  { %3858 = vmatpush1.bf16.msra.mxu0 %v8903_v35  ;;  %3818 = vmatprep.subr.bf16.mxu1 %v8908_v40  ;;  %v8986_v35 = vld [vmem:[#allocation9 + $0x504] ss:$16 sps:$4 sm:$0xff]   ;;  %v8989_v40 = vld [vmem:[#allocation9 + $0x50c] ss:$16 sps:$4 sm:$0xff]  }
 0x349   :  { %3859 = vmatprep.subr.bf16.mxu0 %v8911_v54  ;;  %v8984_v54 = vld [vmem:[#allocation9 + $0x500] ss:$16 sps:$4 sm:$0xff]  }
 0x34b   :  { %3819 = vmatpush1.bf16.msra.mxu1 %v8906_v43  ;;  %v8987_v43 = vld [vmem:[#allocation9 + $0x508] ss:$16 sps:$4 sm:$0xff]  }
 0x34c   :  { %3860 = vmatpush1.bf16.msra.mxu0 %v8909_v45  ;;  %3820 = vmatprep.subr.bf16.mxu1 %v8914_v25  ;;  %v8992_v45 = vld [vmem:[#allocation9 + $0x6e4] ss:$16 sps:$4 sm:$0xff]   ;;  %v8995_v25 = vld [vmem:[#allocation9 + $0x6ec] ss:$16 sps:$4 sm:$0xff]  }
 0x34d   :  { %3861 = vmatprep.subr.bf16.mxu0 %v8917_v16  ;;  %v8990_v16 = vld [vmem:[#allocation9 + $0x6e0] ss:$16 sps:$4 sm:$0xff]  }
 0x34f   :  { %3821 = vmatpush1.bf16.msra.mxu1 %v8912_v18  ;;  %v8993_v18 = vld [vmem:[#allocation9 + $0x6e8] ss:$16 sps:$4 sm:$0xff]  }
 0x350   :  { %3862 = vmatpush1.bf16.msra.mxu0 %v8915_v8  ;;  %3822 = vmatprep.subr.bf16.mxu1 %v8920_v56  ;;  %v8998_v8 = vld [vmem:[#allocation9 + $0x6c4] ss:$16 sps:$4 sm:$0xff]   ;;  %v3968_v56 = vrot.slane %v10939_v0, 4  ;;  %v9013_v0 = vld [vmem:[#allocation9 + $0x68c] ss:$16 sps:$4 sm:$0xff]  }
 0x351   :  { %3863 = vmatprep.subr.bf16.mxu0 %v8923_v50  ;;  %v9001_v50 = vld [vmem:[#allocation9 + $0x6cc] ss:$16 sps:$4 sm:$0xff]  }
 0x353   :  { %3823 = vmatpush1.bf16.msra.mxu1 %v8918_v38  ;;  %v8996_v38 = vld [vmem:[#allocation9 + $0x6c0] ss:$16 sps:$4 sm:$0xff]  }
 0x354   :  { %3864 = vmatpush1.bf16.msra.mxu0 %v8921_v15  ;;  %3824 = vmatprep.subr.bf16.mxu1 %v8926_v21  ;;  %v8999_v15 = vld [vmem:[#allocation9 + $0x6c8] ss:$16 sps:$4 sm:$0xff]   ;;  %v9004_v21 = vld [vmem:[#allocation9 + $0x6a4] ss:$16 sps:$4 sm:$0xff]  }
 0x355   :  { %3865 = vmatprep.subr.bf16.mxu0 %v8929_v31  ;;  %v9007_v31 = vld [vmem:[#allocation9 + $0x6ac] ss:$16 sps:$4 sm:$0xff]  }
 0x357   :  { %3825 = vmatpush1.bf16.msra.mxu1 %v8924_v23  ;;  %v9002_v23 = vld [vmem:[#allocation9 + $0x6a0] ss:$16 sps:$4 sm:$0xff]  }
 0x358   :  { %3866 = vmatpush1.bf16.msra.mxu0 %v8927_v7  ;;  %3826 = vmatprep.subr.bf16.mxu1 %v8932_v9  ;;  %v9005_v7 = vld [vmem:[#allocation9 + $0x6a8] ss:$16 sps:$4 sm:$0xff]   ;;  %v9010_v9 = vld [vmem:[#allocation9 + $0x684] ss:$16 sps:$4 sm:$0xff]  }
 0x359   :  { %3867 = vmatprep.subr.bf16.mxu0 %v8935_v47  ;;  %v9008_v47 = vld [vmem:[#allocation9 + $0x680] ss:$16 sps:$4 sm:$0xff]  }
 0x35b   :  { %3827 = vmatpush1.bf16.msra.mxu1 %v8930_v28  ;;  %v9011_v28 = vld [vmem:[#allocation9 + $0x688] ss:$16 sps:$4 sm:$0xff]  }
 0x35c   :  { %3868 = vmatpush1.bf16.msra.mxu0 %v8933_v60  ;;  %3828 = vmatprep.subr.bf16.mxu1 %v8938_v58  ;;  %v9016_v60 = vld [vmem:[#allocation9 + $0x664] ss:$16 sps:$4 sm:$0xff]   ;;  %v9019_v58 = vld [vmem:[#allocation9 + $0x66c] ss:$16 sps:$4 sm:$0xff]  }
 0x35d   :  { %3869 = vmatprep.subr.bf16.mxu0 %v8941_v26  ;;  %v9014_v26 = vld [vmem:[#allocation9 + $0x660] ss:$16 sps:$4 sm:$0xff]  }
 0x35f   :  { %3829 = vmatpush1.bf16.msra.mxu1 %v8936_v22  ;;  %v9017_v22 = vld [vmem:[#allocation9 + $0x668] ss:$16 sps:$4 sm:$0xff]  }
 0x360   :  { %3870 = vmatpush1.bf16.msra.mxu0 %v8939_v34  ;;  %3830 = vmatprep.subr.bf16.mxu1 %v8944_v55  ;;  %v9022_v34 = vld [vmem:[#allocation9 + $0x644] ss:$16 sps:$4 sm:$0xff]   ;;  %v9025_v55 = vld [vmem:[#allocation9 + $0x64c] ss:$16 sps:$4 sm:$0xff]  }
 0x361   :  { %3871 = vmatprep.subr.bf16.mxu0 %v8947_v29  ;;  %v9020_v29 = vld [vmem:[#allocation9 + $0x640] ss:$16 sps:$4 sm:$0xff]  }
 0x363   :  { %3831 = vmatpush2.bf16.msra.mxu1 %v8942_v46  ;;  %v9023_v46 = vld [vmem:[#allocation9 + $0x648] ss:$16 sps:$4 sm:$0xff]  }
 0x364   :  { %3872 = vmatpush2.bf16.msra.mxu0 %v8945_v53  ;;  %3832 = vmatprep.subr.bf16.mxu1 %v8950_v39  ;;  %v9028_v53 = vld [vmem:[#allocation9 + $0x624] ss:$16 sps:$4 sm:$0xff]   ;;  %v9031_v39 = vld [vmem:[#allocation9 + $0x62c] ss:$16 sps:$4 sm:$0xff]  }
 0x365   :  { %3873 = vmatprep.subr.bf16.mxu0 %v8953_v30  ;;  %v9026_v30 = vld [vmem:[#allocation9 + $0x620] ss:$16 sps:$4 sm:$0xff]  }
 0x367   :  { %3833 = vmatpush2.bf16.msra.mxu1 %v8948_v13  ;;  %v9029_v13 = vld [vmem:[#allocation9 + $0x628] ss:$16 sps:$4 sm:$0xff]  }
 0x368   :  { %3874 = vmatpush2.bf16.msra.mxu0 %v8951_v41  ;;  %3834 = vmatprep.subr.bf16.mxu1 %v8956_v44  ;;  %v9034_v41 = vld [vmem:[#allocation9 + $0x604] ss:$16 sps:$4 sm:$0xff]   ;;  %v9037_v44 = vld [vmem:[#allocation9 + $0x60c] ss:$16 sps:$4 sm:$0xff]  }
 0x369   :  { %3875 = vmatprep.subr.bf16.mxu0 %v8959_v51  ;;  %v9032_v51 = vld [vmem:[#allocation9 + $0x600] ss:$16 sps:$4 sm:$0xff]  }
 0x36b   :  { %3835 = vmatpush2.bf16.msra.mxu1 %v8954_v59  ;;  %v9035_v59 = vld [vmem:[#allocation9 + $0x608] ss:$16 sps:$4 sm:$0xff]  }
 0x36c   :  { %3876 = vmatpush2.bf16.msra.mxu0 %v8957_v12  ;;  %3836 = vmatprep.subr.bf16.mxu1 %v8962_v5  ;;  %v9040_v12 = vld [vmem:[#allocation9 + $0x7e4] ss:$16 sps:$4 sm:$0xff]   ;;  %v9043_v5 = vld [vmem:[#allocation9 + $0x7ec] ss:$16 sps:$4 sm:$0xff]  }
 0x36d   :  { %3877 = vmatprep.subr.bf16.mxu0 %v8965_v61  ;;  %v9038_v61 = vld [vmem:[#allocation9 + $0x7e0] ss:$16 sps:$4 sm:$0xff]  }
 0x36f   :  { %3837 = vmatpush2.bf16.msra.mxu1 %v8960_v33  ;;  %v9041_v33 = vld [vmem:[#allocation9 + $0x7e8] ss:$16 sps:$4 sm:$0xff]  }
 0x370   :  { %3878 = vmatpush2.bf16.msra.mxu0 %v8963_v57  ;;  %3838 = vmatprep.subr.bf16.mxu1 %v8968_v24  ;;  %v9046_v57 = vld [vmem:[#allocation9 + $0x7c4] ss:$16 sps:$4 sm:$0xff]   ;;  %v9049_v24 = vld [vmem:[#allocation9 + $0x7cc] ss:$16 sps:$4 sm:$0xff]  }
 0x371   :  { %3879 = vmatprep.subr.bf16.mxu0 %v8971_v27  ;;  %v9044_v27 = vld [vmem:[#allocation9 + $0x7c0] ss:$16 sps:$4 sm:$0xff]  }
 0x373   :  { %3839 = vmatpush2.bf16.msra.mxu1 %v8966_v20  ;;  %v9047_v20 = vld [vmem:[#allocation9 + $0x7c8] ss:$16 sps:$4 sm:$0xff]  }
 0x374   :  { %3880 = vmatpush2.bf16.msra.mxu0 %v8969_v62  ;;  %3840 = vmatprep.subr.bf16.mxu1 %v8974_v17  ;;  %v9052_v62 = vld [vmem:[#allocation9 + $0x7a4] ss:$16 sps:$4 sm:$0xff]   ;;  %v9055_v17 = vld [vmem:[#allocation9 + $0x7ac] ss:$16 sps:$4 sm:$0xff]  }
 0x375   :  { %3881 = vmatprep.subr.bf16.mxu0 %v8977_v63  ;;  %v9050_v63 = vld [vmem:[#allocation9 + $0x7a0] ss:$16 sps:$4 sm:$0xff]  }
 0x377   :  { %3841 = vmatpush2.bf16.msra.mxu1 %v8972_v36  ;;  %v9053_v36 = vld [vmem:[#allocation9 + $0x7a8] ss:$16 sps:$4 sm:$0xff]  }
 0x378   :  { %3882 = vmatpush2.bf16.msra.mxu0 %v8975_v52  ;;  %3842 = vmatprep.subr.bf16.mxu1 %v8980_v37  ;;  %v9058_v52 = vld [vmem:[#allocation9 + $0x784] ss:$16 sps:$4 sm:$0xff]   ;;  %v9061_v37 = vld [vmem:[#allocation9 + $0x78c] ss:$16 sps:$4 sm:$0xff]  }
 0x379   :  { %3883 = vmatprep.subr.bf16.mxu0 %v8983_v2  ;;  %v9056_v2 = vld [vmem:[#allocation9 + $0x780] ss:$16 sps:$4 sm:$0xff]  }
 0x37b   :  { %3843 = vmatpush2.bf16.msra.mxu1 %v8978_v10  ;;  %v9059_v10 = vld [vmem:[#allocation9 + $0x788] ss:$16 sps:$4 sm:$0xff]  }
 0x37c   :  { %3884 = vmatpush2.bf16.msra.mxu0 %v8981_v49  ;;  %3844 = vmatprep.subr.bf16.mxu1 %v8986_v35  ;;  %v9064_v49 = vld [vmem:[#allocation9 + $0x764] ss:$16 sps:$4 sm:$0xff]   ;;  %v9067_v35 = vld [vmem:[#allocation9 + $0x76c] ss:$16 sps:$4 sm:$0xff]  }
 0x37d   :  { %3885 = vmatprep.subr.bf16.mxu0 %v8989_v40  ;;  %v9062_v40 = vld [vmem:[#allocation9 + $0x760] ss:$16 sps:$4 sm:$0xff]  }
 0x37f   :  { %3845 = vmatpush2.bf16.msra.mxu1 %v8984_v54  ;;  %v9065_v54 = vld [vmem:[#allocation9 + $0x768] ss:$16 sps:$4 sm:$0xff]  }
 0x380   :  { %3886 = vmatpush2.bf16.msra.mxu0 %v8987_v43  ;;  %4291 = vmatprep.subr.bf16.mxu1 %v8992_v45  ;;  %v9070_v43 = vld [vmem:[#allocation9 + $0x744] ss:$16 sps:$4 sm:$0xff]   ;;  %v9073_v45 = vld [vmem:[#allocation9 + $0x74c] ss:$16 sps:$4 sm:$0xff]  }
 0x381   :  { %4332 = vmatprep.subr.bf16.mxu0 %v8995_v25  ;;  %v9068_v25 = vld [vmem:[#allocation9 + $0x740] ss:$16 sps:$4 sm:$0xff]  }
 0x382   :  { %3847 = vmatmul.mubr.bf16.vlgmr.msra.gmra.mxu1 %v10935_v48 }
 0x383   :  { %3888 = vmatmul.mubr.bf16.vlgmr.msra.gmra.mxu0 %v10935_v48  ;;  %4292 = vmatpush1.bf16.msra.mxu1 %v8990_v16  ;;  %v9071_v16 = vld [vmem:[#allocation9 + $0x748] ss:$16 sps:$4 sm:$0xff]  }
 0x384   :  { %4323 = vmatprep.mubr.bf16.mxu1 %v3968_v56  ;;  %4333 = vmatpush1.bf16.msra.mxu0 %v8993_v18  ;;  %v9076_v18 = vld [vmem:[#allocation9 + $0x724] ss:$16 sps:$4 sm:$0xff]  }
 0x385   :  { %4364 = vmatprep.mubr.bf16.mxu0 %v3968_v56  ;;  %4293 = vmatprep.subr.bf16.mxu1 %v8998_v8  ;;  %v9079_v8 = vld [vmem:[#allocation9 + $0x72c] ss:$16 sps:$4 sm:$0xff]   ;;  %v9074_v56 = vld [vmem:[#allocation9 + $0x720] ss:$16 sps:$4 sm:$0xff]  }
 0x386   :  { %4334 = vmatprep.subr.bf16.mxu0 %v9001_v50  ;;  %v9077_v50 = vld [vmem:[#allocation9 + $0x728] ss:$16 sps:$4 sm:$0xff]  }
 0x387   :  { %4294 = vmatpush1.bf16.msra.mxu1 %v8996_v38  ;;  %v9082_v38 = vld [vmem:[#allocation9 + $0x704] ss:$16 sps:$4 sm:$0xff]  }
 0x388   :  { %4335 = vmatpush1.bf16.msra.mxu0 %v8999_v15  ;;  %4295 = vmatprep.subr.bf16.mxu1 %v9004_v21  ;;  %v9085_v15 = vld [vmem:[#allocation9 + $0x70c] ss:$16 sps:$4 sm:$0xff]   ;;  %v9080_v21 = vld [vmem:[#allocation9 + $0x700] ss:$16 sps:$4 sm:$0xff]  }
 0x389   :  { %4336 = vmatprep.subr.bf16.mxu0 %v9007_v31  ;;  %v9083_v31 = vld [vmem:[#allocation9 + $0x708] ss:$16 sps:$4 sm:$0xff]  }
 0x38b   :  { %4296 = vmatpush1.bf16.msra.mxu1 %v9002_v23  ;;  %v9088_v23 = vld [vmem:[#allocation9 + $0x8e4] ss:$16 sps:$4 sm:$0xff]  }
 0x38c   :  { %4337 = vmatpush1.bf16.msra.mxu0 %v9005_v7  ;;  %4297 = vmatprep.subr.bf16.mxu1 %v9010_v9  ;;  %v9091_v7 = vld [vmem:[#allocation9 + $0x8ec] ss:$16 sps:$4 sm:$0xff]   ;;  %v9086_v9 = vld [vmem:[#allocation9 + $0x8e0] ss:$16 sps:$4 sm:$0xff]  }
 0x38d   :  { %4338 = vmatprep.subr.bf16.mxu0 %v9013_v0  ;;  %v3967_v0 = vrot.slane %v10935_v48, 4 }
 0x38f   :  { %4298 = vmatpush1.bf16.msra.mxu1 %v9008_v47  ;;  %v9089_v47 = vld [vmem:[#allocation9 + $0x8e8] ss:$16 sps:$4 sm:$0xff]  }
 0x390   :  { %4339 = vmatpush1.bf16.msra.mxu0 %v9011_v28  ;;  %4299 = vmatprep.subr.bf16.mxu1 %v9016_v60  ;;  %v9094_v28 = vld [vmem:[#allocation9 + $0x8c4] ss:$16 sps:$4 sm:$0xff]  }
 0x391   :  { %4340 = vmatprep.subr.bf16.mxu0 %v9019_v58 }
 0x393   :  { %4300 = vmatpush1.bf16.msra.mxu1 %v9014_v26  ;;  %v9097_v26 = vld [vmem:[#allocation9 + $0x8cc] ss:$16 sps:$4 sm:$0xff]  }
 0x394   :  { %4341 = vmatpush1.bf16.msra.mxu0 %v9017_v22  ;;  %4301 = vmatprep.subr.bf16.mxu1 %v9022_v34  ;;  %v9092_v22 = vld [vmem:[#allocation9 + $0x8c0] ss:$16 sps:$4 sm:$0xff]  }
 0x395   :  { %4342 = vmatprep.subr.bf16.mxu0 %v9025_v55  ;;  %v9095_v55 = vld [vmem:[#allocation9 + $0x8c8] ss:$16 sps:$4 sm:$0xff]  }
 0x397   :  { %4302 = vmatpush1.bf16.msra.mxu1 %v9020_v29  ;;  %v9100_v29 = vld [vmem:[#allocation9 + $0x8a4] ss:$16 sps:$4 sm:$0xff]  }
 0x398   :  { %4343 = vmatpush1.bf16.msra.mxu0 %v9023_v46  ;;  %4303 = vmatprep.subr.bf16.mxu1 %v9028_v53  ;;  %v9103_v46 = vld [vmem:[#allocation9 + $0x8ac] ss:$16 sps:$4 sm:$0xff]  }
 0x399   :  { %4344 = vmatprep.subr.bf16.mxu0 %v9031_v39 }
 0x39b   :  { %4304 = vmatpush1.bf16.msra.mxu1 %v9026_v30  ;;  %v9098_v30 = vld [vmem:[#allocation9 + $0x8a0] ss:$16 sps:$4 sm:$0xff]  }
 0x39c   :  { %4345 = vmatpush1.bf16.msra.mxu0 %v9029_v13  ;;  %4305 = vmatprep.subr.bf16.mxu1 %v9034_v41 }
 0x39d   :  { %4346 = vmatprep.subr.bf16.mxu0 %v9037_v44  ;;  %v9101_v44 = vld [vmem:[#allocation9 + $0x8a8] ss:$16 sps:$4 sm:$0xff]  }
 0x39f   :  { %4306 = vmatpush1.bf16.msra.mxu1 %v9032_v51  ;;  %v9106_v51 = vld [vmem:[#allocation9 + $0x884] ss:$16 sps:$4 sm:$0xff]  }
 0x3a0   :  { %4347 = vmatpush1.bf16.msra.mxu0 %v9035_v59  ;;  %4307 = vmatprep.subr.bf16.mxu1 %v9040_v12  ;;  %v9109_v59 = vld [vmem:[#allocation9 + $0x88c] ss:$16 sps:$4 sm:$0xff]   ;;  %v9104_v12 = vld [vmem:[#allocation9 + $0x880] ss:$16 sps:$4 sm:$0xff]  }
 0x3a1   :  { %4348 = vmatprep.subr.bf16.mxu0 %v9043_v5  ;;  %v9107_v5 = vld [vmem:[#allocation9 + $0x888] ss:$16 sps:$4 sm:$0xff]  }
 0x3a3   :  { %4308 = vmatpush2.bf16.msra.mxu1 %v9038_v61  ;;  %v9112_v61 = vld [vmem:[#allocation9 + $0x864] ss:$16 sps:$4 sm:$0xff]  }
 0x3a4   :  { %4349 = vmatpush2.bf16.msra.mxu0 %v9041_v33  ;;  %4309 = vmatprep.subr.bf16.mxu1 %v9046_v57  ;;  %v9115_v33 = vld [vmem:[#allocation9 + $0x86c] ss:$16 sps:$4 sm:$0xff]   ;;  %v9110_v57 = vld [vmem:[#allocation9 + $0x860] ss:$16 sps:$4 sm:$0xff]  }
 0x3a5   :  { %4350 = vmatprep.subr.bf16.mxu0 %v9049_v24  ;;  %v9113_v24 = vld [vmem:[#allocation9 + $0x868] ss:$16 sps:$4 sm:$0xff]  }
 0x3a7   :  { %4310 = vmatpush2.bf16.msra.mxu1 %v9044_v27  ;;  %v9118_v27 = vld [vmem:[#allocation9 + $0x844] ss:$16 sps:$4 sm:$0xff]  }
 0x3a8   :  { %4351 = vmatpush2.bf16.msra.mxu0 %v9047_v20  ;;  %4311 = vmatprep.subr.bf16.mxu1 %v9052_v62  ;;  %v9121_v20 = vld [vmem:[#allocation9 + $0x84c] ss:$16 sps:$4 sm:$0xff]   ;;  %v9116_v62 = vld [vmem:[#allocation9 + $0x840] ss:$16 sps:$4 sm:$0xff]  }
 0x3a9   :  { %4352 = vmatprep.subr.bf16.mxu0 %v9055_v17  ;;  %v9119_v17 = vld [vmem:[#allocation9 + $0x848] ss:$16 sps:$4 sm:$0xff]  }
 0x3ab   :  { %4312 = vmatpush2.bf16.msra.mxu1 %v9050_v63  ;;  %v9124_v63 = vld [vmem:[#allocation9 + $0x824] ss:$16 sps:$4 sm:$0xff]  }
 0x3ac   :  { %4353 = vmatpush2.bf16.msra.mxu0 %v9053_v36  ;;  %4313 = vmatprep.subr.bf16.mxu1 %v9058_v52  ;;  %v9127_v36 = vld [vmem:[#allocation9 + $0x82c] ss:$16 sps:$4 sm:$0xff]   ;;  %v9122_v52 = vld [vmem:[#allocation9 + $0x820] ss:$16 sps:$4 sm:$0xff]  }
 0x3ad   :  { %4354 = vmatprep.subr.bf16.mxu0 %v9061_v37  ;;  %v9125_v37 = vld [vmem:[#allocation9 + $0x828] ss:$16 sps:$4 sm:$0xff]  }
 0x3af   :  { %4314 = vmatpush2.bf16.msra.mxu1 %v9056_v2  ;;  %v9130_v2 = vld [vmem:[#allocation9 + $0x804] ss:$16 sps:$4 sm:$0xff]  }
 0x3b0   :  { %4355 = vmatpush2.bf16.msra.mxu0 %v9059_v10  ;;  %4315 = vmatprep.subr.bf16.mxu1 %v9064_v49  ;;  %v9133_v10 = vld [vmem:[#allocation9 + $0x80c] ss:$16 sps:$4 sm:$0xff]   ;;  %v9128_v49 = vld [vmem:[#allocation9 + $0x800] ss:$16 sps:$4 sm:$0xff]  }
 0x3b1   :  { %4356 = vmatprep.subr.bf16.mxu0 %v9067_v35  ;;  %v9131_v35 = vld [vmem:[#allocation9 + $0x808] ss:$16 sps:$4 sm:$0xff]  }
 0x3b3   :  { %4316 = vmatpush2.bf16.msra.mxu1 %v9062_v40  ;;  %v9136_v40 = vld [vmem:[#allocation9 + $0x9e4] ss:$16 sps:$4 sm:$0xff]  }
 0x3b4   :  { %4357 = vmatpush2.bf16.msra.mxu0 %v9065_v54  ;;  %4317 = vmatprep.subr.bf16.mxu1 %v9070_v43  ;;  %v9139_v54 = vld [vmem:[#allocation9 + $0x9ec] ss:$16 sps:$4 sm:$0xff]   ;;  %v9134_v43 = vld [vmem:[#allocation9 + $0x9e0] ss:$16 sps:$4 sm:$0xff]  }
 0x3b5   :  { %4358 = vmatprep.subr.bf16.mxu0 %v9073_v45  ;;  %v9137_v45 = vld [vmem:[#allocation9 + $0x9e8] ss:$16 sps:$4 sm:$0xff]  }
 0x3b7   :  { %4318 = vmatpush2.bf16.msra.mxu1 %v9068_v25  ;;  %v9142_v25 = vld [vmem:[#allocation9 + $0x9c4] ss:$16 sps:$4 sm:$0xff]  }
 0x3b8   :  { %4359 = vmatpush2.bf16.msra.mxu0 %v9071_v16  ;;  %4319 = vmatprep.subr.bf16.mxu1 %v9076_v18  ;;  %v9145_v16 = vld [vmem:[#allocation9 + $0x9cc] ss:$16 sps:$4 sm:$0xff]   ;;  %v9140_v18 = vld [vmem:[#allocation9 + $0x9c0] ss:$16 sps:$4 sm:$0xff]  }
 0x3b9   :  { %4360 = vmatprep.subr.bf16.mxu0 %v9079_v8  ;;  %v9143_v8 = vld [vmem:[#allocation9 + $0x9c8] ss:$16 sps:$4 sm:$0xff]  }
 0x3bb   :  { %4320 = vmatpush2.bf16.msra.mxu1 %v9074_v56  ;;  %v9148_v56 = vld [vmem:[#allocation9 + $0x9a4] ss:$16 sps:$4 sm:$0xff]  }
 0x3bc   :  { %4361 = vmatpush2.bf16.msra.mxu0 %v9077_v50  ;;  %4321 = vmatprep.subr.bf16.mxu1 %v9082_v38  ;;  %v9151_v50 = vld [vmem:[#allocation9 + $0x9ac] ss:$16 sps:$4 sm:$0xff]   ;;  %v9146_v38 = vld [vmem:[#allocation9 + $0x9a0] ss:$16 sps:$4 sm:$0xff]  }
 0x3bd   :  { %4362 = vmatprep.subr.bf16.mxu0 %v9085_v15  ;;  %v9149_v15 = vld [vmem:[#allocation9 + $0x9a8] ss:$16 sps:$4 sm:$0xff]  }
 0x3bf   :  { %4322 = vmatpush2.bf16.msra.mxu1 %v9080_v21  ;;  %v9154_v21 = vld [vmem:[#allocation9 + $0x984] ss:$16 sps:$4 sm:$0xff]  }
 0x3c0   :  { %4363 = vmatpush2.bf16.msra.mxu0 %v9083_v31  ;;  %4762 = vmatprep.subr.bf16.mxu1 %v9088_v23  ;;  %v9157_v31 = vld [vmem:[#allocation9 + $0x98c] ss:$16 sps:$4 sm:$0xff]   ;;  %v9152_v23 = vld [vmem:[#allocation9 + $0x980] ss:$16 sps:$4 sm:$0xff]  }
 0x3c1   :  { %4803 = vmatprep.subr.bf16.mxu0 %v9091_v7  ;;  %v9155_v7 = vld [vmem:[#allocation9 + $0x988] ss:$16 sps:$4 sm:$0xff]  }
 0x3c2   :  { %4324 = vmatmul.mubr.bf16.vlgmr.msra.gmra.mxu1 %v3967_v0  ;;  %v10979_v60 = vpop.f32.mrf.mxu1  ;;  %v10981_v58 = vpop.f32.mrf.mxu0 }
 0x3c3   :  { %4365 = vmatmul.mubr.bf16.vlgmr.msra.gmra.mxu0 %v3967_v0  ;;  %4763 = vmatpush1.bf16.msra.mxu1 %v9086_v9  ;;  %v9160_v9 = vld [vmem:[#allocation9 + $0x964] ss:$16 sps:$4 sm:$0xff]   ;;  %v9163_v0 = vld [vmem:[#allocation9 + $0x96c] ss:$16 sps:$4 sm:$0xff]  }
 0x3c4   :  { %4794 = vmatprep.mubr.bf16.mxu1 %v10950_v19  ;;  %4804 = vmatpush1.bf16.msra.mxu0 %v9089_v47  ;;  %v10984_v34 = vpop.f32.mrf.mxu1  ;;  %v10986_v48 = vpop.f32.mrf.mxu0  ;;  %v9158_v47 = vld [vmem:[#allocation9 + $0x960] ss:$16 sps:$4 sm:$0xff]  }
 0x3c5   :  { %4835 = vmatprep.mubr.bf16.mxu0 %v10950_v19  ;;  %4764 = vmatprep.subr.bf16.mxu1 %v9094_v28  ;;  %v9161_v28 = vld [vmem:[#allocation9 + $0x968] ss:$16 sps:$4 sm:$0xff]  }
 0x3c6   :  { %4805 = vmatprep.subr.bf16.mxu0 %v9097_v26  ;;  %v2983_v53 = vpop.f32.mrf.mxu1  ;;  %v3024_v39 = vpop.f32.mrf.mxu0  ;;  %v9166_v26 = vld [vmem:[#allocation9 + $0x944] ss:$16 sps:$4 sm:$0xff]  }
 0x3c7   :  { %4765 = vmatpush1.bf16.msra.mxu1 %v9092_v22  ;;  %v9169_v22 = vld [vmem:[#allocation9 + $0x94c] ss:$16 sps:$4 sm:$0xff]   ;;  %v9170_v39 = vld [vmem:[#allocation9 + $0x920] ss:$16 sps:$4 sm:$0xff]  }
 0x3c8   :  { %4806 = vmatpush1.bf16.msra.mxu0 %v9095_v55  ;;  %v2984_v13 = vpop.f32.mrf.mxu1  ;;  %v3025_v41 = vpop.f32.mrf.mxu0  ;;  %4766 = vmatprep.subr.bf16.mxu1 %v9100_v29  ;;  %v9164_v55 = vld [vmem:[#allocation9 + $0x940] ss:$16 sps:$4 sm:$0xff]   ;;  %v9167_v29 = vld [vmem:[#allocation9 + $0x948] ss:$16 sps:$4 sm:$0xff]   ;;  %v9175_v53 = vld [vmem:[#allocation9 + $0x92c] ss:$16 sps:$4 sm:$0xff]  }
 0x3c9   :  { %4807 = vmatprep.subr.bf16.mxu0 %v9103_v46  ;;  %v9172_v46 = vld [vmem:[#allocation9 + $0x924] ss:$16 sps:$4 sm:$0xff]   ;;  %v9181_v41 = vld [vmem:[#allocation9 + $0x90c] ss:$16 sps:$4 sm:$0xff]  }
 0x3ca   :  { %v9178_v13 = vld [vmem:[#allocation9 + $0x904] ss:$16 sps:$4 sm:$0xff]  }
 0x3cb   :  { %4767 = vmatpush1.bf16.msra.mxu1 %v9098_v30  ;;  %v9173_v30 = vld [vmem:[#allocation9 + $0x928] ss:$16 sps:$4 sm:$0xff]  }
 0x3cc   :  { %4808 = vmatpush1.bf16.msra.mxu0 %v9101_v44  ;;  %4768 = vmatprep.subr.bf16.mxu1 %v9106_v51  ;;  %v9176_v44 = vld [vmem:[#allocation9 + $0x900] ss:$16 sps:$4 sm:$0xff]   ;;  %v9179_v51 = vld [vmem:[#allocation9 + $0x908] ss:$16 sps:$4 sm:$0xff]  }
 0x3cd   :  { %4809 = vmatprep.subr.bf16.mxu0 %v9109_v59  ;;  %v9184_v59 = vld [vmem:[#allocation9 + $0xae4] ss:$16 sps:$4 sm:$0xff]  }
 0x3cf   :  { %4769 = vmatpush1.bf16.msra.mxu1 %v9104_v12  ;;  %v9187_v12 = vld [vmem:[#allocation9 + $0xaec] ss:$16 sps:$4 sm:$0xff]  }
 0x3d0   :  { %4810 = vmatpush1.bf16.msra.mxu0 %v9107_v5  ;;  %4770 = vmatprep.subr.bf16.mxu1 %v9112_v61  ;;  %v9182_v5 = vld [vmem:[#allocation9 + $0xae0] ss:$16 sps:$4 sm:$0xff]   ;;  %v9185_v61 = vld [vmem:[#allocation9 + $0xae8] ss:$16 sps:$4 sm:$0xff]  }
 0x3d1   :  { %4811 = vmatprep.subr.bf16.mxu0 %v9115_v33  ;;  %v9190_v33 = vld [vmem:[#allocation9 + $0xac4] ss:$16 sps:$4 sm:$0xff]  }
 0x3d3   :  { %4771 = vmatpush1.bf16.msra.mxu1 %v9110_v57 }
 0x3d4   :  { %4812 = vmatpush1.bf16.msra.mxu0 %v9113_v24  ;;  %4772 = vmatprep.subr.bf16.mxu1 %v9118_v27  ;;  %v4916_v27 = vrot.slane %v10950_v19, 4 }
 0x3d5   :  { %4813 = vmatprep.subr.bf16.mxu0 %v9121_v20  ;;  %v9193_v20 = vld [vmem:[#allocation9 + $0xacc] ss:$16 sps:$4 sm:$0xff]  }
 0x3d7   :  { %4773 = vmatpush1.bf16.msra.mxu1 %v9116_v62 }
 0x3d8   :  { %4814 = vmatpush1.bf16.msra.mxu0 %v9119_v17  ;;  %4774 = vmatprep.subr.bf16.mxu1 %v9124_v63  ;;  %v9188_v63 = vld [vmem:[#allocation9 + $0xac0] ss:$16 sps:$4 sm:$0xff]  }
 0x3d9   :  { %4815 = vmatprep.subr.bf16.mxu0 %v9127_v36 }
 0x3db   :  { %4775 = vmatpush1.bf16.msra.mxu1 %v9122_v52 }
 0x3dc   :  { %4816 = vmatpush1.bf16.msra.mxu0 %v9125_v37  ;;  %4776 = vmatprep.subr.bf16.mxu1 %v9130_v2  ;;  %v9191_v37 = vld [vmem:[#allocation9 + $0xac8] ss:$16 sps:$4 sm:$0xff]   ;;  %v9196_v2 = vld [vmem:[#allocation9 + $0xaa4] ss:$16 sps:$4 sm:$0xff]  }
 0x3dd   :  { %4817 = vmatprep.subr.bf16.mxu0 %v9133_v10 }
 0x3df   :  { %4777 = vmatpush1.bf16.msra.mxu1 %v9128_v49 }
 0x3e0   :  { %4818 = vmatpush1.bf16.msra.mxu0 %v9131_v35  ;;  %4778 = vmatprep.subr.bf16.mxu1 %v9136_v40  ;;  %v9194_v35 = vld [vmem:[#allocation9 + $0xaa0] ss:$16 sps:$4 sm:$0xff]  }
 0x3e1   :  { %4819 = vmatprep.subr.bf16.mxu0 %v9139_v54 }
 0x3e3   :  { %4779 = vmatpush2.bf16.msra.mxu1 %v9134_v43  ;;  %v9197_v43 = vld [vmem:[#allocation9 + $0xaa8] ss:$16 sps:$4 sm:$0xff]  }
 0x3e4   :  { %4820 = vmatpush2.bf16.msra.mxu0 %v9137_v45  ;;  %4780 = vmatprep.subr.bf16.mxu1 %v9142_v25  ;;  %v9202_v45 = vld [vmem:[#allocation9 + $0xa84] ss:$16 sps:$4 sm:$0xff]   ;;  %v9205_v25 = vld [vmem:[#allocation9 + $0xa8c] ss:$16 sps:$4 sm:$0xff]  }
 0x3e5   :  { %4821 = vmatprep.subr.bf16.mxu0 %v9145_v16  ;;  %v9208_v16 = vld [vmem:[#allocation9 + $0xa64] ss:$16 sps:$4 sm:$0xff]  }
 0x3e7   :  { %4781 = vmatpush2.bf16.msra.mxu1 %v9140_v18  ;;  %v9211_v18 = vld [vmem:[#allocation9 + $0xa6c] ss:$16 sps:$4 sm:$0xff]  }
 0x3e8   :  { %4822 = vmatpush2.bf16.msra.mxu0 %v9143_v8  ;;  %4782 = vmatprep.subr.bf16.mxu1 %v9148_v56  ;;  %v9206_v8 = vld [vmem:[#allocation9 + $0xa60] ss:$16 sps:$4 sm:$0xff]   ;;  %v9209_v56 = vld [vmem:[#allocation9 + $0xa68] ss:$16 sps:$4 sm:$0xff]  }
 0x3e9   :  { %4823 = vmatprep.subr.bf16.mxu0 %v9151_v50  ;;  %v9214_v50 = vld [vmem:[#allocation9 + $0xa44] ss:$16 sps:$4 sm:$0xff]  }
 0x3eb   :  { %4783 = vmatpush2.bf16.msra.mxu1 %v9146_v38  ;;  %v9217_v38 = vld [vmem:[#allocation9 + $0xa4c] ss:$16 sps:$4 sm:$0xff]  }
 0x3ec   :  { %4824 = vmatpush2.bf16.msra.mxu0 %v9149_v15  ;;  %4784 = vmatprep.subr.bf16.mxu1 %v9154_v21  ;;  %v9212_v15 = vld [vmem:[#allocation9 + $0xa40] ss:$16 sps:$4 sm:$0xff]   ;;  %v9215_v21 = vld [vmem:[#allocation9 + $0xa48] ss:$16 sps:$4 sm:$0xff]  }
 0x3ed   :  { %4825 = vmatprep.subr.bf16.mxu0 %v9157_v31  ;;  %v9220_v31 = vld [vmem:[#allocation9 + $0xa24] ss:$16 sps:$4 sm:$0xff]  }
 0x3ef   :  { %4785 = vmatpush2.bf16.msra.mxu1 %v9152_v23  ;;  %v9223_v23 = vld [vmem:[#allocation9 + $0xa2c] ss:$16 sps:$4 sm:$0xff]  }
 0x3f0   :  { %4826 = vmatpush2.bf16.msra.mxu0 %v9155_v7  ;;  %4786 = vmatprep.subr.bf16.mxu1 %v9160_v9  ;;  %v9218_v7 = vld [vmem:[#allocation9 + $0xa20] ss:$16 sps:$4 sm:$0xff]   ;;  %v9221_v9 = vld [vmem:[#allocation9 + $0xa28] ss:$16 sps:$4 sm:$0xff]  }
 0x3f1   :  { %4827 = vmatprep.subr.bf16.mxu0 %v9163_v0  ;;  %v9226_v0 = vld [vmem:[#allocation9 + $0xa04] ss:$16 sps:$4 sm:$0xff]  }
 0x3f3   :  { %4787 = vmatpush2.bf16.msra.mxu1 %v9158_v47  ;;  %v9229_v47 = vld [vmem:[#allocation9 + $0xa0c] ss:$16 sps:$4 sm:$0xff]  }
 0x3f4   :  { %4828 = vmatpush2.bf16.msra.mxu0 %v9161_v28  ;;  %4788 = vmatprep.subr.bf16.mxu1 %v9166_v26  ;;  %v9224_v28 = vld [vmem:[#allocation9 + $0xa00] ss:$16 sps:$4 sm:$0xff]   ;;  %v9227_v26 = vld [vmem:[#allocation9 + $0xa08] ss:$16 sps:$4 sm:$0xff]  }
 0x3f5   :  { %4829 = vmatprep.subr.bf16.mxu0 %v9169_v22  ;;  %v9232_v22 = vld [vmem:[#allocation9 + $0xbe4] ss:$16 sps:$4 sm:$0xff]  }
 0x3f7   :  { %4789 = vmatpush2.bf16.msra.mxu1 %v9164_v55  ;;  %v9235_v55 = vld [vmem:[#allocation9 + $0xbec] ss:$16 sps:$4 sm:$0xff]  }
 0x3f8   :  { %4830 = vmatpush2.bf16.msra.mxu0 %v9167_v29  ;;  %4790 = vmatprep.subr.bf16.mxu1 %v9172_v46  ;;  %v9230_v29 = vld [vmem:[#allocation9 + $0xbe0] ss:$16 sps:$4 sm:$0xff]   ;;  %v9233_v46 = vld [vmem:[#allocation9 + $0xbe8] ss:$16 sps:$4 sm:$0xff]  }
 0x3f9   :  { %4831 = vmatprep.subr.bf16.mxu0 %v9175_v53  ;;  %v9238_v53 = vld [vmem:[#allocation9 + $0xbc4] ss:$16 sps:$4 sm:$0xff]  }
 0x3fb   :  { %4791 = vmatpush2.bf16.msra.mxu1 %v9170_v39  ;;  %v9241_v39 = vld [vmem:[#allocation9 + $0xbcc] ss:$16 sps:$4 sm:$0xff]  }
 0x3fc   :  { %4832 = vmatpush2.bf16.msra.mxu0 %v9173_v30  ;;  %4792 = vmatprep.subr.bf16.mxu1 %v9178_v13  ;;  %v9236_v30 = vld [vmem:[#allocation9 + $0xbc0] ss:$16 sps:$4 sm:$0xff]   ;;  %v9239_v13 = vld [vmem:[#allocation9 + $0xbc8] ss:$16 sps:$4 sm:$0xff]  }
 0x3fd   :  { %4833 = vmatprep.subr.bf16.mxu0 %v9181_v41  ;;  %v9244_v41 = vld [vmem:[#allocation9 + $0xba4] ss:$16 sps:$4 sm:$0xff]  }
 0x3ff   :  { %4793 = vmatpush2.bf16.msra.mxu1 %v9176_v44  ;;  %v9247_v44 = vld [vmem:[#allocation9 + $0xbac] ss:$16 sps:$4 sm:$0xff]  }
 0x400   :  { %4834 = vmatpush2.bf16.msra.mxu0 %v9179_v51  ;;  %5239 = vmatprep.subr.bf16.mxu1 %v9184_v59  ;;  %v9242_v51 = vld [vmem:[#allocation9 + $0xba0] ss:$16 sps:$4 sm:$0xff]   ;;  %v9245_v59 = vld [vmem:[#allocation9 + $0xba8] ss:$16 sps:$4 sm:$0xff]  }
 0x401   :  { %5280 = vmatprep.subr.bf16.mxu0 %v9187_v12  ;;  %v9250_v12 = vld [vmem:[#allocation9 + $0xb84] ss:$16 sps:$4 sm:$0xff]  }
 0x402   :  { %v3381_v57 = vpop.f32.mrf.mxu1  ;;  %v3422_v24 = vpop.f32.mrf.mxu0  ;;  %4795 = vmatmul.mubr.bf16.vlgmr.msra.gmra.mxu1 %v10944_v42 }
 0x403   :  { %v10992_v62 = vadd.f32 %v3381_v57, %v10979_v60  ;;  %v10995_v17 = vadd.f32 %v3422_v24, %v10981_v58  ;;  %4836 = vmatmul.mubr.bf16.vlgmr.msra.gmra.mxu0 %v10944_v42  ;;  %5240 = vmatpush1.bf16.msra.mxu1 %v9182_v5  ;;  %v9199_v58 = vld [vmem:[#allocation9 + $0xaac] ss:$16 sps:$4 sm:$0xff]   ;;  %v9256_v57 = vld [vmem:[#allocation9 + $0xb64] ss:$16 sps:$4 sm:$0xff]  }
 0x404   :  { %5271 = vmatprep.mubr.bf16.mxu1 %v4916_v27  ;;  %5281 = vmatpush1.bf16.msra.mxu0 %v9185_v61  ;;  %v3383_v36 = vpop.f32.mrf.mxu1  ;;  %v3424_v52 = vpop.f32.mrf.mxu0  ;;  %v9253_v5 = vld [vmem:[#allocation9 + $0xb8c] ss:$16 sps:$4 sm:$0xff]   ;;  %v9248_v61 = vld [vmem:[#allocation9 + $0xb80] ss:$16 sps:$4 sm:$0xff]  }
 0x405   :  { %5312 = vmatprep.mubr.bf16.mxu0 %v4916_v27  ;;  %v10999_v19 = vadd.f32 %v3383_v36, %v10984_v34  ;;  %v11002_v60 = vadd.f32 %v3424_v52, %v10986_v48  ;;  %5241 = vmatprep.subr.bf16.mxu1 %v9190_v33  ;;  %v9200_v34 = vld [vmem:[#allocation9 + $0xa80] ss:$16 sps:$4 sm:$0xff]   ;;  %v9203_v48 = vld [vmem:[#allocation9 + $0xa88] ss:$16 sps:$4 sm:$0xff]   ;;  %v9259_v24 = vld [vmem:[#allocation9 + $0xb6c] ss:$16 sps:$4 sm:$0xff]  }
 0x406   :  { %v3385_v10 = vpop.f32.mrf.mxu1  ;;  %v3426_v49 = vpop.f32.mrf.mxu0  ;;  %5282 = vmatprep.subr.bf16.mxu0 %v9193_v20  ;;  %v9251_v33 = vld [vmem:[#allocation9 + $0xb88] ss:$16 sps:$4 sm:$0xff]   ;;  %v9254_v27 = vld [vmem:[#allocation9 + $0xb60] ss:$16 sps:$4 sm:$0xff]   ;;  %v9265_v36 = vld [vmem:[#allocation9 + $0xb4c] ss:$16 sps:$4 sm:$0xff]  }
 0x407   :  { %5242 = vmatpush1.bf16.msra.mxu1 %v9188_v63  ;;  %v9257_v20 = vld [vmem:[#allocation9 + $0xb68] ss:$16 sps:$4 sm:$0xff]   ;;  %v9262_v63 = vld [vmem:[#allocation9 + $0xb44] ss:$16 sps:$4 sm:$0xff]   ;;  %v9260_v52 = vld [vmem:[#allocation9 + $0xb40] ss:$16 sps:$4 sm:$0xff]  }
 0x408   :  { %5283 = vmatpush1.bf16.msra.mxu0 %v9191_v37  ;;  %v3386_v40 = vpop.f32.mrf.mxu1  ;;  %v3427_v54 = vpop.f32.mrf.mxu0  ;;  %5243 = vmatprep.subr.bf16.mxu1 %v9196_v2  ;;  %v9263_v37 = vld [vmem:[#allocation9 + $0xb48] ss:$16 sps:$4 sm:$0xff]   ;;  %v9268_v2 = vld [vmem:[#allocation9 + $0xb24] ss:$16 sps:$4 sm:$0xff]   ;;  %v9266_v10 = vld [vmem:[#allocation9 + $0xb20] ss:$16 sps:$4 sm:$0xff]  }
 0x409   :  { %5284 = vmatprep.subr.bf16.mxu0 %v9199_v58  ;;  %v9271_v58 = vld [vmem:[#allocation9 + $0xb2c] ss:$16 sps:$4 sm:$0xff]   ;;  %v9269_v49 = vld [vmem:[#allocation9 + $0xb28] ss:$16 sps:$4 sm:$0xff]   ;;  %v9272_v54 = vld [vmem:[#allocation9 + $0xb00] ss:$16 sps:$4 sm:$0xff]  }
 0x40a   :  { %v9277_v40 = vld [vmem:[#allocation9 + $0xb0c] ss:$16 sps:$4 sm:$0xff]  }
 0x40b   :  { %5244 = vmatpush1.bf16.msra.mxu1 %v9194_v35  ;;  %v9274_v35 = vld [vmem:[#allocation9 + $0xb04] ss:$16 sps:$4 sm:$0xff]  }
 0x40c   :  { %5285 = vmatpush1.bf16.msra.mxu0 %v9197_v43  ;;  %5245 = vmatprep.subr.bf16.mxu1 %v9202_v45  ;;  %v9275_v43 = vld [vmem:[#allocation9 + $0xb08] ss:$16 sps:$4 sm:$0xff]   ;;  %v9280_v45 = vld [vmem:[#allocation9 + $0xce4] ss:$16 sps:$4 sm:$0xff]  }
 0x40d   :  { %5286 = vmatprep.subr.bf16.mxu0 %v9205_v25  ;;  %v9283_v25 = vld [vmem:[#allocation9 + $0xcec] ss:$16 sps:$4 sm:$0xff]  }
 0x40f   :  { %5246 = vmatpush1.bf16.msra.mxu1 %v9200_v34  ;;  %v9278_v34 = vld [vmem:[#allocation9 + $0xce0] ss:$16 sps:$4 sm:$0xff]  }
 0x410   :  { %5287 = vmatpush1.bf16.msra.mxu0 %v9203_v48  ;;  %5247 = vmatprep.subr.bf16.mxu1 %v9208_v16  ;;  %v4915_v48 = vrot.slane %v10944_v42, 4  ;;  %v9281_v16 = vld [vmem:[#allocation9 + $0xce8] ss:$16 sps:$4 sm:$0xff]  }
 0x411   :  { %5288 = vmatprep.subr.bf16.mxu0 %v9211_v18  ;;  %v9286_v18 = vld [vmem:[#allocation9 + $0xcc4] ss:$16 sps:$4 sm:$0xff]  }
 0x413   :  { %5248 = vmatpush1.bf16.msra.mxu1 %v9206_v8 }
 0x414   :  { %5289 = vmatpush1.bf16.msra.mxu0 %v9209_v56  ;;  %5249 = vmatprep.subr.bf16.mxu1 %v9214_v50  ;;  %v9289_v56 = vld [vmem:[#allocation9 + $0xccc] ss:$16 sps:$4 sm:$0xff]  }
 0x415   :  { %5290 = vmatprep.subr.bf16.mxu0 %v9217_v38 }
 0x417   :  { %5250 = vmatpush1.bf16.msra.mxu1 %v9212_v15  ;;  %v9284_v15 = vld [vmem:[#allocation9 + $0xcc0] ss:$16 sps:$4 sm:$0xff]  }
 0x418   :  { %5291 = vmatpush1.bf16.msra.mxu0 %v9215_v21  ;;  %5251 = vmatprep.subr.bf16.mxu1 %v9220_v31  ;;  %v9287_v31 = vld [vmem:[#allocation9 + $0xcc8] ss:$16 sps:$4 sm:$0xff]  }
 0x419   :  { %5292 = vmatprep.subr.bf16.mxu0 %v9223_v23  ;;  %v9292_v23 = vld [vmem:[#allocation9 + $0xca4] ss:$16 sps:$4 sm:$0xff]  }
 0x41b   :  { %5252 = vmatpush1.bf16.msra.mxu1 %v9218_v7 }
 0x41c   :  { %5293 = vmatpush1.bf16.msra.mxu0 %v9221_v9  ;;  %5253 = vmatprep.subr.bf16.mxu1 %v9226_v0  ;;  %v9295_v9 = vld [vmem:[#allocation9 + $0xcac] ss:$16 sps:$4 sm:$0xff]  }
 0x41d   :  { %5294 = vmatprep.subr.bf16.mxu0 %v9229_v47 }
 0x41f   :  { %5254 = vmatpush1.bf16.msra.mxu1 %v9224_v28  ;;  %v9290_v28 = vld [vmem:[#allocation9 + $0xca0] ss:$16 sps:$4 sm:$0xff]  }
 0x420   :  { %5295 = vmatpush1.bf16.msra.mxu0 %v9227_v26  ;;  %5255 = vmatprep.subr.bf16.mxu1 %v9232_v22  ;;  %v9293_v22 = vld [vmem:[#allocation9 + $0xca8] ss:$16 sps:$4 sm:$0xff]  }
 0x421   :  { %5296 = vmatprep.subr.bf16.mxu0 %v9235_v55  ;;  %v9298_v55 = vld [vmem:[#allocation9 + $0xc84] ss:$16 sps:$4 sm:$0xff]  }
 0x423   :  { %5256 = vmatpush2.bf16.msra.mxu1 %v9230_v29 }
 0x424   :  { %5297 = vmatpush2.bf16.msra.mxu0 %v9233_v46  ;;  %5257 = vmatprep.subr.bf16.mxu1 %v9238_v53  ;;  %v9296_v46 = vld [vmem:[#allocation9 + $0xc80] ss:$16 sps:$4 sm:$0xff]   ;;  %v9299_v53 = vld [vmem:[#allocation9 + $0xc88] ss:$16 sps:$4 sm:$0xff]  }
 0x425   :  { %5298 = vmatprep.subr.bf16.mxu0 %v9241_v39  ;;  %v9307_v39 = vld [vmem:[#allocation9 + $0xc6c] ss:$16 sps:$4 sm:$0xff]  }
 0x427   :  { %5258 = vmatpush2.bf16.msra.mxu1 %v9236_v30  ;;  %v9302_v30 = vld [vmem:[#allocation9 + $0xc60] ss:$16 sps:$4 sm:$0xff]  }
 0x428   :  { %5299 = vmatpush2.bf16.msra.mxu0 %v9239_v13  ;;  %5259 = vmatprep.subr.bf16.mxu1 %v9244_v41  ;;  %v9305_v13 = vld [vmem:[#allocation9 + $0xc68] ss:$16 sps:$4 sm:$0xff]   ;;  %v9310_v41 = vld [vmem:[#allocation9 + $0xc44] ss:$16 sps:$4 sm:$0xff]  }
 0x429   :  { %5300 = vmatprep.subr.bf16.mxu0 %v9247_v44  ;;  %v9313_v44 = vld [vmem:[#allocation9 + $0xc4c] ss:$16 sps:$4 sm:$0xff]  }
 0x42b   :  { %5260 = vmatpush2.bf16.msra.mxu1 %v9242_v51  ;;  %v9308_v51 = vld [vmem:[#allocation9 + $0xc40] ss:$16 sps:$4 sm:$0xff]  }
 0x42c   :  { %5301 = vmatpush2.bf16.msra.mxu0 %v9245_v59  ;;  %5261 = vmatprep.subr.bf16.mxu1 %v9250_v12  ;;  %v9311_v59 = vld [vmem:[#allocation9 + $0xc48] ss:$16 sps:$4 sm:$0xff]   ;;  %v9316_v12 = vld [vmem:[#allocation9 + $0xc24] ss:$16 sps:$4 sm:$0xff]  }
 0x42d   :  { %5302 = vmatprep.subr.bf16.mxu0 %v9253_v5  ;;  %v9319_v5 = vld [vmem:[#allocation9 + $0xc2c] ss:$16 sps:$4 sm:$0xff]  }
 0x42f   :  { %5262 = vmatpush2.bf16.msra.mxu1 %v9248_v61  ;;  %v9314_v61 = vld [vmem:[#allocation9 + $0xc20] ss:$16 sps:$4 sm:$0xff]  }
 0x430   :  { %5303 = vmatpush2.bf16.msra.mxu0 %v9251_v33  ;;  %5263 = vmatprep.subr.bf16.mxu1 %v9256_v57  ;;  %v9317_v33 = vld [vmem:[#allocation9 + $0xc28] ss:$16 sps:$4 sm:$0xff]   ;;  %v9322_v57 = vld [vmem:[#allocation9 + $0xc04] ss:$16 sps:$4 sm:$0xff]  }
 0x431   :  { %5304 = vmatprep.subr.bf16.mxu0 %v9259_v24  ;;  %v9325_v24 = vld [vmem:[#allocation9 + $0xc0c] ss:$16 sps:$4 sm:$0xff]  }
 0x433   :  { %5264 = vmatpush2.bf16.msra.mxu1 %v9254_v27  ;;  %v9320_v27 = vld [vmem:[#allocation9 + $0xc00] ss:$16 sps:$4 sm:$0xff]  }
 0x434   :  { %5305 = vmatpush2.bf16.msra.mxu0 %v9257_v20  ;;  %5265 = vmatprep.subr.bf16.mxu1 %v9262_v63  ;;  %v9323_v20 = vld [vmem:[#allocation9 + $0xc08] ss:$16 sps:$4 sm:$0xff]   ;;  %v9328_v63 = vld [vmem:[#allocation9 + $0xde4] ss:$16 sps:$4 sm:$0xff]  }
 0x435   :  { %5306 = vmatprep.subr.bf16.mxu0 %v9265_v36  ;;  %v9331_v36 = vld [vmem:[#allocation9 + $0xdec] ss:$16 sps:$4 sm:$0xff]  }
 0x437   :  { %5266 = vmatpush2.bf16.msra.mxu1 %v9260_v52  ;;  %v9326_v52 = vld [vmem:[#allocation9 + $0xde0] ss:$16 sps:$4 sm:$0xff]  }
 0x438   :  { %5307 = vmatpush2.bf16.msra.mxu0 %v9263_v37  ;;  %5267 = vmatprep.subr.bf16.mxu1 %v9268_v2  ;;  %v9329_v37 = vld [vmem:[#allocation9 + $0xde8] ss:$16 sps:$4 sm:$0xff]   ;;  %v9334_v2 = vld [vmem:[#allocation9 + $0xdc4] ss:$16 sps:$4 sm:$0xff]  }
 0x439   :  { %5308 = vmatprep.subr.bf16.mxu0 %v9271_v58  ;;  %v9337_v58 = vld [vmem:[#allocation9 + $0xdcc] ss:$16 sps:$4 sm:$0xff]  }
 0x43b   :  { %5268 = vmatpush2.bf16.msra.mxu1 %v9266_v10  ;;  %v9332_v10 = vld [vmem:[#allocation9 + $0xdc0] ss:$16 sps:$4 sm:$0xff]  }
 0x43c   :  { %5309 = vmatpush2.bf16.msra.mxu0 %v9269_v49  ;;  %5269 = vmatprep.subr.bf16.mxu1 %v9274_v35  ;;  %v9335_v49 = vld [vmem:[#allocation9 + $0xdc8] ss:$16 sps:$4 sm:$0xff]   ;;  %v9340_v35 = vld [vmem:[#allocation9 + $0xda4] ss:$16 sps:$4 sm:$0xff]  }
 0x43d   :  { %5310 = vmatprep.subr.bf16.mxu0 %v9277_v40  ;;  %v9343_v40 = vld [vmem:[#allocation9 + $0xdac] ss:$16 sps:$4 sm:$0xff]  }
 0x43f   :  { %5270 = vmatpush2.bf16.msra.mxu1 %v9272_v54  ;;  %v9338_v54 = vld [vmem:[#allocation9 + $0xda0] ss:$16 sps:$4 sm:$0xff]  }
 0x440   :  { %5311 = vmatpush2.bf16.msra.mxu0 %v9275_v43  ;;  %5710 = vmatprep.subr.bf16.mxu1 %v9280_v45  ;;  %v9341_v43 = vld [vmem:[#allocation9 + $0xda8] ss:$16 sps:$4 sm:$0xff]   ;;  %v9346_v45 = vld [vmem:[#allocation9 + $0xd84] ss:$16 sps:$4 sm:$0xff]  }
 0x441   :  { %5751 = vmatprep.subr.bf16.mxu0 %v9283_v25  ;;  %v9349_v25 = vld [vmem:[#allocation9 + $0xd8c] ss:$16 sps:$4 sm:$0xff]  }
 0x442   :  { %v3848_v8 = vpop.f32.mrf.mxu1  ;;  %5272 = vmatmul.mubr.bf16.vlgmr.msra.gmra.mxu1 %v4915_v48 }
 0x443   :  { %v11006_v50 = vadd.f32 %v3848_v8, %v10992_v62  ;;  %v3889_v38 = vpop.f32.mrf.mxu0  ;;  %5313 = vmatmul.mubr.bf16.vlgmr.msra.gmra.mxu0 %v4915_v48  ;;  %5711 = vmatpush1.bf16.msra.mxu1 %v9278_v34  ;;  %v9344_v34 = vld [vmem:[#allocation9 + $0xd80] ss:$16 sps:$4 sm:$0xff]   ;;  %v9347_v48 = vld [vmem:[#allocation9 + $0xd88] ss:$16 sps:$4 sm:$0xff]  }
 0x444   :  { %v11009_v21 = vadd.f32 %v3889_v38, %v10995_v17  ;;  %5742 = vmatprep.mubr.bf16.mxu1 %v10963_v11  ;;  %5752 = vmatpush1.bf16.msra.mxu0 %v9281_v16  ;;  %v3850_v42 = vpop.f32.mrf.mxu1  ;;  %v9352_v16 = vld [vmem:[#allocation9 + $0xd64] ss:$16 sps:$4 sm:$0xff]   ;;  %v9350_v8 = vld [vmem:[#allocation9 + $0xd60] ss:$16 sps:$4 sm:$0xff]  }
 0x445   :  { %5783 = vmatprep.mubr.bf16.mxu0 %v10963_v11  ;;  %v11014_v7 = vadd.f32 %v3850_v42, %v10999_v19  ;;  %v3891_v62 = vpop.f32.mrf.mxu0  ;;  %5712 = vmatprep.subr.bf16.mxu1 %v9286_v18  ;;  %v9301_v19 = vld [vmem:[#allocation9 + $0xc8c] ss:$16 sps:$4 sm:$0xff]   ;;  %v9358_v38 = vld [vmem:[#allocation9 + $0xd44] ss:$16 sps:$4 sm:$0xff]   ;;  %v9356_v42 = vld [vmem:[#allocation9 + $0xd40] ss:$16 sps:$4 sm:$0xff]  }
 0x446   :  { %v11017_v0 = vadd.f32 %v3891_v62, %v11002_v60  ;;  %v3852_v47 = vpop.f32.mrf.mxu1  ;;  %5753 = vmatprep.subr.bf16.mxu0 %v9289_v56  ;;  %v9304_v60 = vld [vmem:[#allocation9 + $0xc64] ss:$16 sps:$4 sm:$0xff]   ;;  %v9355_v18 = vld [vmem:[#allocation9 + $0xd6c] ss:$16 sps:$4 sm:$0xff]   ;;  %v9353_v56 = vld [vmem:[#allocation9 + $0xd68] ss:$16 sps:$4 sm:$0xff]  }
 0x447   :  { %v3893_v17 = vpop.f32.mrf.mxu0  ;;  %5713 = vmatpush1.bf16.msra.mxu1 %v9284_v15  ;;  %v9361_v15 = vld [vmem:[#allocation9 + $0xd4c] ss:$16 sps:$4 sm:$0xff]   ;;  %v9365_v47 = vld [vmem:[#allocation9 + $0xd28] ss:$16 sps:$4 sm:$0xff]  }
 0x448   :  { %5754 = vmatpush1.bf16.msra.mxu0 %v9287_v31  ;;  %v3853_v26 = vpop.f32.mrf.mxu1  ;;  %5714 = vmatprep.subr.bf16.mxu1 %v9292_v23  ;;  %v9359_v31 = vld [vmem:[#allocation9 + $0xd48] ss:$16 sps:$4 sm:$0xff]   ;;  %v9364_v23 = vld [vmem:[#allocation9 + $0xd24] ss:$16 sps:$4 sm:$0xff]   ;;  %v9367_v62 = vld [vmem:[#allocation9 + $0xd2c] ss:$16 sps:$4 sm:$0xff]  }
 0x449   :  { %v3894_v29 = vpop.f32.mrf.mxu0  ;;  %5755 = vmatprep.subr.bf16.mxu0 %v9295_v9  ;;  %v9362_v9 = vld [vmem:[#allocation9 + $0xd20] ss:$16 sps:$4 sm:$0xff]   ;;  %v9370_v17 = vld [vmem:[#allocation9 + $0xd04] ss:$16 sps:$4 sm:$0xff]  }
 0x44a   :  { %v9368_v26 = vld [vmem:[#allocation9 + $0xd00] ss:$16 sps:$4 sm:$0xff]   ;;  %v9379_v29 = vld [vmem:[#allocation9 + $0xeec] ss:$16 sps:$4 sm:$0xff]  }
 0x44b   :  { %5715 = vmatpush1.bf16.msra.mxu1 %v9290_v28  ;;  %v9373_v28 = vld [vmem:[#allocation9 + $0xd0c] ss:$16 sps:$4 sm:$0xff]  }
 0x44c   :  { %5756 = vmatpush1.bf16.msra.mxu0 %v9293_v22  ;;  %5716 = vmatprep.subr.bf16.mxu1 %v9298_v55  ;;  %v9371_v22 = vld [vmem:[#allocation9 + $0xd08] ss:$16 sps:$4 sm:$0xff]   ;;  %v9376_v55 = vld [vmem:[#allocation9 + $0xee4] ss:$16 sps:$4 sm:$0xff]  }
 0x44d   :  { %5757 = vmatprep.subr.bf16.mxu0 %v9301_v19  ;;  %v9374_v19 = vld [vmem:[#allocation9 + $0xee0] ss:$16 sps:$4 sm:$0xff]  }
 0x44f   :  { %5717 = vmatpush1.bf16.msra.mxu1 %v9296_v46  ;;  %v9377_v46 = vld [vmem:[#allocation9 + $0xee8] ss:$16 sps:$4 sm:$0xff]  }
 0x450   :  { %5758 = vmatpush1.bf16.msra.mxu0 %v9299_v53  ;;  %5718 = vmatprep.subr.bf16.mxu1 %v9304_v60  ;;  %v9382_v53 = vld [vmem:[#allocation9 + $0xec4] ss:$16 sps:$4 sm:$0xff]  }
 0x451   :  { %5759 = vmatprep.subr.bf16.mxu0 %v9307_v39  ;;  %v5864_v39 = vrot.slane %v10963_v11, 4 }
 0x453   :  { %5719 = vmatpush1.bf16.msra.mxu1 %v9302_v30  ;;  %v9385_v30 = vld [vmem:[#allocation9 + $0xecc] ss:$16 sps:$4 sm:$0xff]  }
 0x454   :  { %5760 = vmatpush1.bf16.msra.mxu0 %v9305_v13  ;;  %5720 = vmatprep.subr.bf16.mxu1 %v9310_v41 }
 0x455   :  { %5761 = vmatprep.subr.bf16.mxu0 %v9313_v44  ;;  %v9380_v44 = vld [vmem:[#allocation9 + $0xec0] ss:$16 sps:$4 sm:$0xff]  }
 0x457   :  { %5721 = vmatpush1.bf16.msra.mxu1 %v9308_v51 }
 0x458   :  { %5762 = vmatpush1.bf16.msra.mxu0 %v9311_v59  ;;  %5722 = vmatprep.subr.bf16.mxu1 %v9316_v12  ;;  %v9383_v12 = vld [vmem:[#allocation9 + $0xec8] ss:$16 sps:$4 sm:$0xff]  }
 0x459   :  { %5763 = vmatprep.subr.bf16.mxu0 %v9319_v5  ;;  %v9388_v5 = vld [vmem:[#allocation9 + $0xea4] ss:$16 sps:$4 sm:$0xff]  }
 0x45b   :  { %5723 = vmatpush1.bf16.msra.mxu1 %v9314_v61 }
 0x45c   :  { %5764 = vmatpush1.bf16.msra.mxu0 %v9317_v33  ;;  %5724 = vmatprep.subr.bf16.mxu1 %v9322_v57 }
 0x45d   :  { %5765 = vmatprep.subr.bf16.mxu0 %v9325_v24 }
 0x45f   :  { %5725 = vmatpush1.bf16.msra.mxu1 %v9320_v27 }
 0x460   :  { %5766 = vmatpush1.bf16.msra.mxu0 %v9323_v20  ;;  %5726 = vmatprep.subr.bf16.mxu1 %v9328_v63  ;;  %v9389_v20 = vld [vmem:[#allocation9 + $0xea8] ss:$16 sps:$4 sm:$0xff]   ;;  %v9394_v63 = vld [vmem:[#allocation9 + $0xe84] ss:$16 sps:$4 sm:$0xff]  }
 0x461   :  { %5767 = vmatprep.subr.bf16.mxu0 %v9331_v36 }
 0x463   :  { %5727 = vmatpush2.bf16.msra.mxu1 %v9326_v52  ;;  %v9392_v52 = vld [vmem:[#allocation9 + $0xe80] ss:$16 sps:$4 sm:$0xff]  }
 0x464   :  { %5768 = vmatpush2.bf16.msra.mxu0 %v9329_v37  ;;  %5728 = vmatprep.subr.bf16.mxu1 %v9334_v2  ;;  %v9395_v37 = vld [vmem:[#allocation9 + $0xe88] ss:$16 sps:$4 sm:$0xff]   ;;  %v9403_v2 = vld [vmem:[#allocation9 + $0xe6c] ss:$16 sps:$4 sm:$0xff]  }
 0x465   :  { %5769 = vmatprep.subr.bf16.mxu0 %v9337_v58  ;;  %v9398_v58 = vld [vmem:[#allocation9 + $0xe60] ss:$16 sps:$4 sm:$0xff]  }
 0x467   :  { %5729 = vmatpush2.bf16.msra.mxu1 %v9332_v10  ;;  %v9401_v10 = vld [vmem:[#allocation9 + $0xe68] ss:$16 sps:$4 sm:$0xff]  }
 0x468   :  { %5770 = vmatpush2.bf16.msra.mxu0 %v9335_v49  ;;  %5730 = vmatprep.subr.bf16.mxu1 %v9340_v35  ;;  %v9406_v49 = vld [vmem:[#allocation9 + $0xe44] ss:$16 sps:$4 sm:$0xff]   ;;  %v9409_v35 = vld [vmem:[#allocation9 + $0xe4c] ss:$16 sps:$4 sm:$0xff]  }
 0x469   :  { %5771 = vmatprep.subr.bf16.mxu0 %v9343_v40  ;;  %v9404_v40 = vld [vmem:[#allocation9 + $0xe40] ss:$16 sps:$4 sm:$0xff]  }
 0x46b   :  { %5731 = vmatpush2.bf16.msra.mxu1 %v9338_v54  ;;  %v9407_v54 = vld [vmem:[#allocation9 + $0xe48] ss:$16 sps:$4 sm:$0xff]  }
 0x46c   :  { %5772 = vmatpush2.bf16.msra.mxu0 %v9341_v43  ;;  %5732 = vmatprep.subr.bf16.mxu1 %v9346_v45  ;;  %v9412_v43 = vld [vmem:[#allocation9 + $0xe24] ss:$16 sps:$4 sm:$0xff]   ;;  %v9415_v45 = vld [vmem:[#allocation9 + $0xe2c] ss:$16 sps:$4 sm:$0xff]  }
 0x46d   :  { %5773 = vmatprep.subr.bf16.mxu0 %v9349_v25  ;;  %v9410_v25 = vld [vmem:[#allocation9 + $0xe20] ss:$16 sps:$4 sm:$0xff]  }
 0x46f   :  { %5733 = vmatpush2.bf16.msra.mxu1 %v9344_v34  ;;  %v9413_v34 = vld [vmem:[#allocation9 + $0xe28] ss:$16 sps:$4 sm:$0xff]  }
 0x470   :  { %5774 = vmatpush2.bf16.msra.mxu0 %v9347_v48  ;;  %5734 = vmatprep.subr.bf16.mxu1 %v9352_v16  ;;  %v9418_v48 = vld [vmem:[#allocation9 + $0xe04] ss:$16 sps:$4 sm:$0xff]   ;;  %v9421_v16 = vld [vmem:[#allocation9 + $0xe0c] ss:$16 sps:$4 sm:$0xff]  }
 0x471   :  { %5775 = vmatprep.subr.bf16.mxu0 %v9355_v18  ;;  %v9416_v18 = vld [vmem:[#allocation9 + $0xe00] ss:$16 sps:$4 sm:$0xff]  }
 0x473   :  { %5735 = vmatpush2.bf16.msra.mxu1 %v9350_v8  ;;  %v9419_v8 = vld [vmem:[#allocation9 + $0xe08] ss:$16 sps:$4 sm:$0xff]  }
 0x474   :  { %5776 = vmatpush2.bf16.msra.mxu0 %v9353_v56  ;;  %5736 = vmatprep.subr.bf16.mxu1 %v9358_v38  ;;  %v9424_v56 = vld [vmem:[#allocation9 + $0xfe4] ss:$16 sps:$4 sm:$0xff]   ;;  %v9427_v38 = vld [vmem:[#allocation9 + $0xfec] ss:$16 sps:$4 sm:$0xff]  }
 0x475   :  { %5777 = vmatprep.subr.bf16.mxu0 %v9361_v15  ;;  %v9422_v15 = vld [vmem:[#allocation9 + $0xfe0] ss:$16 sps:$4 sm:$0xff]  }
 0x477   :  { %5737 = vmatpush2.bf16.msra.mxu1 %v9356_v42  ;;  %v9425_v42 = vld [vmem:[#allocation9 + $0xfe8] ss:$16 sps:$4 sm:$0xff]  }
 0x478   :  { %5778 = vmatpush2.bf16.msra.mxu0 %v9359_v31  ;;  %5738 = vmatprep.subr.bf16.mxu1 %v9364_v23  ;;  %v9430_v31 = vld [vmem:[#allocation9 + $0xfc4] ss:$16 sps:$4 sm:$0xff]   ;;  %v9433_v23 = vld [vmem:[#allocation9 + $0xfcc] ss:$16 sps:$4 sm:$0xff]  }
 0x479   :  { %5779 = vmatprep.subr.bf16.mxu0 %v9367_v62  ;;  %v9428_v62 = vld [vmem:[#allocation9 + $0xfc0] ss:$16 sps:$4 sm:$0xff]  }
 0x47b   :  { %5739 = vmatpush2.bf16.msra.mxu1 %v9362_v9  ;;  %v9431_v9 = vld [vmem:[#allocation9 + $0xfc8] ss:$16 sps:$4 sm:$0xff]  }
 0x47c   :  { %5780 = vmatpush2.bf16.msra.mxu0 %v9365_v47  ;;  %5740 = vmatprep.subr.bf16.mxu1 %v9370_v17  ;;  %v9436_v47 = vld [vmem:[#allocation9 + $0xfa4] ss:$16 sps:$4 sm:$0xff]   ;;  %v9439_v17 = vld [vmem:[#allocation9 + $0xfac] ss:$16 sps:$4 sm:$0xff]  }
 0x47d   :  { %5781 = vmatprep.subr.bf16.mxu0 %v9373_v28  ;;  %v9434_v28 = vld [vmem:[#allocation9 + $0xfa0] ss:$16 sps:$4 sm:$0xff]  }
 0x47f   :  { %5741 = vmatpush2.bf16.msra.mxu1 %v9368_v26  ;;  %v9437_v26 = vld [vmem:[#allocation9 + $0xfa8] ss:$16 sps:$4 sm:$0xff]  }
 0x480   :  { %5782 = vmatpush2.bf16.msra.mxu0 %v9371_v22  ;;  %6187 = vmatprep.subr.bf16.mxu1 %v9376_v55  ;;  %v9442_v22 = vld [vmem:[#allocation9 + $0xf84] ss:$16 sps:$4 sm:$0xff]   ;;  %v9445_v55 = vld [vmem:[#allocation9 + $0xf8c] ss:$16 sps:$4 sm:$0xff]  }
 0x481   :  { %6228 = vmatprep.subr.bf16.mxu0 %v9379_v29  ;;  %v9440_v29 = vld [vmem:[#allocation9 + $0xf80] ss:$16 sps:$4 sm:$0xff]  }
 0x482   :  { %v4325_v60 = vpop.f32.mrf.mxu1  ;;  %5743 = vmatmul.mubr.bf16.vlgmr.msra.gmra.mxu1 %v10956_v1 }
 0x483   :  { %v11022_v13 = vadd.f32 %v4325_v60, %v11006_v50  ;;  %v4366_v41 = vpop.f32.mrf.mxu0  ;;  %5784 = vmatmul.mubr.bf16.vlgmr.msra.gmra.mxu0 %v10956_v1  ;;  %6188 = vmatpush1.bf16.msra.mxu1 %v9374_v19  ;;  %v9391_v50 = vld [vmem:[#allocation9 + $0xeac] ss:$16 sps:$4 sm:$0xff]   ;;  %v9443_v19 = vld [vmem:[#allocation9 + $0xf88] ss:$16 sps:$4 sm:$0xff]   ;;  %v9446_v60 = vld [vmem:[#allocation9 + $0xf60] ss:$16 sps:$4 sm:$0xff]  }
 0x484   :  { %v11026_v51 = vadd.f32 %v4366_v41, %v11009_v21  ;;  %6219 = vmatprep.mubr.bf16.mxu1 %v5864_v39  ;;  %6229 = vmatpush1.bf16.msra.mxu0 %v9377_v46  ;;  %v4327_v59 = vpop.f32.mrf.mxu1  ;;  %v9386_v21 = vld [vmem:[#allocation9 + $0xea0] ss:$16 sps:$4 sm:$0xff]   ;;  %v9448_v46 = vld [vmem:[#allocation9 + $0xf64] ss:$16 sps:$4 sm:$0xff]   ;;  %v9457_v41 = vld [vmem:[#allocation9 + $0xf4c] ss:$16 sps:$4 sm:$0xff]  }
 0x485   :  { %6260 = vmatprep.mubr.bf16.mxu0 %v5864_v39  ;;  %v11029_v11 = vadd.f32 %v4327_v59, %v11014_v7  ;;  %v4368_v61 = vpop.f32.mrf.mxu0  ;;  %6189 = vmatprep.subr.bf16.mxu1 %v9382_v53  ;;  %v9397_v7 = vld [vmem:[#allocation9 + $0xe8c] ss:$16 sps:$4 sm:$0xff]   ;;  %v9449_v39 = vld [vmem:[#allocation9 + $0xf68] ss:$16 sps:$4 sm:$0xff]  }
 0x486   :  { %v11032_v33 = vadd.f32 %v4368_v61, %v11017_v0  ;;  %v4329_v57 = vpop.f32.mrf.mxu1  ;;  %6230 = vmatprep.subr.bf16.mxu0 %v9385_v30  ;;  %v9400_v0 = vld [vmem:[#allocation9 + $0xe64] ss:$16 sps:$4 sm:$0xff]   ;;  %v9451_v53 = vld [vmem:[#allocation9 + $0xf6c] ss:$16 sps:$4 sm:$0xff]   ;;  %v9455_v59 = vld [vmem:[#allocation9 + $0xf48] ss:$16 sps:$4 sm:$0xff]  }
 0x487   :  { %v4370_v24 = vpop.f32.mrf.mxu0  ;;  %6190 = vmatpush1.bf16.msra.mxu1 %v9380_v44  ;;  %v9454_v30 = vld [vmem:[#allocation9 + $0xf44] ss:$16 sps:$4 sm:$0xff]   ;;  %v9452_v44 = vld [vmem:[#allocation9 + $0xf40] ss:$16 sps:$4 sm:$0xff]  }
 0x488   :  { %6231 = vmatpush1.bf16.msra.mxu0 %v9383_v12  ;;  %v4330_v27 = vpop.f32.mrf.mxu1  ;;  %6191 = vmatprep.subr.bf16.mxu1 %v9388_v5  ;;  %v9460_v12 = vld [vmem:[#allocation9 + $0xf24] ss:$16 sps:$4 sm:$0xff]   ;;  %v9463_v5 = vld [vmem:[#allocation9 + $0xf2c] ss:$16 sps:$4 sm:$0xff]   ;;  %v9458_v61 = vld [vmem:[#allocation9 + $0xf20] ss:$16 sps:$4 sm:$0xff]  }
 0x489   :  { %v4371_v36 = vpop.f32.mrf.mxu0  ;;  %6232 = vmatprep.subr.bf16.mxu0 %v9391_v50  ;;  %v9461_v50 = vld [vmem:[#allocation9 + $0xf28] ss:$16 sps:$4 sm:$0xff]   ;;  %v9466_v57 = vld [vmem:[#allocation9 + $0xf04] ss:$16 sps:$4 sm:$0xff]   ;;  %v9469_v24 = vld [vmem:[#allocation9 + $0xf0c] ss:$16 sps:$4 sm:$0xff]  }
 0x48a   :  { %v9467_v27 = vld [vmem:[#allocation9 + $0xf08] ss:$16 sps:$4 sm:$0xff]   ;;  %v9470_v36 = vld [vmem:[#allocation9 + $0x10e0] ss:$16 sps:$4 sm:$0xff]  }
 0x48b   :  { %6192 = vmatpush1.bf16.msra.mxu1 %v9386_v21  ;;  %v9464_v21 = vld [vmem:[#allocation9 + $0xf00] ss:$16 sps:$4 sm:$0xff]  }
 0x48c   :  { %6233 = vmatpush1.bf16.msra.mxu0 %v9389_v20  ;;  %6193 = vmatprep.subr.bf16.mxu1 %v9394_v63  ;;  %v9472_v20 = vld [vmem:[#allocation9 + $0x10e4] ss:$16 sps:$4 sm:$0xff]   ;;  %v9475_v63 = vld [vmem:[#allocation9 + $0x10ec] ss:$16 sps:$4 sm:$0xff]  }
 0x48d   :  { %6234 = vmatprep.subr.bf16.mxu0 %v9397_v7  ;;  %v5863_v7 = vrot.slane %v10956_v1, 4 }
 0x48f   :  { %6194 = vmatpush1.bf16.msra.mxu1 %v9392_v52  ;;  %v9473_v52 = vld [vmem:[#allocation9 + $0x10e8] ss:$16 sps:$4 sm:$0xff]  }
 0x490   :  { %6235 = vmatpush1.bf16.msra.mxu0 %v9395_v37  ;;  %6195 = vmatprep.subr.bf16.mxu1 %v9400_v0  ;;  %v9478_v37 = vld [vmem:[#allocation9 + $0x10c4] ss:$16 sps:$4 sm:$0xff]  }
 0x491   :  { %6236 = vmatprep.subr.bf16.mxu0 %v9403_v2  ;;  %v9481_v2 = vld [vmem:[#allocation9 + $0x10cc] ss:$16 sps:$4 sm:$0xff]  }
 0x493   :  { %6196 = vmatpush1.bf16.msra.mxu1 %v9398_v58 }
 0x494   :  { %6237 = vmatpush1.bf16.msra.mxu0 %v9401_v10  ;;  %6197 = vmatprep.subr.bf16.mxu1 %v9406_v49  ;;  %v9476_v49 = vld [vmem:[#allocation9 + $0x10c0] ss:$16 sps:$4 sm:$0xff]  }
 0x495   :  { %6238 = vmatprep.subr.bf16.mxu0 %v9409_v35 }
 0x497   :  { %6198 = vmatpush1.bf16.msra.mxu1 %v9404_v40  ;;  %v9479_v40 = vld [vmem:[#allocation9 + $0x10c8] ss:$16 sps:$4 sm:$0xff]  }
 0x498   :  { %6239 = vmatpush1.bf16.msra.mxu0 %v9407_v54  ;;  %6199 = vmatprep.subr.bf16.mxu1 %v9412_v43  ;;  %v9484_v54 = vld [vmem:[#allocation9 + $0x10a4] ss:$16 sps:$4 sm:$0xff]  }
 0x499   :  { %6240 = vmatprep.subr.bf16.mxu0 %v9415_v45  ;;  %v9487_v45 = vld [vmem:[#allocation9 + $0x10ac] ss:$16 sps:$4 sm:$0xff]  }
 0x49b   :  { %6200 = vmatpush1.bf16.msra.mxu1 %v9410_v25 }
 0x49c   :  { %6241 = vmatpush1.bf16.msra.mxu0 %v9413_v34  ;;  %6201 = vmatprep.subr.bf16.mxu1 %v9418_v48  ;;  %v9482_v48 = vld [vmem:[#allocation9 + $0x10a0] ss:$16 sps:$4 sm:$0xff]  }
 0x49d   :  { %6242 = vmatprep.subr.bf16.mxu0 %v9421_v16 }
 0x49f   :  { %6202 = vmatpush1.bf16.msra.mxu1 %v9416_v18  ;;  %v9485_v18 = vld [vmem:[#allocation9 + $0x10a8] ss:$16 sps:$4 sm:$0xff]  }
 0x4a0   :  { %6243 = vmatpush1.bf16.msra.mxu0 %v9419_v8  ;;  %6203 = vmatprep.subr.bf16.mxu1 %v9424_v56  ;;  %v9490_v8 = vld [vmem:[#allocation9 + $0x1084] ss:$16 sps:$4 sm:$0xff]  }
 0x4a1   :  { %6244 = vmatprep.subr.bf16.mxu0 %v9427_v38  ;;  %v9488_v38 = vld [vmem:[#allocation9 + $0x1080] ss:$16 sps:$4 sm:$0xff]  }
 0x4a3   :  { %6204 = vmatpush2.bf16.msra.mxu1 %v9422_v15  ;;  %v9491_v15 = vld [vmem:[#allocation9 + $0x1088] ss:$16 sps:$4 sm:$0xff]  }
 0x4a4   :  { %6245 = vmatpush2.bf16.msra.mxu0 %v9425_v42  ;;  %6205 = vmatprep.subr.bf16.mxu1 %v9430_v31  ;;  %v9499_v42 = vld [vmem:[#allocation9 + $0x106c] ss:$16 sps:$4 sm:$0xff]   ;;  %v9494_v31 = vld [vmem:[#allocation9 + $0x1060] ss:$16 sps:$4 sm:$0xff]  }
 0x4a5   :  { %6246 = vmatprep.subr.bf16.mxu0 %v9433_v23  ;;  %v9497_v23 = vld [vmem:[#allocation9 + $0x1068] ss:$16 sps:$4 sm:$0xff]  }
 0x4a7   :  { %6206 = vmatpush2.bf16.msra.mxu1 %v9428_v62  ;;  %v9502_v62 = vld [vmem:[#allocation9 + $0x1044] ss:$16 sps:$4 sm:$0xff]  }
 0x4a8   :  { %6247 = vmatpush2.bf16.msra.mxu0 %v9431_v9  ;;  %6207 = vmatprep.subr.bf16.mxu1 %v9436_v47  ;;  %v9505_v9 = vld [vmem:[#allocation9 + $0x104c] ss:$16 sps:$4 sm:$0xff]   ;;  %v9500_v47 = vld [vmem:[#allocation9 + $0x1040] ss:$16 sps:$4 sm:$0xff]  }
 0x4a9   :  { %6248 = vmatprep.subr.bf16.mxu0 %v9439_v17  ;;  %v9503_v17 = vld [vmem:[#allocation9 + $0x1048] ss:$16 sps:$4 sm:$0xff]  }
 0x4ab   :  { %6208 = vmatpush2.bf16.msra.mxu1 %v9434_v28  ;;  %v9508_v28 = vld [vmem:[#allocation9 + $0x1024] ss:$16 sps:$4 sm:$0xff]  }
 0x4ac   :  { %6249 = vmatpush2.bf16.msra.mxu0 %v9437_v26  ;;  %6209 = vmatprep.subr.bf16.mxu1 %v9442_v22  ;;  %v9511_v26 = vld [vmem:[#allocation9 + $0x102c] ss:$16 sps:$4 sm:$0xff]   ;;  %v9506_v22 = vld [vmem:[#allocation9 + $0x1020] ss:$16 sps:$4 sm:$0xff]  }
 0x4ad   :  { %6250 = vmatprep.subr.bf16.mxu0 %v9445_v55  ;;  %v9509_v55 = vld [vmem:[#allocation9 + $0x1028] ss:$16 sps:$4 sm:$0xff]  }
 0x4af   :  { %6210 = vmatpush2.bf16.msra.mxu1 %v9440_v29  ;;  %v9514_v29 = vld [vmem:[#allocation9 + $0x1004] ss:$16 sps:$4 sm:$0xff]  }
 0x4b0   :  { %6251 = vmatpush2.bf16.msra.mxu0 %v9443_v19  ;;  %6211 = vmatprep.subr.bf16.mxu1 %v9448_v46  ;;  %v9517_v19 = vld [vmem:[#allocation9 + $0x100c] ss:$16 sps:$4 sm:$0xff]   ;;  %v9512_v46 = vld [vmem:[#allocation9 + $0x1000] ss:$16 sps:$4 sm:$0xff]  }
 0x4b1   :  { %6252 = vmatprep.subr.bf16.mxu0 %v9451_v53  ;;  %v9515_v53 = vld [vmem:[#allocation9 + $0x1008] ss:$16 sps:$4 sm:$0xff]  }
 0x4b3   :  { %6212 = vmatpush2.bf16.msra.mxu1 %v9446_v60  ;;  %v9520_v60 = vld [vmem:[#allocation9 + $0x11e4] ss:$16 sps:$4 sm:$0xff]  }
 0x4b4   :  { %6253 = vmatpush2.bf16.msra.mxu0 %v9449_v39  ;;  %6213 = vmatprep.subr.bf16.mxu1 %v9454_v30  ;;  %v9523_v39 = vld [vmem:[#allocation9 + $0x11ec] ss:$16 sps:$4 sm:$0xff]   ;;  %v9518_v30 = vld [vmem:[#allocation9 + $0x11e0] ss:$16 sps:$4 sm:$0xff]  }
 0x4b5   :  { %6254 = vmatprep.subr.bf16.mxu0 %v9457_v41  ;;  %v9521_v41 = vld [vmem:[#allocation9 + $0x11e8] ss:$16 sps:$4 sm:$0xff]  }
 0x4b7   :  { %6214 = vmatpush2.bf16.msra.mxu1 %v9452_v44  ;;  %v9526_v44 = vld [vmem:[#allocation9 + $0x11c4] ss:$16 sps:$4 sm:$0xff]  }
 0x4b8   :  { %6255 = vmatpush2.bf16.msra.mxu0 %v9455_v59  ;;  %6215 = vmatprep.subr.bf16.mxu1 %v9460_v12  ;;  %v9529_v59 = vld [vmem:[#allocation9 + $0x11cc] ss:$16 sps:$4 sm:$0xff]   ;;  %v9524_v12 = vld [vmem:[#allocation9 + $0x11c0] ss:$16 sps:$4 sm:$0xff]  }
 0x4b9   :  { %6256 = vmatprep.subr.bf16.mxu0 %v9463_v5  ;;  %v9527_v5 = vld [vmem:[#allocation9 + $0x11c8] ss:$16 sps:$4 sm:$0xff]  }
 0x4bb   :  { %6216 = vmatpush2.bf16.msra.mxu1 %v9458_v61  ;;  %v9532_v61 = vld [vmem:[#allocation9 + $0x11a4] ss:$16 sps:$4 sm:$0xff]  }
 0x4bc   :  { %6257 = vmatpush2.bf16.msra.mxu0 %v9461_v50  ;;  %6217 = vmatprep.subr.bf16.mxu1 %v9466_v57  ;;  %v9535_v50 = vld [vmem:[#allocation9 + $0x11ac] ss:$16 sps:$4 sm:$0xff]   ;;  %v9530_v57 = vld [vmem:[#allocation9 + $0x11a0] ss:$16 sps:$4 sm:$0xff]  }
 0x4bd   :  { %6258 = vmatprep.subr.bf16.mxu0 %v9469_v24  ;;  %v9533_v24 = vld [vmem:[#allocation9 + $0x11a8] ss:$16 sps:$4 sm:$0xff]  }
 0x4bf   :  { %6218 = vmatpush2.bf16.msra.mxu1 %v9464_v21  ;;  %v9538_v21 = vld [vmem:[#allocation9 + $0x1184] ss:$16 sps:$4 sm:$0xff]  }
 0x4c0   :  { %6259 = vmatpush2.bf16.msra.mxu0 %v9467_v27  ;;  %6658 = vmatprep.subr.bf16.mxu1 %v9472_v20  ;;  %v9541_v27 = vld [vmem:[#allocation9 + $0x118c] ss:$16 sps:$4 sm:$0xff]   ;;  %v9536_v20 = vld [vmem:[#allocation9 + $0x1180] ss:$16 sps:$4 sm:$0xff]  }
 0x4c1   :  { %6699 = vmatprep.subr.bf16.mxu0 %v9475_v63  ;;  %v9539_v63 = vld [vmem:[#allocation9 + $0x1188] ss:$16 sps:$4 sm:$0xff]  }
 0x4c2   :  { %v4796_v0 = vpop.f32.mrf.mxu1  ;;  %6220 = vmatmul.mubr.bf16.vlgmr.msra.gmra.mxu1 %v5863_v7 }
 0x4c3   :  { %v11036_v58 = vadd.f32 %v4796_v0, %v11022_v13  ;;  %v4837_v10 = vpop.f32.mrf.mxu0  ;;  %6261 = vmatmul.mubr.bf16.vlgmr.msra.gmra.mxu0 %v5863_v7  ;;  %6659 = vmatpush1.bf16.msra.mxu1 %v9470_v36  ;;  %v9544_v36 = vld [vmem:[#allocation9 + $0x1164] ss:$16 sps:$4 sm:$0xff]   ;;  %v9547_v7 = vld [vmem:[#allocation9 + $0x116c] ss:$16 sps:$4 sm:$0xff]  }
 0x4c4   :  { %v11039_v35 = vadd.f32 %v4837_v10, %v11026_v51  ;;  %6690 = vmatprep.mubr.bf16.mxu1 %v10969_v32  ;;  %6700 = vmatpush1.bf16.msra.mxu0 %v9473_v52  ;;  %v4798_v1 = vpop.f32.mrf.mxu1  ;;  %v9542_v52 = vld [vmem:[#allocation9 + $0x1160] ss:$16 sps:$4 sm:$0xff]   ;;  %v9550_v0 = vld [vmem:[#allocation9 + $0x1144] ss:$16 sps:$4 sm:$0xff]  }
 0x4c5   :  { %6731 = vmatprep.mubr.bf16.mxu0 %v10969_v32  ;;  %v11044_v43 = vadd.f32 %v4798_v1, %v11029_v11  ;;  %v4839_v13 = vpop.f32.mrf.mxu0  ;;  %6660 = vmatprep.subr.bf16.mxu1 %v9478_v37  ;;  %v9493_v11 = vld [vmem:[#allocation9 + $0x108c] ss:$16 sps:$4 sm:$0xff]   ;;  %v9545_v37 = vld [vmem:[#allocation9 + $0x1168] ss:$16 sps:$4 sm:$0xff]   ;;  %v9548_v10 = vld [vmem:[#allocation9 + $0x1140] ss:$16 sps:$4 sm:$0xff]  }
 0x4c6   :  { %v11047_v25 = vadd.f32 %v4839_v13, %v11032_v33  ;;  %v4800_v34 = vpop.f32.mrf.mxu1  ;;  %6701 = vmatprep.subr.bf16.mxu0 %v9481_v2  ;;  %v9496_v33 = vld [vmem:[#allocation9 + $0x1064] ss:$16 sps:$4 sm:$0xff]   ;;  %v9553_v2 = vld [vmem:[#allocation9 + $0x114c] ss:$16 sps:$4 sm:$0xff]   ;;  %v9557_v13 = vld [vmem:[#allocation9 + $0x1128] ss:$16 sps:$4 sm:$0xff]  }
 0x4c7   :  { %v4841_v51 = vpop.f32.mrf.mxu0  ;;  %6661 = vmatpush1.bf16.msra.mxu1 %v9476_v49  ;;  %v9551_v49 = vld [vmem:[#allocation9 + $0x1148] ss:$16 sps:$4 sm:$0xff]   ;;  %v9556_v1 = vld [vmem:[#allocation9 + $0x1124] ss:$16 sps:$4 sm:$0xff]   ;;  %v9565_v34 = vld [vmem:[#allocation9 + $0x110c] ss:$16 sps:$4 sm:$0xff]  }
 0x4c8   :  { %6702 = vmatpush1.bf16.msra.mxu0 %v9479_v40  ;;  %v4801_v16 = vpop.f32.mrf.mxu1  ;;  %6662 = vmatprep.subr.bf16.mxu1 %v9484_v54  ;;  %v9559_v40 = vld [vmem:[#allocation9 + $0x112c] ss:$16 sps:$4 sm:$0xff]   ;;  %v9554_v54 = vld [vmem:[#allocation9 + $0x1120] ss:$16 sps:$4 sm:$0xff]  }
 0x4c9   :  { %v4842_v56 = vpop.f32.mrf.mxu0  ;;  %6703 = vmatprep.subr.bf16.mxu0 %v9487_v45  ;;  %v9562_v45 = vld [vmem:[#allocation9 + $0x1104] ss:$16 sps:$4 sm:$0xff]   ;;  %v9560_v51 = vld [vmem:[#allocation9 + $0x1100] ss:$16 sps:$4 sm:$0xff]  }
 0x4ca   :  { %v9568_v16 = vld [vmem:[#allocation9 + $0x12e4] ss:$16 sps:$4 sm:$0xff]   ;;  %v9569_v56 = vld [vmem:[#allocation9 + $0x12e8] ss:$16 sps:$4 sm:$0xff]  }
 0x4cb   :  { %6663 = vmatpush1.bf16.msra.mxu1 %v9482_v48  ;;  %v9563_v48 = vld [vmem:[#allocation9 + $0x1108] ss:$16 sps:$4 sm:$0xff]  }
 0x4cc   :  { %6704 = vmatpush1.bf16.msra.mxu0 %v9485_v18  ;;  %6664 = vmatprep.subr.bf16.mxu1 %v9490_v8  ;;  %v9571_v18 = vld [vmem:[#allocation9 + $0x12ec] ss:$16 sps:$4 sm:$0xff]   ;;  %v9566_v8 = vld [vmem:[#allocation9 + $0x12e0] ss:$16 sps:$4 sm:$0xff]  }
 0x4cd   :  { %6705 = vmatprep.subr.bf16.mxu0 %v9493_v11  ;;  %v9574_v11 = vld [vmem:[#allocation9 + $0x12c4] ss:$16 sps:$4 sm:$0xff]  }
 0x4cf   :  { %6665 = vmatpush1.bf16.msra.mxu1 %v9488_v38 }
 0x4d0   :  { %6706 = vmatpush1.bf16.msra.mxu0 %v9491_v15  ;;  %6666 = vmatprep.subr.bf16.mxu1 %v9496_v33  ;;  %v6812_v15 = vrot.slane %v10969_v32, 4  ;;  %v9577_v33 = vld [vmem:[#allocation9 + $0x12cc] ss:$16 sps:$4 sm:$0xff]  }
 0x4d1   :  { %6707 = vmatprep.subr.bf16.mxu0 %v9499_v42 }
 0x4d3   :  { %6667 = vmatpush1.bf16.msra.mxu1 %v9494_v31 }
 0x4d4   :  { %6708 = vmatpush1.bf16.msra.mxu0 %v9497_v23  ;;  %6668 = vmatprep.subr.bf16.mxu1 %v9502_v62  ;;  %v9572_v23 = vld [vmem:[#allocation9 + $0x12c0] ss:$16 sps:$4 sm:$0xff]  }
 0x4d5   :  { %6709 = vmatprep.subr.bf16.mxu0 %v9505_v9 }
 0x4d7   :  { %6669 = vmatpush1.bf16.msra.mxu1 %v9500_v47  ;;  %v9575_v47 = vld [vmem:[#allocation9 + $0x12c8] ss:$16 sps:$4 sm:$0xff]  }
 0x4d8   :  { %6710 = vmatpush1.bf16.msra.mxu0 %v9503_v17  ;;  %6670 = vmatprep.subr.bf16.mxu1 %v9508_v28  ;;  %v9580_v17 = vld [vmem:[#allocation9 + $0x12a4] ss:$16 sps:$4 sm:$0xff]  }
 0x4d9   :  { %6711 = vmatprep.subr.bf16.mxu0 %v9511_v26 }
 0x4db   :  { %6671 = vmatpush1.bf16.msra.mxu1 %v9506_v22 }
 0x4dc   :  { %6712 = vmatpush1.bf16.msra.mxu0 %v9509_v55  ;;  %6672 = vmatprep.subr.bf16.mxu1 %v9514_v29 }
 0x4dd   :  { %6713 = vmatprep.subr.bf16.mxu0 %v9517_v19  ;;  %v9581_v19 = vld [vmem:[#allocation9 + $0x12a8] ss:$16 sps:$4 sm:$0xff]  }
 0x4df   :  { %6673 = vmatpush1.bf16.msra.mxu1 %v9512_v46  ;;  %v9586_v46 = vld [vmem:[#allocation9 + $0x1284] ss:$16 sps:$4 sm:$0xff]  }
 0x4e0   :  { %6714 = vmatpush1.bf16.msra.mxu0 %v9515_v53  ;;  %6674 = vmatprep.subr.bf16.mxu1 %v9520_v60  ;;  %v9584_v60 = vld [vmem:[#allocation9 + $0x1280] ss:$16 sps:$4 sm:$0xff]  }
 0x4e1   :  { %6715 = vmatprep.subr.bf16.mxu0 %v9523_v39  ;;  %v9587_v39 = vld [vmem:[#allocation9 + $0x1288] ss:$16 sps:$4 sm:$0xff]  }
 0x4e3   :  { %6675 = vmatpush2.bf16.msra.mxu1 %v9518_v30  ;;  %v9595_v30 = vld [vmem:[#allocation9 + $0x126c] ss:$16 sps:$4 sm:$0xff]  }
 0x4e4   :  { %6716 = vmatpush2.bf16.msra.mxu0 %v9521_v41  ;;  %6676 = vmatprep.subr.bf16.mxu1 %v9526_v44  ;;  %v9590_v41 = vld [vmem:[#allocation9 + $0x1260] ss:$16 sps:$4 sm:$0xff]   ;;  %v9593_v44 = vld [vmem:[#allocation9 + $0x1268] ss:$16 sps:$4 sm:$0xff]  }
 0x4e5   :  { %6717 = vmatprep.subr.bf16.mxu0 %v9529_v59  ;;  %v9598_v59 = vld [vmem:[#allocation9 + $0x1244] ss:$16 sps:$4 sm:$0xff]  }
 0x4e7   :  { %6677 = vmatpush2.bf16.msra.mxu1 %v9524_v12  ;;  %v9601_v12 = vld [vmem:[#allocation9 + $0x124c] ss:$16 sps:$4 sm:$0xff]  }
 0x4e8   :  { %6718 = vmatpush2.bf16.msra.mxu0 %v9527_v5  ;;  %6678 = vmatprep.subr.bf16.mxu1 %v9532_v61  ;;  %v9596_v5 = vld [vmem:[#allocation9 + $0x1240] ss:$16 sps:$4 sm:$0xff]   ;;  %v9599_v61 = vld [vmem:[#allocation9 + $0x1248] ss:$16 sps:$4 sm:$0xff]  }
 0x4e9   :  { %6719 = vmatprep.subr.bf16.mxu0 %v9535_v50  ;;  %v9604_v50 = vld [vmem:[#allocation9 + $0x1224] ss:$16 sps:$4 sm:$0xff]  }
 0x4eb   :  { %6679 = vmatpush2.bf16.msra.mxu1 %v9530_v57  ;;  %v9607_v57 = vld [vmem:[#allocation9 + $0x122c] ss:$16 sps:$4 sm:$0xff]  }
 0x4ec   :  { %6720 = vmatpush2.bf16.msra.mxu0 %v9533_v24  ;;  %6680 = vmatprep.subr.bf16.mxu1 %v9538_v21  ;;  %v9602_v24 = vld [vmem:[#allocation9 + $0x1220] ss:$16 sps:$4 sm:$0xff]   ;;  %v9605_v21 = vld [vmem:[#allocation9 + $0x1228] ss:$16 sps:$4 sm:$0xff]  }
 0x4ed   :  { %6721 = vmatprep.subr.bf16.mxu0 %v9541_v27  ;;  %v9610_v27 = vld [vmem:[#allocation9 + $0x1204] ss:$16 sps:$4 sm:$0xff]  }
 0x4ef   :  { %6681 = vmatpush2.bf16.msra.mxu1 %v9536_v20  ;;  %v9613_v20 = vld [vmem:[#allocation9 + $0x120c] ss:$16 sps:$4 sm:$0xff]  }
 0x4f0   :  { %6722 = vmatpush2.bf16.msra.mxu0 %v9539_v63  ;;  %6682 = vmatprep.subr.bf16.mxu1 %v9544_v36  ;;  %v9608_v63 = vld [vmem:[#allocation9 + $0x1200] ss:$16 sps:$4 sm:$0xff]   ;;  %v9611_v36 = vld [vmem:[#allocation9 + $0x1208] ss:$16 sps:$4 sm:$0xff]  }
 0x4f1   :  { %6723 = vmatprep.subr.bf16.mxu0 %v9547_v7  ;;  %v9616_v7 = vld [vmem:[#allocation9 + $0x13e4] ss:$16 sps:$4 sm:$0xff]  }
 0x4f3   :  { %6683 = vmatpush2.bf16.msra.mxu1 %v9542_v52  ;;  %v9619_v52 = vld [vmem:[#allocation9 + $0x13ec] ss:$16 sps:$4 sm:$0xff]  }
 0x4f4   :  { %6724 = vmatpush2.bf16.msra.mxu0 %v9545_v37  ;;  %6684 = vmatprep.subr.bf16.mxu1 %v9550_v0  ;;  %v9614_v37 = vld [vmem:[#allocation9 + $0x13e0] ss:$16 sps:$4 sm:$0xff]   ;;  %v9617_v0 = vld [vmem:[#allocation9 + $0x13e8] ss:$16 sps:$4 sm:$0xff]  }
 0x4f5   :  { %6725 = vmatprep.subr.bf16.mxu0 %v9553_v2  ;;  %v9622_v2 = vld [vmem:[#allocation9 + $0x13c4] ss:$16 sps:$4 sm:$0xff]  }
 0x4f7   :  { %6685 = vmatpush2.bf16.msra.mxu1 %v9548_v10  ;;  %v9625_v10 = vld [vmem:[#allocation9 + $0x13cc] ss:$16 sps:$4 sm:$0xff]  }
 0x4f8   :  { %6726 = vmatpush2.bf16.msra.mxu0 %v9551_v49  ;;  %6686 = vmatprep.subr.bf16.mxu1 %v9556_v1  ;;  %v9620_v49 = vld [vmem:[#allocation9 + $0x13c0] ss:$16 sps:$4 sm:$0xff]   ;;  %v9623_v1 = vld [vmem:[#allocation9 + $0x13c8] ss:$16 sps:$4 sm:$0xff]  }
 0x4f9   :  { %6727 = vmatprep.subr.bf16.mxu0 %v9559_v40  ;;  %v9628_v40 = vld [vmem:[#allocation9 + $0x13a4] ss:$16 sps:$4 sm:$0xff]  }
 0x4fb   :  { %6687 = vmatpush2.bf16.msra.mxu1 %v9554_v54  ;;  %v9631_v54 = vld [vmem:[#allocation9 + $0x13ac] ss:$16 sps:$4 sm:$0xff]  }
 0x4fc   :  { %6728 = vmatpush2.bf16.msra.mxu0 %v9557_v13  ;;  %6688 = vmatprep.subr.bf16.mxu1 %v9562_v45  ;;  %v9626_v13 = vld [vmem:[#allocation9 + $0x13a0] ss:$16 sps:$4 sm:$0xff]   ;;  %v9629_v45 = vld [vmem:[#allocation9 + $0x13a8] ss:$16 sps:$4 sm:$0xff]  }
 0x4fd   :  { %6729 = vmatprep.subr.bf16.mxu0 %v9565_v34  ;;  %v9634_v34 = vld [vmem:[#allocation9 + $0x1384] ss:$16 sps:$4 sm:$0xff]  }
 0x4ff   :  { %6689 = vmatpush2.bf16.msra.mxu1 %v9560_v51  ;;  %v9637_v51 = vld [vmem:[#allocation9 + $0x138c] ss:$16 sps:$4 sm:$0xff]  }
 0x500   :  { %6730 = vmatpush2.bf16.msra.mxu0 %v9563_v48  ;;  %7135 = vmatprep.subr.bf16.mxu1 %v9568_v16  ;;  %v9632_v48 = vld [vmem:[#allocation9 + $0x1380] ss:$16 sps:$4 sm:$0xff]   ;;  %v9635_v16 = vld [vmem:[#allocation9 + $0x1388] ss:$16 sps:$4 sm:$0xff]  }
 0x501   :  { %7176 = vmatprep.subr.bf16.mxu0 %v9571_v18  ;;  %v9640_v18 = vld [vmem:[#allocation9 + $0x1364] ss:$16 sps:$4 sm:$0xff]  }
 0x502   :  { %v5273_v38 = vpop.f32.mrf.mxu1  ;;  %6691 = vmatmul.mubr.bf16.vlgmr.msra.gmra.mxu1 %v10967_v4 }
 0x503   :  { %v11052_v42 = vadd.f32 %v5273_v38, %v11036_v58  ;;  %v5314_v31 = vpop.f32.mrf.mxu0  ;;  %6732 = vmatmul.mubr.bf16.vlgmr.msra.gmra.mxu0 %v10967_v4  ;;  %7136 = vmatpush1.bf16.msra.mxu1 %v9566_v8  ;;  %v9583_v58 = vld [vmem:[#allocation9 + $0x12ac] ss:$16 sps:$4 sm:$0xff]   ;;  %v9646_v38 = vld [vmem:[#allocation9 + $0x1344] ss:$16 sps:$4 sm:$0xff]  }
 0x504   :  { %v11056_v62 = vadd.f32 %v5314_v31, %v11039_v35  ;;  %7167 = vmatprep.mubr.bf16.mxu1 %v6812_v15  ;;  %7177 = vmatpush1.bf16.msra.mxu0 %v9569_v56  ;;  %v5275_v9 = vpop.f32.mrf.mxu1  ;;  %v9578_v35 = vld [vmem:[#allocation9 + $0x12a0] ss:$16 sps:$4 sm:$0xff]   ;;  %v9643_v8 = vld [vmem:[#allocation9 + $0x136c] ss:$16 sps:$4 sm:$0xff]   ;;  %v9647_v31 = vld [vmem:[#allocation9 + $0x1348] ss:$16 sps:$4 sm:$0xff]  }
 0x505   :  { %7208 = vmatprep.mubr.bf16.mxu0 %v6812_v15  ;;  %v11059_v32 = vadd.f32 %v5275_v9, %v11044_v43  ;;  %v5316_v28 = vpop.f32.mrf.mxu0  ;;  %7137 = vmatprep.subr.bf16.mxu1 %v9574_v11  ;;  %v9589_v43 = vld [vmem:[#allocation9 + $0x128c] ss:$16 sps:$4 sm:$0xff]   ;;  %v9638_v56 = vld [vmem:[#allocation9 + $0x1360] ss:$16 sps:$4 sm:$0xff]   ;;  %v9641_v11 = vld [vmem:[#allocation9 + $0x1368] ss:$16 sps:$4 sm:$0xff]  }
 0x506   :  { %v11062_v26 = vadd.f32 %v5316_v28, %v11047_v25  ;;  %v5277_v22 = vpop.f32.mrf.mxu1  ;;  %7178 = vmatprep.subr.bf16.mxu0 %v9577_v33  ;;  %v9592_v25 = vld [vmem:[#allocation9 + $0x1264] ss:$16 sps:$4 sm:$0xff]   ;;  %v9649_v15 = vld [vmem:[#allocation9 + $0x134c] ss:$16 sps:$4 sm:$0xff]   ;;  %v9644_v33 = vld [vmem:[#allocation9 + $0x1340] ss:$16 sps:$4 sm:$0xff]  }
 0x507   :  { %v5318_v55 = vpop.f32.mrf.mxu0  ;;  %7138 = vmatpush1.bf16.msra.mxu1 %v9572_v23  ;;  %v9652_v23 = vld [vmem:[#allocation9 + $0x1324] ss:$16 sps:$4 sm:$0xff]   ;;  %v9655_v9 = vld [vmem:[#allocation9 + $0x132c] ss:$16 sps:$4 sm:$0xff]   ;;  %v9656_v22 = vld [vmem:[#allocation9 + $0x1300] ss:$16 sps:$4 sm:$0xff]  }
 0x508   :  { %7179 = vmatpush1.bf16.msra.mxu0 %v9575_v47  ;;  %v5278_v29 = vpop.f32.mrf.mxu1  ;;  %7139 = vmatprep.subr.bf16.mxu1 %v9580_v17  ;;  %v9650_v47 = vld [vmem:[#allocation9 + $0x1320] ss:$16 sps:$4 sm:$0xff]   ;;  %v9653_v17 = vld [vmem:[#allocation9 + $0x1328] ss:$16 sps:$4 sm:$0xff]   ;;  %v9658_v28 = vld [vmem:[#allocation9 + $0x1304] ss:$16 sps:$4 sm:$0xff]  }
 0x509   :  { %v5319_v53 = vpop.f32.mrf.mxu0  ;;  %7180 = vmatprep.subr.bf16.mxu0 %v9583_v58  ;;  %v9661_v58 = vld [vmem:[#allocation9 + $0x130c] ss:$16 sps:$4 sm:$0xff]   ;;  %v9659_v55 = vld [vmem:[#allocation9 + $0x1308] ss:$16 sps:$4 sm:$0xff]  }
 0x50b   :  { %7140 = vmatpush1.bf16.msra.mxu1 %v9578_v35  ;;  %v6811_v35 = vrot.slane %v10967_v4, 4  ;;  %v9662_v4 = vld [vmem:[%s11184_s7 + $0x78] sm:$0xff]  }
 0x50c   :  { %7181 = vmatpush1.bf16.msra.mxu0 %v9581_v19  ;;  %7141 = vmatprep.subr.bf16.mxu1 %v9586_v46 }
 0x50d   :  { %7182 = vmatprep.subr.bf16.mxu0 %v9589_v43 }
 0x50f   :  { %7142 = vmatpush1.bf16.msra.mxu1 %v9584_v60 }
 0x510   :  { %7183 = vmatpush1.bf16.msra.mxu0 %v9587_v39  ;;  %7143 = vmatprep.subr.bf16.mxu1 %v9592_v25 }
 0x511   :  { %7184 = vmatprep.subr.bf16.mxu0 %v9595_v30 }
 0x513   :  { %7144 = vmatpush1.bf16.msra.mxu1 %v9590_v41 }
 0x514   :  { %7185 = vmatpush1.bf16.msra.mxu0 %v9593_v44  ;;  %7145 = vmatprep.subr.bf16.mxu1 %v9598_v59 }
 0x515   :  { %7186 = vmatprep.subr.bf16.mxu0 %v9601_v12  ;;  %v9667_v12 = vld [vmem:[%s11184_s7 + $0x28] sm:$0xff]  }
 0x517   :  { %7146 = vmatpush1.bf16.msra.mxu1 %v9596_v5  ;;  %v9668_v5 = vld [vmem:[%s11184_s7 + $0x60] sm:$0xff]  }
 0x518   :  { %7187 = vmatpush1.bf16.msra.mxu0 %v9599_v61  ;;  %7147 = vmatprep.subr.bf16.mxu1 %v9604_v50  ;;  %v9669_v61 = vld [vmem:[%s11184_s7 + $0x20] sm:$0xff]   ;;  %v9670_v50 = vld [vmem:[%s11184_s7 + $0x58] sm:$0xff]  }
 0x519   :  { %7188 = vmatprep.subr.bf16.mxu0 %v9607_v57  ;;  %v9671_v57 = vld [vmem:[%s11184_s7 + $0x18] sm:$0xff]  }
 0x51b   :  { %7148 = vmatpush1.bf16.msra.mxu1 %v9602_v24  ;;  %v9672_v24 = vld [vmem:[%s11184_s7 + $0x50] sm:$0xff]  }
 0x51c   :  { %7189 = vmatpush1.bf16.msra.mxu0 %v9605_v21  ;;  %7149 = vmatprep.subr.bf16.mxu1 %v9610_v27  ;;  %v9673_v27 = vld [vmem:[%s11184_s7 + $0x10] sm:$0xff]  }
 0x51d   :  { %7190 = vmatprep.subr.bf16.mxu0 %v9613_v20 }
 0x51f   :  { %7150 = vmatpush1.bf16.msra.mxu1 %v9608_v63 }
 0x520   :  { %7191 = vmatpush1.bf16.msra.mxu0 %v9611_v36  ;;  %7151 = vmatprep.subr.bf16.mxu1 %v9616_v7 }
 0x521   :  { %7192 = vmatprep.subr.bf16.mxu0 %v9619_v52 }
 0x523   :  { %7152 = vmatpush2.bf16.msra.mxu1 %v9614_v37 }
 0x524   :  { %7193 = vmatpush2.bf16.msra.mxu0 %v9617_v0  ;;  %7153 = vmatprep.subr.bf16.mxu1 %v9622_v2  ;;  %v9674_v0 = vld [vmem:[%s11184_s7 + $0x48] sm:$0xff]  }
 0x525   :  { %7194 = vmatprep.subr.bf16.mxu0 %v9625_v10 }
 0x527   :  { %7154 = vmatpush2.bf16.msra.mxu1 %v9620_v49  ;;  %v9675_v49 = vld [vmem:[%s11184_s7 + $0x8] sm:$0xff]  }
 0x528   :  { %7195 = vmatpush2.bf16.msra.mxu0 %v9623_v1  ;;  %7155 = vmatprep.subr.bf16.mxu1 %v9628_v40 }
 0x529   :  { %7196 = vmatprep.subr.bf16.mxu0 %v9631_v54 }
 0x52b   :  { %7156 = vmatpush2.bf16.msra.mxu1 %v9626_v13  ;;  %v9676_v13 = vld [vmem:[%s11184_s7 + $0x40] sm:$0xff]  }
 0x52c   :  { %7197 = vmatpush2.bf16.msra.mxu0 %v9629_v45  ;;  %7157 = vmatprep.subr.bf16.mxu1 %v9634_v34  ;;  %v9677_v45 = vld [vmem:[%s11184_s7] sm:$0xff]   ;;  %v9678_v34 = vld [vmem:[%s11184_s7 + $0xf8] sm:$0xff]  }
 0x52d   :  { %7198 = vmatprep.subr.bf16.mxu0 %v9637_v51 }
 0x52f   :  { %7158 = vmatpush2.bf16.msra.mxu1 %v9632_v48 }
 0x530   :  { %7199 = vmatpush2.bf16.msra.mxu0 %v9635_v16  ;;  %7159 = vmatprep.subr.bf16.mxu1 %v9640_v18 }
 0x531   :  { %7200 = vmatprep.subr.bf16.mxu0 %v9643_v8 }
 0x533   :  { %7160 = vmatpush2.bf16.msra.mxu1 %v9638_v56 }
 0x534   :  { %7201 = vmatpush2.bf16.msra.mxu0 %v9641_v11  ;;  %7161 = vmatprep.subr.bf16.mxu1 %v9646_v38 }
 0x535   :  { %7202 = vmatprep.subr.bf16.mxu0 %v9649_v15 }
 0x537   :  { %7162 = vmatpush2.bf16.msra.mxu1 %v9644_v33 }
 0x538   :  { %7203 = vmatpush2.bf16.msra.mxu0 %v9647_v31  ;;  %7163 = vmatprep.subr.bf16.mxu1 %v9652_v23  ;;  %v7221_v31 = vld [vmem:[#allocation10] sm:$0xf]  ;;  %v7237_v23 = vsub.s32 3, %v10896_v14 }
 0x539   :  { %7204 = vmatprep.subr.bf16.mxu0 %v9655_v9  ;;  %v7226_v9 = vrot.slane %v7221_v31, %v2432_v3 }
 0x53b   :  { %7164 = vmatpush2.bf16.msra.mxu1 %v9650_v47 }
 0x53c   :  { %7205 = vmatpush2.bf16.msra.mxu0 %v9653_v17  ;;  %7165 = vmatprep.subr.bf16.mxu1 %v9658_v28 }
 0x53d   :  { %7206 = vmatprep.subr.bf16.mxu0 %v9661_v58 }
 0x53f   :  { %7166 = vmatpush2.bf16.msra.mxu1 %v9656_v22  ;;  %v7230_v22 = vrot.slane %v7221_v31, %v2436_v6  ;;  %v9679_v6 = vld [vmem:[%s11184_s7 + $0xb8] sm:$0xff]  }
 0x540   :  { %7207 = vmatpush2.bf16.msra.mxu0 %v9659_v55  ;;  %8504 = vmatprep.subr.bf16.mxu1 %v9662_v4 }
 0x542   :  { %v5744_v29 = vpop.f32.mrf.mxu1  ;;  %7168 = vmatmul.mubr.bf16.vlgmr.msra.gmra.mxu1 %v6811_v35 }
 0x543   :  { %v5792_v19 = vadd.f32 %v5744_v29, %v11052_v42  ;;  %v5785_v46 = vpop.f32.mrf.mxu0  ;;  %7209 = vmatmul.mubr.bf16.vlgmr.msra.gmra.mxu0 %v6811_v35  ;;  %v9663_v42 = vld [vmem:[%s11184_s7 + $0x38] sm:$0xff]   ;;  %v7238_v29 = vrot.slane %v7221_v31, %v7237_v23 }
 0x544   :  { %v5794_v53 = vadd.f32 %v5785_v46, %v11056_v62  ;;  %v5746_v43 = vpop.f32.mrf.mxu1  ;;  %v9664_v62 = vld [vmem:[%s11184_s7 + $0x70] sm:$0xff]   ;;  %8505 = vmatpush3.bf16.msra.mxu1 %v9663_v42 }
 0x545   :  { %v5793_v60 = vadd.f32 %v5746_v43, %v11059_v32  ;;  %v5787_v39 = vpop.f32.mrf.mxu0  ;;  %v9665_v32 = vld [vmem:[%s11184_s7 + $0x30] sm:$0xff]   ;;  %8506 = vmatprep.subr.bf16.mxu1 %v9664_v62 }
 0x546   :  { %v5795_v25 = vadd.f32 %v5787_v39, %v11062_v26  ;;  %v5748_v30 = vpop.f32.mrf.mxu1  ;;  %v9666_v26 = vld [vmem:[%s11184_s7 + $0x68] sm:$0xff]  }
 0x547   :  { %v5789_v41 = vpop.f32.mrf.mxu0 }
 0x548   :  { %v5749_v44 = vpop.f32.mrf.mxu1  ;;  %8507 = vmatpush3.bf16.msra.mxu1 %v9665_v32  ;;  %v9680_v32 = vld [vmem:[%s11184_s7 + $0xf0] sm:$0xff]  }
 0x549   :  { %v5790_v59 = vpop.f32.mrf.mxu0  ;;  %8508 = vmatprep.subr.bf16.mxu1 %v9666_v26 }
 0x54c   :  { %8509 = vmatpush3.bf16.msra.mxu1 %v9667_v12  ;;  %v9681_v12 = vld [vmem:[%s11184_s7 + $0xb0] sm:$0xff]  }
 0x54d   :  { %8510 = vmatprep.subr.bf16.mxu1 %v9668_v5  ;;  %v9682_v5 = vld [vmem:[%s11184_s7 + $0xe8] sm:$0xff]  }
 0x550   :  { %8511 = vmatpush3.bf16.msra.mxu1 %v9669_v61  ;;  %v9683_v61 = vld [vmem:[%s11184_s7 + $0xa8] sm:$0xff]  }
 0x551   :  { %8512 = vmatprep.subr.bf16.mxu1 %v9670_v50  ;;  %v9684_v50 = vld [vmem:[%s11184_s7 + $0xe0] sm:$0xff]  }
 0x554   :  { %8513 = vmatpush3.bf16.msra.mxu1 %v9671_v57  ;;  %v9685_v57 = vld [vmem:[%s11184_s7 + $0xa0] sm:$0xff]  }
 0x555   :  { %8514 = vmatprep.subr.bf16.mxu1 %v9672_v24  ;;  %v9686_v24 = vld [vmem:[%s11184_s7 + $0xd8] sm:$0xff]  }
 0x558   :  { %8515 = vmatpush3.bf16.msra.mxu1 %v9673_v27  ;;  %v7233_v27 = vsub.s32 2, %v10896_v14  ;;  %v9691_v14 = vld [vmem:[%s11184_s7 + $0x88] sm:$0xff]  }
 0x559   :  { %8516 = vmatprep.subr.bf16.mxu1 %v9674_v0  ;;  %v9692_v0 = vld [vmem:[%s11184_s7 + $0xc0] sm:$0xff]  }
 0x55c   :  { %8517 = vmatpush3.bf16.msra.mxu1 %v9675_v49 }
 0x55d   :  { %8518 = vmatprep.subr.bf16.mxu1 %v9676_v13 }
 0x560   :  { %8519 = vmatpush3.bf16.msra.mxu1 %v9677_v45 }
 0x561   :  { %8526 = vmatprep.subr.bf16.mxu1 %v9678_v34  ;;  %v8471_v34 = vld [vmem:[#allocation12] ss:$0 sm:$0xff] }
 0x582   :  { %v6221_v21 = vpop.f32.mrf.mxu1 }
 0x583   :  { %v6269_v20 = vadd.f32 %v6221_v21, %v5792_v19  ;;  %v6262_v63 = vpop.f32.mrf.mxu0  ;;  %v9687_v21 = vld [vmem:[%s11184_s7 + $0x98] sm:$0xff]  }
 0x584   :  { %v6271_v36 = vadd.f32 %v6262_v63, %v5794_v53  ;;  %v6223_v7 = vpop.f32.mrf.mxu1  ;;  %v9689_v63 = vld [vmem:[%s11184_s7 + $0x90] sm:$0xff]  }
 0x585   :  { %v6270_v52 = vadd.f32 %v6223_v7, %v5793_v60  ;;  %v6264_v37 = vpop.f32.mrf.mxu0  ;;  %v7234_v7 = vrot.slane %v7221_v31, %v7233_v27 }
 0x586   :  { %v6272_v2 = vadd.f32 %v6264_v37, %v5795_v25  ;;  %v6225_v10 = vpop.f32.mrf.mxu1 }
 0x587   :  { %v6266_v1 = vpop.f32.mrf.mxu0 }
 0x588   :  { %v6226_v40 = vpop.f32.mrf.mxu1 }
 0x589   :  { %v6267_v54 = vpop.f32.mrf.mxu0 }
 0x5c2   :  { %v6692_v51 = vpop.f32.mrf.mxu1 }
 0x5c3   :  { %v6740_v48 = vadd.f32 %v6692_v51, %v6269_v20  ;;  %v6733_v16 = vpop.f32.mrf.mxu0  ;;  %v9688_v20 = vld [vmem:[%s11184_s7 + $0xd0] sm:$0xff]  }
 0x5c4   :  { %v6742_v18 = vadd.f32 %v6733_v16, %v6271_v36  ;;  %v6694_v8 = vpop.f32.mrf.mxu1 }
 0x5c5   :  { %v6735_v56 = vpop.f32.mrf.mxu0  ;;  %v6741_v17 = vadd.f32 %v6694_v8, %v6270_v52  ;;  %v9690_v52 = vld [vmem:[%s11184_s7 + $0xc8] sm:$0xff]  }
 0x5c6   :  { %v6696_v11 = vpop.f32.mrf.mxu1  ;;  %v6743_v55 = vadd.f32 %v6735_v56, %v6272_v2  ;;  %v9693_v2 = vld [vmem:[%s11184_s7 + $0x80] sm:$0xff]  }
 0x5c7   :  { %v6737_v38 = vpop.f32.mrf.mxu0 }
 0x5c8   :  { %v6697_v15 = vpop.f32.mrf.mxu1 }
 0x5c9   :  { %v6738_v33 = vpop.f32.mrf.mxu0 }
 0x602   :  { %v7169_v47 = vpop.f32.mrf.mxu1 }
 0x603   :  { %v7217_v28 = vadd.f32 %v7169_v47, %v6740_v48  ;;  %v7210_v58 = vpop.f32.mrf.mxu0 }
 0x604   :  { %v7171_v35 = vpop.f32.mrf.mxu1  ;;  %v7219_v36 = vadd.f32 %v7210_v58, %v6742_v18 }
 0x605   :  { %v7243_v19 = vadd.f32 %v7226_v9, %v7217_v28  ;;  %v7218_v46 = vadd.f32 %v7171_v35, %v6741_v17  ;;  %v7212_v53 = vpop.f32.mrf.mxu0 }
 0x606   :  { %v7220_v43 = vadd.f32 %v7212_v53, %v6743_v55  ;;  %v7173_v60 = vpop.f32.mrf.mxu1  ;;  %v7245_v37 = vadd.f32 %v7234_v7, %v7219_v36 }
 0x607   :  { %v7244_v39 = vadd.f32 %v7230_v22, %v7218_v46  ;;  %v7214_v25 = vpop.f32.mrf.mxu0  ;;  %v7247_v30 = vmax.f32 %v7243_v19, 0.0 }
 0x608   :  { %v7246_v41 = vadd.f32 %v7238_v29, %v7220_v43  ;;  %v7174_v3 = vpop.f32.mrf.mxu1  ;;  %v7249_v10 = vmax.f32 %v7245_v37, 0.0 }
 0x609   :  { %v7248_v44 = vmax.f32 %v7244_v39, 0.0  ;;  %v7215_v59 = vpop.f32.mrf.mxu0  ;;  %v7251_v62 = vpack.c.bf16 %v7247_v30, %v7247_v30 }
 0x60a   :  { %v7250_v4 = vmax.f32 %v7246_v41, 0.0  ;;  %v7253_v49 = vpack.c.bf16 %v7249_v10, %v7249_v10 }
 0x60b   :  { %v7252_v42 = vpack.c.bf16 %v7248_v44, %v7248_v44 }
 0x60c   :  { %v7254_v26 = vpack.c.bf16 %v7250_v4, %v7250_v4 }
 0x60d   :  { %7550 = vmatprep.mubr.bf16.mxu1 %v7252_v42 }
 0x60e   :  { %7551 = vmatmul.mubr.bf16.vlgmr.msra.gmra.mxu1 %v7251_v62 }
 0x60f   :  { %8527 = vmatpush3.bf16.msra.mxu1 %v9679_v6  ;;  %7590 = vmatprep.mubr.bf16.mxu1 %v7254_v26 }
 0x610   :  { %8528 = vmatprep.subr.bf16.mxu1 %v9680_v32 }
 0x613   :  { %8529 = vmatpush3.bf16.msra.mxu1 %v9681_v12 }
 0x614   :  { %8530 = vmatprep.subr.bf16.mxu1 %v9682_v5 }
 0x617   :  { %8531 = vmatpush3.bf16.msra.mxu1 %v9683_v61 }
 0x618   :  { %8532 = vmatprep.subr.bf16.mxu1 %v9684_v50 }
 0x61b   :  { %8533 = vmatpush3.bf16.msra.mxu1 %v9685_v57 }
 0x61c   :  { %8534 = vmatprep.subr.bf16.mxu1 %v9686_v24 }
 0x61f   :  { %8535 = vmatpush3.bf16.msra.mxu1 %v9687_v21 }
 0x620   :  { %8536 = vmatprep.subr.bf16.mxu1 %v9688_v20 }
 0x623   :  { %8537 = vmatpush3.bf16.msra.mxu1 %v9689_v63 }
 0x624   :  { %8538 = vmatprep.subr.bf16.mxu1 %v9690_v52 }
 0x627   :  { %8539 = vmatpush3.bf16.msra.mxu1 %v9691_v14 }
 0x628   :  { %8540 = vmatprep.subr.bf16.mxu1 %v9692_v0 }
 0x62b   :  { %8541 = vmatpush3.bf16.msra.mxu1 %v9693_v2 }
 0x62e   :  { %7591 = vmatmul.mubr.bf16.vlgmr.msra.gmra.mxu1 %v7253_v49 }
 0x6ce   :  { %v8520_v1 = vpop.f32.mrf.mxu1 }
 0x6d0   :  { %v8521_v40 = vpop.f32.mrf.mxu1 }
 0x6d1   :  { %v8522_v45 = vadd.f32 %v8521_v40, %v8520_v1 }
 0x6d2   :  { %v8523_v54 = vpop.f32.mrf.mxu1 }
 0x6d3   :  { %v7553_v16 = vadd.f32 %v8522_v45, %v8471_v34 }
 0x6d4   :  { %v8524_v13 = vpop.f32.mrf.mxu1 }
 0x6ee   :  { %v8542_v51 = vpop.f32.mrf.mxu1 }
 0x6f0   :  { %v8543_v48 = vpop.f32.mrf.mxu1 }
 0x6f1   :  { %v8544_v18 = vadd.f32 %v8543_v48, %v8542_v51 }
 0x6f2   :  { %v8545_v8 = vpop.f32.mrf.mxu1 }
 0x6f3   :  { %v7593_v56 = vadd.f32 %v8544_v18, %v7553_v16 }
 0x6f4   :  { %v8546_v11 = vpop.f32.mrf.mxu1 }
 0x6f5   :  { %v7599_v38 = vsel %vm7598_vm3, %v7593_v56, -inf }
 0x6f6   :  { %7600 = vmax.xlane.f32.xlu0 %v7599_v38 }
 0x77f   :  { %v7601_v15 = vpop.xlane.xlu0 %7600 }
 0x780   :  { %v7602_v33 = vsub.f32 %v7593_v56, %v7601_v15 }
 0x782   :  { %v7603_v31 = vmul.f32 1.442695, %v7602_v33 }
 0x784   :  { %9694 = vpow2.f32 %v7603_v31 }
 0x791   :  { %v9695_v23 = vpop.eup %9694 }
 0x792   :  { %v7605_v9 = vsel %vm7598_vm3, %v9695_v23, 0.0 }
 0x793   :  { %7606 = vadd.xlane.f32.xlu0 %v7605_v9 }
 0x81c   :  { %v7607_v47 = vpop.xlane.xlu0 %7606 }
 0x81d   :  { %9696 = vlog2.f32 %v7607_v47 }
 0x82a   :  { %v9697_v17 = vpop.eup %9696 }
 0x82b   :  { %v7609_v28 = vmul.f32 0.6931472, %v9697_v17 }
 0x82d   :  { %v7610_v58 = vsub.f32 %v7602_v33, %v7609_v28 }
 0x82f   :  { %7611 = vst.msk [vmem:[%s11186_s9] sm:$0xff] %vm7598_vm3, %v7610_v58 }
 0x830   :  { %7616 = vsyncpa [#allocation3], 1 }
 0x831   :  { %7617 = vsyncpa [#allocation5], 1 }
 0x832   :  { %7618 = vsyncpa [#allocation8], 1 }
 0x833   :  { %7619 = vsyncpa [#allocation11], 1 }

</bundles_post_ra>
